<compile_context>
chip_gen: v7x
topology: tpu7x:2x2x1
jax: 0.10.0
libtpu: 0.0.40
codegen_flags: <defaults>
</compile_context>

<pallas_src>
import functools
import numpy as np
import jax
import jax.numpy as jnp
from jax import lax
from jax.experimental import pallas as pl
from jax.experimental.pallas import tpu as pltpu

_LANE = 128


def _round_up(x, m):
    return ((x + m - 1) // m) * m


# ----------------------------------------------------------------------------
# Host-side: separable bilinear-resize operators (align_corners=True)
# ----------------------------------------------------------------------------
def _interp_matrix_1d(out_size, in_size):
    """1-D interpolation matrix for bilinear resize with align_corners=True."""
    m = np.zeros((out_size, in_size), dtype=np.float64)
    if out_size == 1 or in_size == 1:
        m[:, 0] = 1.0
        return m
    src = np.arange(out_size, dtype=np.float64) * (in_size - 1) / (out_size - 1)
    p0 = np.clip(np.floor(src).astype(np.int64), 0, in_size - 1)
    p1 = np.minimum(p0 + 1, in_size - 1)
    frac = src - p0
    rows = np.arange(out_size)
    np.add.at(m, (rows, p0), 1.0 - frac)
    np.add.at(m, (rows, p1), frac)
    return m


@functools.lru_cache(maxsize=None)
def _resize_ops_np(Hh, Wh, Hl, Wl, Wpad):
    """Separable resize operators with the dilated-conv zero padding baked in.

    rx_pad : (Wpad, Wl)  -- width resize; rows [2, 2+Wh) = Rx, others zero
                            (the zero rows ARE the conv's horizontal padding).
    ry_halo: (Hh+8, Hl)  -- height resize; rows [2, 2+Hh) = Ry, others zero
                            (zero rows give the vertical padding; the extra
                            rows let every row-tile slice a fixed-size band).
    """
    ry = _interp_matrix_1d(Hh, Hl)
    rx = _interp_matrix_1d(Wh, Wl)
    rx_pad = np.zeros((Wpad, Wl), np.float32)
    rx_pad[2:2 + Wh] = rx
    ry_halo = np.zeros((Hh + 8, Hl), np.float32)
    ry_halo[2:2 + Hh] = ry
    return rx_pad, ry_halo


def _pick_tile_h(Hh, Wh, Wpad):
    """Row-tile height: keeps per-tile VMEM bounded (v7x: 64 MiB) while the
    conv matmul M (= TH*Wpad) stays >= ~2K rows so the 256-wide MXUs are fed."""
    if Hh * Wpad <= 4096:
        return Hh                          # small maps: one tile is plenty
    for th in range(1, Hh + 1):
        if Hh % th or (th * Wh) % 16:      # 16: bf16 block sublane alignment
            continue
        if th * Wpad >= 2048:
            return th
    return Hh


# ----------------------------------------------------------------------------
# Pallas kernel: one (sample, row-tile) step of the fused CFF forward
# ----------------------------------------------------------------------------
def _cff_kernel(TH, Wh, Wpad,
                xlw_ref, xhigh_ref, ry_ref, wlow_ref,
                bnl_s_ref, bnl_b_ref, whigh_ref, bnh_s_ref, bnh_b_ref,
                wcls_ref, out_ref, cls_ref):
    t = pl.program_id(1)
    BH = TH + 5                      # tile rows + 4 halo/padding rows + 1 slack
    Clp = wlow_ref.shape[1]
    Coutp = wlow_ref.shape[2]
    M = TH * Wpad

    # ---- height half of the separable bilinear resize (one MXU matmul) ----
    # ry's zero rows supply the conv's vertical zero padding and the +/-2-row
    # halo of this tile, so no scratch zero-fill is needed at all.
    row0 = t * TH
    if TH % 8 == 0:
        row0 = pl.multiple_of(row0, 8)
    ry_band = ry_ref[pl.ds(row0, BH), :].astype(jnp.bfloat16)       # (BH, Hl)
    band = jnp.dot(ry_band, xlw_ref[0],
                   preferred_element_type=jnp.float32)              # (BH, Wpad*Clp)

    # Flat, already zero-padded map: row (b*Wpad + w), channels on lanes.
    padflat = band.reshape(BH * Wpad, Clp).astype(jnp.bfloat16)

    # ---- 3x3 conv, dilation=2: 9 accumulated matmuls (no concat temps) ----
    # Tap (ky, kx) of output (i, j) lives at flat row (i + 2*ky)*Wpad + j + 2*kx,
    # so every tap is a plain row-offset slice of padflat.  Columns j >= Wh are
    # junk and are stripped once after the accumulation.
    acc = None
    for k in range(9):
        ky, kx = divmod(k, 3)
        off = 2 * ky * Wpad + 2 * kx
        tap = padflat[off:off + M]                                   # (M, Clp)
        part = jnp.dot(tap, wlow_ref[k],
                       preferred_element_type=jnp.float32)           # (M, Coutp)
        acc = part if acc is None else acc + part

    # strip the Wpad->Wh junk columns once, then folded BN + ReLU (f32 VPU).
    acc = acc.reshape(TH, Wpad, Coutp)[:, :Wh, :].reshape(TH * Wh, Coutp)
    x_low = jnp.maximum(acc * bnl_s_ref[...] + bnl_b_ref[...], 0.0)

    # ---- conv_high: 1x1 conv == channel matmul, then folded BN + ReLU -----
    xh = jnp.dot(xhigh_ref[0], whigh_ref[...],
                 preferred_element_type=jnp.float32)                 # (TH*Wh, Coutp)
    x_high = jnp.maximum(xh * bnh_s_ref[...] + bnh_b_ref[...], 0.0)

    # ---- fuse + classifier head (1x1 conv, no bias) on conv_low branch ----
    out_ref[0] = jnp.maximum(x_low + x_high, 0.0)
    cls = jnp.dot(x_low.astype(jnp.bfloat16), wcls_ref[...],
                  preferred_element_type=jnp.float32)
    cls_ref[0] = cls.astype(cls_ref.dtype)


# ----------------------------------------------------------------------------
# Wrapper: layout transforms, channel/lane padding, pallas_call
# ----------------------------------------------------------------------------
def _pad_last(x, target):
    pad = target - x.shape[-1]
    if pad == 0:
        return x
    return jnp.pad(x, [(0, 0)] * (x.ndim - 1) + [(0, pad)])


def _cff_forward(x_low, x_high, params, tile_h=None):
    N, Cl, Hl, Wl = x_low.shape
    _, Ch, Hh, Wh = x_high.shape
    Cout = params["w_low"].shape[0]
    nclass = params["w_cls"].shape[0]
    Lh = Hh * Wh

    Clp = _round_up(Cl, _LANE)
    Chp = _round_up(Ch, _LANE)
    Coutp = _round_up(Cout, _LANE)
    Nclsp = _round_up(nclass, _LANE)
    Wpad = _round_up(Wh + 4, 8)

    TH = _pick_tile_h(Hh, Wh, Wpad) if tile_h is None else int(tile_h)
    if Hh % TH or (TH != Hh and (TH * Wh) % 16):
        raise ValueError("tile_h must divide Hh and keep TH*Wh 16-aligned")
    T = Hh // TH
    BH = TH + 5

    rx_pad_np, ry_halo_np = _resize_ops_np(Hh, Wh, Hl, Wl, Wpad)
    rx_pad = jnp.asarray(rx_pad_np)                     # (Wpad, Wl) f32
    ry_halo = jnp.asarray(ry_halo_np)                   # (Hh+8, Hl) f32

    # --- input prep (tiny XLA ops) ------------------------------------------
    # width half of the resize (+ horizontal conv padding) on the low-res map;
    # channels land on lanes so every in-kernel matmul is lane-dense bf16.
    xl = jnp.transpose(x_low, (0, 2, 3, 1)).astype(jnp.float32)      # (N,Hl,Wl,Cl)
    xl = jnp.einsum("wq,npqc->npwc", rx_pad, xl)                     # (N,Hl,Wpad,Cl)
    xl = _pad_last(xl, Clp).reshape(N, Hl, Wpad * Clp).astype(jnp.bfloat16)

    xh = _pad_last(jnp.transpose(x_high, (0, 2, 3, 1)).reshape(N, Lh, Ch),
                   Chp).astype(jnp.bfloat16)                         # (N,Lh,Chp)

    # --- weights / folded BN, channel-padded, bf16 for the MXU --------------
    w_low = jnp.transpose(params["w_low"], (2, 3, 1, 0)).reshape(9, Cl, Cout)
    w_low = jnp.pad(w_low, ((0, 0), (0, Clp - Cl),
                            (0, Coutp - Cout))).astype(jnp.bfloat16)  # (9,Clp,Coutp)
    w_high = jnp.pad(params["w_high"][:, :, 0, 0].T,
                     ((0, Chp - Ch), (0, Coutp - Cout))).astype(jnp.bfloat16)
    w_cls = jnp.pad(params["w_cls"][:, :, 0, 0].T,
                    ((0, Coutp - Cout), (0, Nclsp - nclass))).astype(jnp.bfloat16)
    bnl_s = jnp.pad(params["scale_low"], (0, Coutp - Cout)).reshape(1, Coutp)
    bnl_b = jnp.pad(params["bias_low"], (0, Coutp - Cout)).reshape(1, Coutp)
    bnh_s = jnp.pad(params["scale_high"], (0, Coutp - Cout)).reshape(1, Coutp)
    bnh_b = jnp.pad(params["bias_high"], (0, Coutp - Cout)).reshape(1, Coutp)

    # --- VMEM budget, capped against the hardware capacity (v7x: 64 MiB) ----
    try:
        vmem_cap = int(pltpu.get_tpu_info().vmem_capacity_bytes)
    except Exception:                                    # pragma: no cover
        vmem_cap = 64 * 1024 * 1024
    est = (2 * Hl * Wpad * Clp * 2                       # x_low blocks (bf16, 2x)
           + 2 * TH * Wh * (Chp * 2 + Coutp * 4 + Nclsp * 2)  # xh/out/cls blocks
           + (Hh + 8) * Hl * 4                           # ry (Buffered(1))
           + (9 * Clp + Chp + Nclsp) * Coutp * 2         # weights (Buffered(1))
           + 4 * Coutp * 4                               # folded BN vectors
           + BH * Wpad * Clp * 6                         # band f32 + padflat bf16
           + TH * Wpad * (Clp * 4 + Coutp * 8)           # live taps + accumulator
           + TH * Wh * (Coutp * 16 + Nclsp * 4))         # branch/fuse/cls temps
    vmem_limit = int(min(max(est + (8 << 20), 24 << 20), int(0.85 * vmem_cap)))

    kernel = functools.partial(_cff_kernel, TH, Wh, Wpad)
    const1 = pl.Buffered(1)          # grid-invariant operands: no double-buffer

    out, cls = pl.pallas_call(
        kernel,
        grid=(N, T),
        in_specs=[
            pl.BlockSpec((1, Hl, Wpad * Clp), lambda n, t: (n, 0, 0)),   # x_low (W-resized)
            pl.BlockSpec((1, TH * Wh, Chp), lambda n, t: (n, t, 0)),     # x_high row-tile
            pl.BlockSpec((Hh + 8, Hl), lambda n, t: (0, 0),
                         pipeline_mode=const1),                          # ry_halo
            pl.BlockSpec((9, Clp, Coutp), lambda n, t: (0, 0, 0),
                         pipeline_mode=const1),                          # w_low
            pl.BlockSpec((1, Coutp), lambda n, t: (0, 0),
                         pipeline_mode=const1),                          # bn_low scale
            pl.BlockSpec((1, Coutp), lambda n, t: (0, 0),
                         pipeline_mode=const1),                          # bn_low bias
            pl.BlockSpec((Chp, Coutp), lambda n, t: (0, 0),
                         pipeline_mode=const1),                          # w_high
            pl.BlockSpec((1, Coutp), lambda n, t: (0, 0),
                         pipeline_mode=const1),                          # bn_high scale
            pl.BlockSpec((1, Coutp), lambda n, t: (0, 0),
                         pipeline_mode=const1),                          # bn_high bias
            pl.BlockSpec((Coutp, Nclsp), lambda n, t: (0, 0),
                         pipeline_mode=const1),                          # w_cls
        ],
        out_specs=(
            pl.BlockSpec((1, TH * Wh, Coutp), lambda n, t: (n, t, 0)),
            pl.BlockSpec((1, TH * Wh, Nclsp), lambda n, t: (n, t, 0)),
        ),
        out_shape=(
            jax.ShapeDtypeStruct((N, Lh, Coutp), jnp.float32),
            jax.ShapeDtypeStruct((N, Lh, Nclsp), jnp.bfloat16),
        ),
        compiler_params=pltpu.CompilerParams(
            dimension_semantics=("parallel", "parallel"),
            vmem_limit_bytes=vmem_limit),
    )(xl, xh, ry_halo, w_low, bnl_s, bnl_b, w_high, bnh_s, bnh_b, w_cls)

    # strip lane padding, back to NCHW (downstream consumers could instead
    # keep the lane-dense channels-last slabs and skip this re-layout).
    x_out = jnp.transpose(out[:, :, :Cout].reshape(N, Hh, Wh, Cout),
                          (0, 3, 1, 2))
    x_cls = jnp.transpose(
        cls[:, :, :nclass].astype(jnp.float32).reshape(N, Hh, Wh, nclass),
        (0, 3, 1, 2))
    return x_out, x_cls


cascade_feature_fusion = jax.jit(_cff_forward, static_argnames=("tile_h",))


# ----------------------------------------------------------------------------
# Pure-JAX reference (NCHW) for correctness checking
# ----------------------------------------------------------------------------
def cff_reference(x_low, x_high, params):
    N, Cl, Hl, Wl = x_low.shape
    _, Ch, Hh, Wh = x_high.shape
    Ry = jnp.asarray(_interp_matrix_1d(Hh, Hl), dtype=jnp.float32)
    Rx = jnp.asarray(_interp_matrix_1d(Wh, Wl), dtype=jnp.float32)
    xl = jnp.einsum("ip,jq,ncpq->ncij", Ry, Rx, x_low)

    y = lax.conv_general_dilated(
        xl, params["w_low"], window_strides=(1, 1),
        padding=((2, 2), (2, 2)), rhs_dilation=(2, 2),
        dimension_numbers=("NCHW", "OIHW", "NCHW"))
    y = y * params["scale_low"][None, :, None, None] + \
        params["bias_low"][None, :, None, None]
    y = jnp.maximum(y, 0.0)

    z = lax.conv_general_dilated(
        x_high, params["w_high"], window_strides=(1, 1), padding="VALID",
        dimension_numbers=("NCHW", "OIHW", "NCHW"))
    z = z * params["scale_high"][None, :, None, None] + \
        params["bias_high"][None, :, None, None]
    z = jnp.maximum(z, 0.0)

    x = jnp.maximum(y + z, 0.0)
    cls = lax.conv_general_dilated(
        y, params["w_cls"], window_strides=(1, 1), padding="VALID",
        dimension_numbers=("NCHW", "OIHW", "NCHW"))
    return x, cls


# ----------------------------------------------------------------------------
# Deterministic parameter init (shapes follow the PyTorch __init__)
# ----------------------------------------------------------------------------
def make_params(low_channels, high_channels, out_channels, nclass, key):
    ks = jax.random.split(key, 12)
    eps = 1e-5

    def fold_bn(gamma, beta, mean, var):
        scale = gamma / jnp.sqrt(var + eps)
        return scale, beta - mean * scale

    w_low = 0.1 * jax.random.normal(ks[0], (out_channels, low_channels, 3, 3), jnp.float32)
    w_high = 0.1 * jax.random.normal(ks[1], (out_channels, high_channels, 1, 1), jnp.float32)
    w_cls = 0.1 * jax.random.normal(ks[2], (nclass, out_channels, 1, 1), jnp.float32)

    g_l = 1.0 + 0.1 * jax.random.normal(ks[3], (out_channels,), jnp.float32)
    b_l = 0.1 * jax.random.normal(ks[4], (out_channels,), jnp.float32)
    m_l = 0.1 * jax.random.normal(ks[5], (out_channels,), jnp.float32)
    v_l = jnp.abs(1.0 + 0.1 * jax.random.normal(ks[6], (out_channels,), jnp.float32))
    g_h = 1.0 + 0.1 * jax.random.normal(ks[7], (out_channels,), jnp.float32)
    b_h = 0.1 * jax.random.normal(ks[8], (out_channels,), jnp.float32)
    m_h = 0.1 * jax.random.normal(ks[9], (out_channels,), jnp.float32)
    v_h = jnp.abs(1.0 + 0.1 * jax.random.normal(ks[10], (out_channels,), jnp.float32))

    scale_low, bias_low = fold_bn(g_l, b_l, m_l, v_l)
    scale_high, bias_high = fold_bn(g_h, b_h, m_h, v_h)
    return dict(w_low=w_low, w_high=w_high, w_cls=w_cls,
                scale_low=scale_low, bias_low=bias_low,
                scale_high=scale_high, bias_high=bias_high)


if __name__ == "__main__":
    # small shapes: low-res feature 8x8, high-res feature 16x16
    N, Cl, Hl, Wl = 2, 4, 8, 8
    Ch, Hh, Wh = 6, 16, 16
    Cout, nclass = 8, 5

    key = jax.random.PRNGKey(0)
    k_in_low, k_in_high, k_par = jax.random.split(key, 3)
    x_low = jax.random.normal(k_in_low, (N, Cl, Hl, Wl), jnp.float32)
    x_high = jax.random.normal(k_in_high, (N, Ch, Hh, Wh), jnp.float32)
    params = make_params(Cl, Ch, Cout, nclass, k_par)

    ref_out, ref_cls = cff_reference(x_low, x_high, params)

    # run once with the auto tile (single row-tile at this size) and once with
    # an explicit 2-way row split to exercise the tiled / halo code path.
    for th in (None, 8):
        x_out, x_cls = cascade_feature_fusion(x_low, x_high, params, tile_h=th)
        jax.block_until_ready((x_out, x_cls))
        np.testing.assert_allclose(np.asarray(x_out), np.asarray(ref_out),
                                   rtol=3e-2, atol=3e-2)
        np.testing.assert_allclose(np.asarray(x_cls), np.asarray(ref_cls),
                                   rtol=3e-2, atol=3e-2)

    print("KERNEL_OK")
</pallas_src>

<mosaic_0001>
module attributes {stable_mosaic.version = 11 : i64} {
  func.func @_cff_kernel(%arg0: i32, %arg1: i32, %arg2: memref<1x8x3072xbf16, #tpu.memory_space<vmem>>, %arg3: memref<1x256x128xbf16, #tpu.memory_space<vmem>>, %arg4: memref<24x8xf32, #tpu.memory_space<vmem>>, %arg5: memref<9x128x128xbf16, #tpu.memory_space<vmem>>, %arg6: memref<1x128xf32, #tpu.memory_space<vmem>>, %arg7: memref<1x128xf32, #tpu.memory_space<vmem>>, %arg8: memref<128x128xbf16, #tpu.memory_space<vmem>>, %arg9: memref<1x128xf32, #tpu.memory_space<vmem>>, %arg10: memref<1x128xf32, #tpu.memory_space<vmem>>, %arg11: memref<128x128xbf16, #tpu.memory_space<vmem>>, %arg12: memref<1x256x128xf32, #tpu.memory_space<vmem>>, %arg13: memref<1x256x128xbf16, #tpu.memory_space<vmem>>) attributes {dimension_semantics = [#tpu.dimension_semantics<parallel>, #tpu.dimension_semantics<parallel>], iteration_bounds = array<i64: 2, 1>, scalar_prefetch = 0 : i64, scratch_operands = 0 : i64, tpu.core_type = #tpu.core_type<tc>, window_params = [{transform_indices = @transform_0, window_bounds = array<i64: 1, 8, 3072>}, {transform_indices = @transform_1, window_bounds = array<i64: 1, 256, 128>}, {pipeline_mode = #tpu.pipeline_mode<synchronous>, transform_indices = @transform_2, window_bounds = array<i64: 24, 8>}, {pipeline_mode = #tpu.pipeline_mode<synchronous>, transform_indices = @transform_3, window_bounds = array<i64: 9, 128, 128>}, {pipeline_mode = #tpu.pipeline_mode<synchronous>, transform_indices = @transform_4, window_bounds = array<i64: 1, 128>}, {pipeline_mode = #tpu.pipeline_mode<synchronous>, transform_indices = @transform_5, window_bounds = array<i64: 1, 128>}, {pipeline_mode = #tpu.pipeline_mode<synchronous>, transform_indices = @transform_6, window_bounds = array<i64: 128, 128>}, {pipeline_mode = #tpu.pipeline_mode<synchronous>, transform_indices = @transform_7, window_bounds = array<i64: 1, 128>}, {pipeline_mode = #tpu.pipeline_mode<synchronous>, transform_indices = @transform_8, window_bounds = array<i64: 1, 128>}, {pipeline_mode = #tpu.pipeline_mode<synchronous>, transform_indices = @transform_9, window_bounds = array<i64: 128, 128>}, {transform_indices = @transform_10, window_bounds = array<i64: 1, 256, 128>}, {transform_indices = @transform_11, window_bounds = array<i64: 1, 256, 128>}]} {
    %c16_i32 = arith.constant 16 : i32
    %0 = arith.muli %arg1, %c16_i32 : i32
    %1 = tpu.assume_multiple %0, 8 : i32
    %2 = arith.index_cast %1 : i32 to index
    %c0 = arith.constant 0 : index
    %3 = vector.load %arg4[%2, %c0] : memref<24x8xf32, #tpu.memory_space<vmem>>, vector<21x8xf32>
    %4 = arith.truncf %3 : vector<21x8xf32> to vector<21x8xbf16>
    %c0_0 = arith.constant 0 : index
    %c0_1 = arith.constant 0 : index
    %c0_2 = arith.constant 0 : index
    %5 = vector.load %arg2[%c0_0, %c0_1, %c0_2] : memref<1x8x3072xbf16, #tpu.memory_space<vmem>>, vector<1x8x3072xbf16>
    %6 = vector.shape_cast %5 : vector<1x8x3072xbf16> to vector<8x3072xbf16>
    %cst = arith.constant dense<0.000000e+00> : vector<21x3072xf32>
    %7 = tpu.matmul %4, %6, %cst {dimension_numbers = #tpu.dot_dimension_numbers<[1], [0], [0], [1], [0, 0, 1, 1], [], []>} : vector<21x8xbf16>, vector<8x3072xbf16>, vector<21x3072xf32> -> vector<21x3072xf32>
    %8 = vector.shape_cast %7 : vector<21x3072xf32> to vector<504x128xf32>
    %9 = arith.truncf %8 : vector<504x128xf32> to vector<504x128xbf16>
    %10 = vector.extract_strided_slice %9 {offsets = [0, 0], sizes = [384, 128], strides = [1, 1]} : vector<504x128xbf16> to vector<384x128xbf16>
    %c0_3 = arith.constant 0 : index
    %c0_4 = arith.constant 0 : index
    %c0_5 = arith.constant 0 : index
    %11 = vector.load %arg5[%c0_3, %c0_4, %c0_5] : memref<9x128x128xbf16, #tpu.memory_space<vmem>>, vector<1x128x128xbf16>
    %12 = vector.shape_cast %11 : vector<1x128x128xbf16> to vector<128x128xbf16>
    %cst_6 = arith.constant dense<0.000000e+00> : vector<384x128xf32>
    %13 = tpu.matmul %10, %12, %cst_6 {dimension_numbers = #tpu.dot_dimension_numbers<[1], [0], [0], [1], [0, 0, 1, 1], [], []>} : vector<384x128xbf16>, vector<128x128xbf16>, vector<384x128xf32> -> vector<384x128xf32>
    %14 = vector.extract_strided_slice %9 {offsets = [2, 0], sizes = [384, 128], strides = [1, 1]} : vector<504x128xbf16> to vector<384x128xbf16>
    %c1 = arith.constant 1 : index
    %c0_7 = arith.constant 0 : index
    %c0_8 = arith.constant 0 : index
    %15 = vector.load %arg5[%c1, %c0_7, %c0_8] : memref<9x128x128xbf16, #tpu.memory_space<vmem>>, vector<1x128x128xbf16>
    %16 = vector.shape_cast %15 : vector<1x128x128xbf16> to vector<128x128xbf16>
    %cst_9 = arith.constant dense<0.000000e+00> : vector<384x128xf32>
    %17 = tpu.matmul %14, %16, %cst_9 {dimension_numbers = #tpu.dot_dimension_numbers<[1], [0], [0], [1], [0, 0, 1, 1], [], []>} : vector<384x128xbf16>, vector<128x128xbf16>, vector<384x128xf32> -> vector<384x128xf32>
    %18 = arith.addf %13, %17 : vector<384x128xf32>
    %19 = vector.extract_strided_slice %9 {offsets = [4, 0], sizes = [384, 128], strides = [1, 1]} : vector<504x128xbf16> to vector<384x128xbf16>
    %c2 = arith.constant 2 : index
    %c0_10 = arith.constant 0 : index
    %c0_11 = arith.constant 0 : index
    %20 = vector.load %arg5[%c2, %c0_10, %c0_11] : memref<9x128x128xbf16, #tpu.memory_space<vmem>>, vector<1x128x128xbf16>
    %21 = vector.shape_cast %20 : vector<1x128x128xbf16> to vector<128x128xbf16>
    %cst_12 = arith.constant dense<0.000000e+00> : vector<384x128xf32>
    %22 = tpu.matmul %19, %21, %cst_12 {dimension_numbers = #tpu.dot_dimension_numbers<[1], [0], [0], [1], [0, 0, 1, 1], [], []>} : vector<384x128xbf16>, vector<128x128xbf16>, vector<384x128xf32> -> vector<384x128xf32>
    %23 = arith.addf %18, %22 : vector<384x128xf32>
    %24 = vector.extract_strided_slice %9 {offsets = [48, 0], sizes = [384, 128], strides = [1, 1]} : vector<504x128xbf16> to vector<384x128xbf16>
    %c3 = arith.constant 3 : index
    %c0_13 = arith.constant 0 : index
    %c0_14 = arith.constant 0 : index
    %25 = vector.load %arg5[%c3, %c0_13, %c0_14] : memref<9x128x128xbf16, #tpu.memory_space<vmem>>, vector<1x128x128xbf16>
    %26 = vector.shape_cast %25 : vector<1x128x128xbf16> to vector<128x128xbf16>
    %cst_15 = arith.constant dense<0.000000e+00> : vector<384x128xf32>
    %27 = tpu.matmul %24, %26, %cst_15 {dimension_numbers = #tpu.dot_dimension_numbers<[1], [0], [0], [1], [0, 0, 1, 1], [], []>} : vector<384x128xbf16>, vector<128x128xbf16>, vector<384x128xf32> -> vector<384x128xf32>
    %28 = arith.addf %23, %27 : vector<384x128xf32>
    %29 = vector.extract_strided_slice %9 {offsets = [50, 0], sizes = [384, 128], strides = [1, 1]} : vector<504x128xbf16> to vector<384x128xbf16>
    %c4 = arith.constant 4 : index
    %c0_16 = arith.constant 0 : index
    %c0_17 = arith.constant 0 : index
    %30 = vector.load %arg5[%c4, %c0_16, %c0_17] : memref<9x128x128xbf16, #tpu.memory_space<vmem>>, vector<1x128x128xbf16>
    %31 = vector.shape_cast %30 : vector<1x128x128xbf16> to vector<128x128xbf16>
    %cst_18 = arith.constant dense<0.000000e+00> : vector<384x128xf32>
    %32 = tpu.matmul %29, %31, %cst_18 {dimension_numbers = #tpu.dot_dimension_numbers<[1], [0], [0], [1], [0, 0, 1, 1], [], []>} : vector<384x128xbf16>, vector<128x128xbf16>, vector<384x128xf32> -> vector<384x128xf32>
    %33 = arith.addf %28, %32 : vector<384x128xf32>
    %34 = vector.extract_strided_slice %9 {offsets = [52, 0], sizes = [384, 128], strides = [1, 1]} : vector<504x128xbf16> to vector<384x128xbf16>
    %c5 = arith.constant 5 : index
    %c0_19 = arith.constant 0 : index
    %c0_20 = arith.constant 0 : index
    %35 = vector.load %arg5[%c5, %c0_19, %c0_20] : memref<9x128x128xbf16, #tpu.memory_space<vmem>>, vector<1x128x128xbf16>
    %36 = vector.shape_cast %35 : vector<1x128x128xbf16> to vector<128x128xbf16>
    %cst_21 = arith.constant dense<0.000000e+00> : vector<384x128xf32>
    %37 = tpu.matmul %34, %36, %cst_21 {dimension_numbers = #tpu.dot_dimension_numbers<[1], [0], [0], [1], [0, 0, 1, 1], [], []>} : vector<384x128xbf16>, vector<128x128xbf16>, vector<384x128xf32> -> vector<384x128xf32>
    %38 = arith.addf %33, %37 : vector<384x128xf32>
    %39 = vector.extract_strided_slice %9 {offsets = [96, 0], sizes = [384, 128], strides = [1, 1]} : vector<504x128xbf16> to vector<384x128xbf16>
    %c6 = arith.constant 6 : index
    %c0_22 = arith.constant 0 : index
    %c0_23 = arith.constant 0 : index
    %40 = vector.load %arg5[%c6, %c0_22, %c0_23] : memref<9x128x128xbf16, #tpu.memory_space<vmem>>, vector<1x128x128xbf16>
    %41 = vector.shape_cast %40 : vector<1x128x128xbf16> to vector<128x128xbf16>
    %cst_24 = arith.constant dense<0.000000e+00> : vector<384x128xf32>
    %42 = tpu.matmul %39, %41, %cst_24 {dimension_numbers = #tpu.dot_dimension_numbers<[1], [0], [0], [1], [0, 0, 1, 1], [], []>} : vector<384x128xbf16>, vector<128x128xbf16>, vector<384x128xf32> -> vector<384x128xf32>
    %43 = arith.addf %38, %42 : vector<384x128xf32>
    %44 = vector.extract_strided_slice %9 {offsets = [98, 0], sizes = [384, 128], strides = [1, 1]} : vector<504x128xbf16> to vector<384x128xbf16>
    %c7 = arith.constant 7 : index
    %c0_25 = arith.constant 0 : index
    %c0_26 = arith.constant 0 : index
    %45 = vector.load %arg5[%c7, %c0_25, %c0_26] : memref<9x128x128xbf16, #tpu.memory_space<vmem>>, vector<1x128x128xbf16>
    %46 = vector.shape_cast %45 : vector<1x128x128xbf16> to vector<128x128xbf16>
    %cst_27 = arith.constant dense<0.000000e+00> : vector<384x128xf32>
    %47 = tpu.matmul %44, %46, %cst_27 {dimension_numbers = #tpu.dot_dimension_numbers<[1], [0], [0], [1], [0, 0, 1, 1], [], []>} : vector<384x128xbf16>, vector<128x128xbf16>, vector<384x128xf32> -> vector<384x128xf32>
    %48 = arith.addf %43, %47 : vector<384x128xf32>
    %49 = vector.extract_strided_slice %9 {offsets = [100, 0], sizes = [384, 128], strides = [1, 1]} : vector<504x128xbf16> to vector<384x128xbf16>
    %c8 = arith.constant 8 : index
    %c0_28 = arith.constant 0 : index
    %c0_29 = arith.constant 0 : index
    %50 = vector.load %arg5[%c8, %c0_28, %c0_29] : memref<9x128x128xbf16, #tpu.memory_space<vmem>>, vector<1x128x128xbf16>
    %51 = vector.shape_cast %50 : vector<1x128x128xbf16> to vector<128x128xbf16>
    %cst_30 = arith.constant dense<0.000000e+00> : vector<384x128xf32>
    %52 = tpu.matmul %49, %51, %cst_30 {dimension_numbers = #tpu.dot_dimension_numbers<[1], [0], [0], [1], [0, 0, 1, 1], [], []>} : vector<384x128xbf16>, vector<128x128xbf16>, vector<384x128xf32> -> vector<384x128xf32>
    %53 = arith.addf %48, %52 : vector<384x128xf32>
    %54 = vector.shape_cast %53 : vector<384x128xf32> to vector<16x24x128xf32>
    %55 = vector.extract_strided_slice %54 {offsets = [0, 0, 0], sizes = [16, 16, 128], strides = [1, 1, 1]} : vector<16x24x128xf32> to vector<16x16x128xf32>
    %56 = vector.shape_cast %55 : vector<16x16x128xf32> to vector<256x128xf32>
    %c0_31 = arith.constant 0 : index
    %c0_32 = arith.constant 0 : index
    %57 = vector.load %arg6[%c0_31, %c0_32] : memref<1x128xf32, #tpu.memory_space<vmem>>, vector<1x128xf32>
    %58 = vector.broadcast %57 : vector<1x128xf32> to vector<256x128xf32>
    %59 = arith.mulf %56, %58 : vector<256x128xf32>
    %c0_33 = arith.constant 0 : index
    %c0_34 = arith.constant 0 : index
    %60 = vector.load %arg7[%c0_33, %c0_34] : memref<1x128xf32, #tpu.memory_space<vmem>>, vector<1x128xf32>
    %61 = vector.broadcast %60 : vector<1x128xf32> to vector<256x128xf32>
    %62 = arith.addf %59, %61 : vector<256x128xf32>
    %cst_35 = arith.constant 0.000000e+00 : f32
    %63 = vector.broadcast %cst_35 : f32 to vector<256x128xf32>
    %64 = arith.maximumf %62, %63 : vector<256x128xf32>
    %c0_36 = arith.constant 0 : index
    %c0_37 = arith.constant 0 : index
    %c0_38 = arith.constant 0 : index
    %65 = vector.load %arg3[%c0_36, %c0_37, %c0_38] : memref<1x256x128xbf16, #tpu.memory_space<vmem>>, vector<1x256x128xbf16>
    %66 = vector.shape_cast %65 : vector<1x256x128xbf16> to vector<256x128xbf16>
    %c0_39 = arith.constant 0 : index
    %c0_40 = arith.constant 0 : index
    %67 = vector.load %arg8[%c0_39, %c0_40] : memref<128x128xbf16, #tpu.memory_space<vmem>>, vector<128x128xbf16>
    %cst_41 = arith.constant dense<0.000000e+00> : vector<256x128xf32>
    %68 = tpu.matmul %66, %67, %cst_41 {dimension_numbers = #tpu.dot_dimension_numbers<[1], [0], [0], [1], [0, 0, 1, 1], [], []>} : vector<256x128xbf16>, vector<128x128xbf16>, vector<256x128xf32> -> vector<256x128xf32>
    %c0_42 = arith.constant 0 : index
    %c0_43 = arith.constant 0 : index
    %69 = vector.load %arg9[%c0_42, %c0_43] : memref<1x128xf32, #tpu.memory_space<vmem>>, vector<1x128xf32>
    %70 = vector.broadcast %69 : vector<1x128xf32> to vector<256x128xf32>
    %71 = arith.mulf %68, %70 : vector<256x128xf32>
    %c0_44 = arith.constant 0 : index
    %c0_45 = arith.constant 0 : index
    %72 = vector.load %arg10[%c0_44, %c0_45] : memref<1x128xf32, #tpu.memory_space<vmem>>, vector<1x128xf32>
    %73 = vector.broadcast %72 : vector<1x128xf32> to vector<256x128xf32>
    %74 = arith.addf %71, %73 : vector<256x128xf32>
    %cst_46 = arith.constant 0.000000e+00 : f32
    %75 = vector.broadcast %cst_46 : f32 to vector<256x128xf32>
    %76 = arith.maximumf %74, %75 : vector<256x128xf32>
    %77 = arith.addf %64, %76 : vector<256x128xf32>
    %cst_47 = arith.constant 0.000000e+00 : f32
    %78 = vector.broadcast %cst_47 : f32 to vector<256x128xf32>
    %79 = arith.maximumf %77, %78 : vector<256x128xf32>
    %c0_48 = arith.constant 0 : index
    %c0_49 = arith.constant 0 : index
    %c0_50 = arith.constant 0 : index
    %80 = vector.load %arg12[%c0_48, %c0_49, %c0_50] : memref<1x256x128xf32, #tpu.memory_space<vmem>>, vector<1x256x128xf32>
    %81 = vector.shape_cast %80 : vector<1x256x128xf32> to vector<256x128xf32>
    %82 = vector.shape_cast %79 : vector<256x128xf32> to vector<1x256x128xf32>
    tpu.vector_store %arg12[%c0_48, %c0_49, %c0_50], %82 {strides = array<i32>} : memref<1x256x128xf32, #tpu.memory_space<vmem>>, vector<1x256x128xf32>,
    %83 = arith.truncf %64 : vector<256x128xf32> to vector<256x128xbf16>
    %c0_51 = arith.constant 0 : index
    %c0_52 = arith.constant 0 : index
    %84 = vector.load %arg11[%c0_51, %c0_52] : memref<128x128xbf16, #tpu.memory_space<vmem>>, vector<128x128xbf16>
    %cst_53 = arith.constant dense<0.000000e+00> : vector<256x128xf32>
    %85 = tpu.matmul %83, %84, %cst_53 {dimension_numbers = #tpu.dot_dimension_numbers<[1], [0], [0], [1], [0, 0, 1, 1], [], []>} : vector<256x128xbf16>, vector<128x128xbf16>, vector<256x128xf32> -> vector<256x128xf32>
    %86 = arith.truncf %85 : vector<256x128xf32> to vector<256x128xbf16>
    %c0_54 = arith.constant 0 : index
    %c0_55 = arith.constant 0 : index
    %c0_56 = arith.constant 0 : index
    %87 = vector.load %arg13[%c0_54, %c0_55, %c0_56] : memref<1x256x128xbf16, #tpu.memory_space<vmem>>, vector<1x256x128xbf16>
    %88 = vector.shape_cast %87 : vector<1x256x128xbf16> to vector<256x128xbf16>
    %89 = vector.shape_cast %86 : vector<256x128xbf16> to vector<1x256x128xbf16>
    tpu.vector_store %arg13[%c0_54, %c0_55, %c0_56], %89 {strides = array<i32>} : memref<1x256x128xbf16, #tpu.memory_space<vmem>>, vector<1x256x128xbf16>,
    return
  }
  func.func @transform_0(%arg0: i32, %arg1: i32) -> (i32, i32, i32) {
    %c0_i32 = arith.constant 0 : i32
    %c0_i32_0 = arith.constant 0 : i32
    %c0_i32_1 = arith.constant 0 : i32
    return %arg0, %c0_i32, %c0_i32_0 : i32, i32, i32
  }
  func.func @transform_1(%arg0: i32, %arg1: i32) -> (i32, i32, i32) {
    %c0_i32 = arith.constant 0 : i32
    %c0_i32_0 = arith.constant 0 : i32
    return %arg0, %arg1, %c0_i32 : i32, i32, i32
  }
  func.func @transform_2(%arg0: i32, %arg1: i32) -> (i32, i32) {
    %c0_i32 = arith.constant 0 : i32
    %c0_i32_0 = arith.constant 0 : i32
    %c0_i32_1 = arith.constant 0 : i32
    return %c0_i32, %c0_i32_0 : i32, i32
  }
  func.func @transform_3(%arg0: i32, %arg1: i32) -> (i32, i32, i32) {
    %c0_i32 = arith.constant 0 : i32
    %c0_i32_0 = arith.constant 0 : i32
    %c0_i32_1 = arith.constant 0 : i32
    %c0_i32_2 = arith.constant 0 : i32
    return %c0_i32, %c0_i32_0, %c0_i32_1 : i32, i32, i32
  }
  func.func @transform_4(%arg0: i32, %arg1: i32) -> (i32, i32) {
    %c0_i32 = arith.constant 0 : i32
    %c0_i32_0 = arith.constant 0 : i32
    %c0_i32_1 = arith.constant 0 : i32
    return %c0_i32, %c0_i32_0 : i32, i32
  }
  func.func @transform_5(%arg0: i32, %arg1: i32) -> (i32, i32) {
    %c0_i32 = arith.constant 0 : i32
    %c0_i32_0 = arith.constant 0 : i32
    %c0_i32_1 = arith.constant 0 : i32
    return %c0_i32, %c0_i32_0 : i32, i32
  }
  func.func @transform_6(%arg0: i32, %arg1: i32) -> (i32, i32) {
    %c0_i32 = arith.constant 0 : i32
    %c0_i32_0 = arith.constant 0 : i32
    %c0_i32_1 = arith.constant 0 : i32
    return %c0_i32, %c0_i32_0 : i32, i32
  }
  func.func @transform_7(%arg0: i32, %arg1: i32) -> (i32, i32) {
    %c0_i32 = arith.constant 0 : i32
    %c0_i32_0 = arith.constant 0 : i32
    %c0_i32_1 = arith.constant 0 : i32
    return %c0_i32, %c0_i32_0 : i32, i32
  }
  func.func @transform_8(%arg0: i32, %arg1: i32) -> (i32, i32) {
    %c0_i32 = arith.constant 0 : i32
    %c0_i32_0 = arith.constant 0 : i32
    %c0_i32_1 = arith.constant 0 : i32
    return %c0_i32, %c0_i32_0 : i32, i32
  }
  func.func @transform_9(%arg0: i32, %arg1: i32) -> (i32, i32) {
    %c0_i32 = arith.constant 0 : i32
    %c0_i32_0 = arith.constant 0 : i32
    %c0_i32_1 = arith.constant 0 : i32
    return %c0_i32, %c0_i32_0 : i32, i32
  }
  func.func @transform_10(%arg0: i32, %arg1: i32) -> (i32, i32, i32) {
    %c0_i32 = arith.constant 0 : i32
    %c0_i32_0 = arith.constant 0 : i32
    return %arg0, %arg1, %c0_i32 : i32, i32, i32
  }
  func.func @transform_11(%arg0: i32, %arg1: i32) -> (i32, i32, i32) {
    %c0_i32 = arith.constant 0 : i32
    %c0_i32_0 = arith.constant 0 : i32
    return %arg0, %arg1, %c0_i32 : i32, i32, i32
  }
}

</mosaic_0001>

<bundles_post_ra>
// kernel: _cff_forward.1
= control target key start
LH: loop header
LB: loop body
LE: loop exit
PB: predicated region body
PF: predicated region fallthrough
CT: control target
= control target key end

     0   :  { %s8741_s17 = smov 0   ;;  %s8743_s18 = smov 0   ;;  %s10787_s0 = inlined_call_operand.vmem [shape: bf16[2,8,3072], index: 0, kind: input, shape index: {}]   ;;  %s10788_s1 = inlined_call_operand.vmem [shape: bf16[2,256,128], index: 1, kind: input, shape index: {}]   ;;  %s10789_s2 = inlined_call_operand.vmem [shape: f32[24,8], index: 2, kind: input, shape index: {}]   ;;  %s10790_s3 = inlined_call_operand.vmem [shape: bf16[9,128,128], index: 3, kind: input, shape index: {}]   ;;  %s10791_s4 = inlined_call_operand.vmem [shape: f32[1,128], index: 4, kind: input, shape index: {}]   ;;  %s10792_s5 = inlined_call_operand.vmem [shape: f32[1,128], index: 5, kind: input, shape index: {}]   ;;  %s10793_s6 = inlined_call_operand.vmem [shape: bf16[128,128], index: 6, kind: input, shape index: {}]   ;;  %s10794_s7 = inlined_call_operand.vmem [shape: f32[1,128], index: 7, kind: input, shape index: {}]   ;;  %s10795_s8 = inlined_call_operand.vmem [shape: f32[1,128], index: 8, kind: input, shape index: {}]   ;;  %s10796_s9 = inlined_call_operand.vmem [shape: bf16[128,128], index: 9, kind: input, shape index: {}]   ;;  %s10797_s10 = inlined_call_operand.vmem [shape: f32[2,256,128], index: 10, kind: output, shape index: {0}]   ;;  %s10798_s11 = inlined_call_operand.vmem [shape: bf16[2,256,128], index: 11, kind: output, shape index: {1}]  }
   0x1   :  { %s8745_s19 = smov 0  }
   0x2 LB: > { %s34_s20 = sadd.s32 1, %s8673_s18  ;;  %p6654_p0 = scmp.ge.s32.totalorder %s8677_s19, 1  ;;  %s8677_s19 = sphi %s8745_s19, %s22_s19   ;;  %s8673_s18 = sphi %s8743_s18, %s10978_s18   ;;  %s8669_s17 = sphi %s8741_s17, %s10977_s17  }
   0x3   : > { %p36_p1 = scmp.ge.s32.totalorder %s34_s20, 2  ;;  %p373_p2 = scmp.lt.s32.totalorder %s8677_s19, 3 }
   0x5   : > { %s10980_s20 = smov (%p36_p1, %s34_s20), 0  ;;  %p374_p3 = pnand %p6654_p0, %p373_p2 }
   0x7   : > { %377 = sbr.rel (%p374_p3) target bundleno = 1323 (0x52b), region = 60 }
   0xe   : > { %p435_p4 = scmp.lt.s32.totalorder %s8669_s17, 1  ;;  %v8679_v0 = vmov 0   ;;  %v473_v1 = vld [vmem:[%s10789_s2] sm:$0xff]  ;;  %v474_v2 = vld [vmem:[%s10789_s2 + $0x8] sm:$0xff]  ;;  %vm557_vm0 = vcmask 1043456   ;;  %vm550_vm1 = vcmask 64512  }
   0xf   : > { %662 = vmatprep.mubr.bf16.mxu0 %v8679_v0  ;;  %713 = vmatprep.mubr.bf16.mxu1 %v8679_v0  ;;  %v8787_v21 = vpack.c.bf16 %v474_v2, %v473_v1  ;;  %v475_v30 = vld [vmem:[%s10789_s2 + $0x10] sm:$0x1f]  ;;  %v8551_v54 = vld [vmem:[%s10790_s3 + $0xc0] sm:$0xff]   ;;  %v8553_v56 = vld [vmem:[%s10790_s3 + $0xc8] sm:$0xff]   ;;  %vm2583_vm2 = vcmask 1046528   ;;  %vm3188_vm3 = vcmask 1045504  }
  0x10   : > { %s10982_s17 = smov (!%p435_p4, %s8669_s17), 1  ;;  %v8831_v45 = vpack.c.bf16 %v475_v30, %v475_v30  ;;  %v8552_v55 = vld [vmem:[%s10790_s3 + $0x40] sm:$0xff]   ;;  %v8554_v57 = vld [vmem:[%s10790_s3 + $0x48] sm:$0xff]   ;;  %v8555_v58 = vld [vmem:[%s10790_s3 + $0xd0] sm:$0xff]  }
  0x11   : > { %s8500_s21 = smul.u32 96, %s10982_s17  ;;  %s6992_s12 = sshll.u32 %s10982_s17, 7  ;;  %v8556_v59 = vld [vmem:[%s10790_s3 + $0x50] sm:$0xff]   ;;  %v8557_v60 = vld [vmem:[%s10790_s3 + $0xd8] sm:$0xff]   ;;  %v8559_v62 = vld [vmem:[%s10790_s3 + $0xe0] sm:$0xff]  }
  0x12   : > { %s8878_s15 = scalar_lea.vmem %s10788_s1, %s6992_s12  ;;  %v8558_v61 = vld [vmem:[%s10790_s3 + $0x58] sm:$0xff]   ;;  %v8560_v63 = vld [vmem:[%s10790_s3 + $0x60] sm:$0xff]   ;;  %v8562_v1 = vld [vmem:[%s10790_s3 + $0x68] sm:$0xff]   ;;  %s6993_s16 = sshll.u32 %s10982_s17, 8 }
  0x13   : > { %s8773_s28 = scalar_lea.vmem %s10787_s0, %s8500_s21  ;;  %v8563_v2 = vld [vmem:[%s10790_s3 + $0xf0] sm:$0xff]   ;;  %s10443_s23 = scalar_lea.vmem %s10797_s10, %s6993_s16 }
  0x14   : > { %v478_v3 = vld [vmem:[%s8773_s28] sm:$0xff]  ;;  %v479_v4 = vld [vmem:[%s8773_s28 + $0x8] sm:$0xff]  ;;  %v480_v5 = vld [vmem:[%s8773_s28 + $0x10] sm:$0xff]  ;;  %s10760_s25 = scalar_lea.vmem %s10798_s11, %s6992_s12 }
  0x15   : > { %v6663_v6 = vcombine.high %v478_v3, %v478_v3  ;;  %v6665_v7 = vcombine.high %v479_v4, %v479_v4  ;;  %v6662_v8 = vcombine.low %v478_v3, %v478_v3  ;;  %v6664_v9 = vcombine.low %v479_v4, %v479_v4  ;;  %v481_v10 = vld [vmem:[%s8773_s28 + $0x18] sm:$0xff]  ;;  %v482_v11 = vld [vmem:[%s8773_s28 + $0x20] sm:$0xff]  ;;  %v483_v12 = vld [vmem:[%s8773_s28 + $0x28] sm:$0xff] }
  0x16   : > { %v6667_v13 = vcombine.high %v480_v5, %v480_v5  ;;  %v6669_v14 = vcombine.high %v481_v10, %v481_v10  ;;  %v6666_v15 = vcombine.low %v480_v5, %v480_v5  ;;  %v6668_v16 = vcombine.low %v481_v10, %v481_v10  ;;  %v484_v17 = vld [vmem:[%s8773_s28 + $0x30] sm:$0xff]  ;;  %v485_v18 = vld [vmem:[%s8773_s28 + $0x38] sm:$0xff]  ;;  %v8790_v22 = vld [vmem:[%s8773_s28 + $0x40] sm:$0xff] }
  0x17   : > { %6686 = vmatprep.subr.msk.bf16.mxu0 %vm557_vm0, %v6663_v6  ;;  %6689 = vmatprep.subr.msk.bf16.mxu1 %vm557_vm0, %v6665_v7  ;;  %v559_v19 = vsel %vm557_vm0, %v6662_v8, 0  ;;  %v565_v20 = vsel %vm557_vm0, %v6664_v9, 0  ;;  %v8793_v23 = vld [vmem:[%s8773_s28 + $0x48] sm:$0xff]  ;;  %v8796_v24 = vld [vmem:[%s8773_s28 + $0x50] sm:$0xff]  ;;  %v6670_v27 = vcombine.low %v482_v11, %v482_v11  ;;  %v6672_v28 = vcombine.low %v483_v12, %v483_v12  ;;  %v8806_v34 = vld [vmem:[%s8773_s28 + $0x58] sm:$0xff] }
  0x18   : > { %631 = vmatpush1.bf16.msra.mxu0 %v559_v19  ;;  %682 = vmatpush1.bf16.msra.mxu1 %v565_v20  ;;  %v571_v25 = vsel %vm557_vm0, %v6666_v15, 0  ;;  %v577_v26 = vsel %vm557_vm0, %v6668_v16, 0  ;;  %v6674_v29 = vcombine.low %v484_v17, %v484_v17  ;;  %v6671_v31 = vcombine.high %v482_v11, %v482_v11  ;;  %v8564_v3 = vld [vmem:[%s10790_s3 + $0x70] sm:$0xff]   ;;  %v8565_v4 = vld [vmem:[%s10790_s3 + $0xf8] sm:$0xff]   ;;  %v8971_v6 = vld [vmem:[%s10790_s3 + $0x100] sm:$0xff]  }
  0x19   : > { %6692 = vmatprep.subr.msk.bf16.mxu0 %vm557_vm0, %v6667_v13  ;;  %6695 = vmatprep.subr.msk.bf16.mxu1 %vm557_vm0, %v6669_v14  ;;  %v6673_v32 = vcombine.high %v483_v12, %v483_v12  ;;  %v6676_v33 = vcombine.low %v485_v18, %v485_v18  ;;  %v6678_v35 = vcombine.low %v8790_v22, %v8790_v22  ;;  %v583_v37 = vsel %vm557_vm0, %v6670_v27, 0  ;;  %v8566_v5 = vld [vmem:[%s10790_s3 + $0x78] sm:$0xff]  }
  0x1a   : > { %v6680_v36 = vcombine.low %v8793_v23, %v8793_v23  ;;  %v589_v38 = vsel %vm557_vm0, %v6672_v28, 0  ;;  %v6682_v39 = vcombine.low %v8796_v24, %v8796_v24  ;;  %v595_v40 = vsel %vm557_vm0, %v6674_v29, 0 }
  0x1b   : > { %6687 = vmatmul.mubr.msk.bf16.vlgmr.msra.gmra.mrb[0].mxu0 %vm550_vm1, %v8787_v21  ;;  %6690 = vmatmul.mubr.msk.bf16.vlgmr.msra.gmra.mrb[0].mxu1 %vm550_vm1, %v8787_v21  ;;  %v601_v41 = vsel %vm557_vm0, %v6676_v33, 0  ;;  %v6684_v42 = vcombine.low %v8806_v34, %v8806_v34  ;;  %v607_v43 = vsel %vm557_vm0, %v6678_v35, 0  ;;  %v6675_v48 = vcombine.high %v484_v17, %v484_v17 }
  0x1c   : > { %733 = vmatpush1.bf16.msra.mxu0 %v571_v25  ;;  %784 = vmatpush1.bf16.msra.mxu1 %v577_v26  ;;  %v613_v44 = vsel %vm557_vm0, %v6680_v36, 0  ;;  %v619_v46 = vsel %vm557_vm0, %v6682_v39, 0  ;;  %v6677_v49 = vcombine.high %v485_v18, %v485_v18  ;;  %v6679_v50 = vcombine.high %v8790_v22, %v8790_v22 }
  0x1d   : > { %672 = vmatprep.mubr.bf16.mxu0 %v8679_v0  ;;  %723 = vmatprep.mubr.bf16.mxu1 %v8679_v0  ;;  %v625_v47 = vsel %vm557_vm0, %v6684_v42, 0  ;;  %v6681_v51 = vcombine.high %v8793_v23, %v8793_v23  ;;  %v6683_v52 = vcombine.high %v8796_v24, %v8796_v24  ;;  %v6685_v53 = vcombine.high %v8806_v34, %v8806_v34 }
  0x1e   : > { %6698 = vmatprep.subr.msk.bf16.mxu0 %vm557_vm0, %v6671_v31  ;;  %6701 = vmatprep.subr.msk.bf16.mxu1 %vm557_vm0, %v6673_v32  ;;  %v8680_v7 = vmov 1966171168   ;;  %v1325_v9 = vlaneseq }
  0x1f   : > { %v1323_v8 = vunpack.c.l.s4 %v8680_v7 }
  0x20   : > { %v1326_v11 = vshrl.u32 %v1325_v9, 7 }
  0x21   : > { %v1324_v10 = vunpack.c.0.s8 %v1323_v8 }
  0x23   : > { %6688 = vmatmul.mubr.msk.bf16.gmra.mrb[4].mxu0 %vm550_vm1, %v8831_v45  ;;  %6691 = vmatmul.mubr.msk.bf16.gmra.mrb[4].mxu1 %vm550_vm1, %v8831_v45  ;;  %v8974_v14 = vsub.s32 %v1324_v10, %v1326_v11 }
  0x24   : > { %764 = vmatprep.mubr.bf16.mxu0 %v8679_v0  ;;  %815 = vmatprep.mubr.bf16.mxu1 %v8679_v0 }
  0x2b   : > { %6693 = vmatmul.mubr.msk.bf16.vlgmr.msra.gmra.mrb[8].mxu0 %vm550_vm1, %v8787_v21  ;;  %6696 = vmatmul.mubr.msk.bf16.vlgmr.msra.gmra.mrb[8].mxu1 %vm550_vm1, %v8787_v21 }
  0x2c   : > { %835 = vmatpush1.bf16.msra.mxu0 %v583_v37  ;;  %886 = vmatpush1.bf16.msra.mxu1 %v589_v38 }
  0x2d   : > { %774 = vmatprep.mubr.bf16.mxu0 %v8679_v0  ;;  %825 = vmatprep.mubr.bf16.mxu1 %v8679_v0 }
  0x2e   : > { %6704 = vmatprep.subr.msk.bf16.mxu0 %vm557_vm0, %v6675_v48  ;;  %6707 = vmatprep.subr.msk.bf16.mxu1 %vm557_vm0, %v6677_v49 }
  0x33   : > { %6694 = vmatmul.mubr.msk.bf16.gmra.mrb[12].mxu0 %vm550_vm1, %v8831_v45  ;;  %6697 = vmatmul.mubr.msk.bf16.gmra.mrb[12].mxu1 %vm550_vm1, %v8831_v45 }
  0x34   : > { %866 = vmatprep.mubr.bf16.mxu0 %v8679_v0  ;;  %917 = vmatprep.mubr.bf16.mxu1 %v8679_v0 }
  0x3b   : > { %6699 = vmatmul.mubr.msk.bf16.vlgmr.msra.gmra.mrb[16].mxu0 %vm550_vm1, %v8787_v21  ;;  %6702 = vmatmul.mubr.msk.bf16.vlgmr.msra.gmra.mrb[16].mxu1 %vm550_vm1, %v8787_v21 }
  0x3c   : > { %937 = vmatpush1.bf16.msra.mxu0 %v595_v40  ;;  %988 = vmatpush1.bf16.msra.mxu1 %v601_v41 }
  0x3d   : > { %876 = vmatprep.mubr.bf16.mxu0 %v8679_v0  ;;  %927 = vmatprep.mubr.bf16.mxu1 %v8679_v0 }
  0x3e   : > { %6710 = vmatprep.subr.msk.bf16.mxu0 %vm557_vm0, %v6679_v50  ;;  %6713 = vmatprep.subr.msk.bf16.mxu1 %vm557_vm0, %v6681_v51 }
  0x43   : > { %6700 = vmatmul.mubr.msk.bf16.gmra.mrb[20].mxu0 %vm550_vm1, %v8831_v45  ;;  %6703 = vmatmul.mubr.msk.bf16.gmra.mrb[20].mxu1 %vm550_vm1, %v8831_v45 }
  0x44   : > { %968 = vmatprep.mubr.bf16.mxu0 %v8679_v0  ;;  %1019 = vmatprep.mubr.bf16.mxu1 %v8679_v0 }
  0x4b   : > { %6705 = vmatmul.mubr.msk.bf16.vlgmr.msra.gmra.mrb[24].mxu0 %vm550_vm1, %v8787_v21  ;;  %6708 = vmatmul.mubr.msk.bf16.vlgmr.msra.gmra.mrb[24].mxu1 %vm550_vm1, %v8787_v21 }
  0x4c   : > { %1039 = vmatpush1.bf16.msra.mxu0 %v607_v43  ;;  %1090 = vmatpush1.bf16.msra.mxu1 %v613_v44 }
  0x4d   : > { %978 = vmatprep.mubr.bf16.mxu0 %v8679_v0  ;;  %1029 = vmatprep.mubr.bf16.mxu1 %v8679_v0 }
  0x4e   : > { %6716 = vmatprep.subr.msk.bf16.mxu0 %vm557_vm0, %v6683_v52  ;;  %6719 = vmatprep.subr.msk.bf16.mxu1 %vm557_vm0, %v6685_v53 }
  0x53   : > { %6706 = vmatmul.mubr.msk.bf16.gmra.mrb[28].mxu0 %vm550_vm1, %v8831_v45  ;;  %6709 = vmatmul.mubr.msk.bf16.gmra.mrb[28].mxu1 %vm550_vm1, %v8831_v45 }
  0x54   : > { %1070 = vmatprep.mubr.bf16.mxu0 %v8679_v0  ;;  %1121 = vmatprep.mubr.bf16.mxu1 %v8679_v0 }
  0x5b   : > { %6711 = vmatmul.mubr.msk.bf16.vlgmr.msra.gmra.mrb[32].mxu0 %vm550_vm1, %v8787_v21  ;;  %6714 = vmatmul.mubr.msk.bf16.vlgmr.msra.gmra.mrb[32].mxu1 %vm550_vm1, %v8787_v21 }
  0x5c   : > { %1141 = vmatpush1.bf16.msra.mxu0 %v619_v46  ;;  %1192 = vmatpush1.bf16.msra.mxu1 %v625_v47 }
  0x5d   : > { %1080 = vmatprep.mubr.bf16.mxu0 %v8679_v0  ;;  %1131 = vmatprep.mubr.bf16.mxu1 %v8679_v0 }
  0x5e   : > { %7650 = vmatprep.subr.bf16.mxu0 %v8551_v54  ;;  %7458 = vmatprep.subr.bf16.mxu1 %v8552_v55 }
  0x63   : > { %6712 = vmatmul.mubr.msk.bf16.gmra.mrb[36].mxu0 %vm550_vm1, %v8831_v45  ;;  %6715 = vmatmul.mubr.msk.bf16.gmra.mrb[36].mxu1 %vm550_vm1, %v8831_v45 }
  0x64   : > { %1172 = vmatprep.mubr.bf16.mxu0 %v8679_v0  ;;  %1223 = vmatprep.mubr.bf16.mxu1 %v8679_v0 }
  0x6b   : > { %6717 = vmatmul.mubr.msk.bf16.vlgmr.msra.gmra.mrb[40].mxu0 %vm550_vm1, %v8787_v21  ;;  %6720 = vmatmul.mubr.msk.bf16.vlgmr.msra.gmra.mrb[40].mxu1 %vm550_vm1, %v8787_v21 }
  0x6c   : > { %1182 = vmatprep.mubr.bf16.mxu0 %v8679_v0  ;;  %1233 = vmatprep.mubr.bf16.mxu1 %v8679_v0  ;;  %v8561_v0 = vld [vmem:[%s10790_s3 + $0xe8] sm:$0xff]  }
  0x6d   : > { %7651 = vmatpush3.bf16.msra.mxu0 %v8551_v54  ;;  %7459 = vmatpush3.bf16.msra.mxu1 %v8552_v55 }
  0x6e   : > { %7652 = vmatprep.subr.bf16.mxu0 %v8553_v56  ;;  %7460 = vmatprep.subr.bf16.mxu1 %v8554_v57 }
  0x71   : > { %7653 = vmatpush3.bf16.msra.mxu0 %v8553_v56  ;;  %7461 = vmatpush3.bf16.msra.mxu1 %v8554_v57 }
  0x72   : > { %7654 = vmatprep.subr.bf16.mxu0 %v8555_v58  ;;  %7462 = vmatprep.subr.bf16.mxu1 %v8556_v59 }
  0x73   : > { %6718 = vmatmul.mubr.msk.bf16.gmra.mrb[44].mxu0 %vm550_vm1, %v8831_v45  ;;  %6721 = vmatmul.mubr.msk.bf16.gmra.mrb[44].mxu1 %vm550_vm1, %v8831_v45 }
  0x75   : > { %7655 = vmatpush3.bf16.msra.mxu0 %v8555_v58  ;;  %7463 = vmatpush3.bf16.msra.mxu1 %v8556_v59 }
  0x76   : > { %7656 = vmatprep.subr.bf16.mxu0 %v8557_v60  ;;  %7464 = vmatprep.subr.bf16.mxu1 %v8558_v61 }
  0x79   : > { %7657 = vmatpush3.bf16.msra.mxu0 %v8557_v60  ;;  %7465 = vmatpush3.bf16.msra.mxu1 %v8558_v61 }
  0x7a   : > { %7658 = vmatprep.subr.bf16.mxu0 %v8559_v62  ;;  %7466 = vmatprep.subr.bf16.mxu1 %v8560_v63 }
  0x7d   : > { %7659 = vmatpush3.bf16.msra.mxu0 %v8559_v62  ;;  %7467 = vmatpush3.bf16.msra.mxu1 %v8560_v63 }
  0x7e   : > { %7660 = vmatprep.subr.bf16.mxu0 %v8561_v0  ;;  %7468 = vmatprep.subr.bf16.mxu1 %v8562_v1 }
  0x81   : > { %7661 = vmatpush3.bf16.msra.mxu0 %v8561_v0  ;;  %7469 = vmatpush3.bf16.msra.mxu1 %v8562_v1 }
  0x82   : > { %7662 = vmatprep.subr.bf16.mxu0 %v8563_v2  ;;  %7470 = vmatprep.subr.bf16.mxu1 %v8564_v3 }
  0x85   : > { %7663 = vmatpush3.bf16.msra.mxu0 %v8563_v2  ;;  %7471 = vmatpush3.bf16.msra.mxu1 %v8564_v3 }
  0x86   : > { %7664 = vmatprep.subr.bf16.mxu0 %v8565_v4  ;;  %7472 = vmatprep.subr.bf16.mxu1 %v8566_v5 }
  0x89   : > { %7665 = vmatpush3.bf16.msra.mxu0 %v8565_v4  ;;  %7473 = vmatpush3.bf16.msra.mxu1 %v8566_v5 }
  0x8a   : > { %7714 = vmatprep.subr.bf16.mxu0 %v8971_v6 }
  0xee   : > { %v664_v12 = vpop.f32.mrb[0].mxu0  ;;  %v715_v13 = vpop.f32.mrb[0].mxu1 }
  0xef   : > { %v666_v15 = vpop.f32.mrb[1].mxu0  ;;  %v717_v16 = vpop.f32.mrb[1].mxu1 }
  0xf0   : > { %v1314_v17 = vcombine.low %v664_v12, %v666_v15  ;;  %v1315_v18 = vcombine.high %v664_v12, %v666_v15  ;;  %v1316_v19 = vcombine.low %v715_v13, %v717_v16  ;;  %v1317_v20 = vcombine.high %v715_v13, %v717_v16  ;;  %v668_v21 = vpop.f32.mrb[2].mxu0  ;;  %v719_v22 = vpop.f32.mrb[2].mxu1 }
  0xf1   : > { %v670_v23 = vpop.f32.mrb[3].mxu0  ;;  %v721_v24 = vpop.f32.mrb[3].mxu1 }
  0xf2   : > { %v1328_v25 = vrot.slane %v1314_v17, %v8974_v14  ;;  %v1335_v26 = vrot.slane %v1315_v18, %v8974_v14  ;;  %v1342_v27 = vrot.slane %v1316_v19, %v8974_v14  ;;  %v1349_v28 = vrot.slane %v1317_v20, %v8974_v14 }
  0xf3   : > { %v1722_v29 = vcombine.low %v668_v21, %v670_v23  ;;  %v1723_v30 = vcombine.high %v668_v21, %v670_v23  ;;  %v1724_v31 = vcombine.low %v719_v22, %v721_v24  ;;  %v1725_v32 = vcombine.high %v719_v22, %v721_v24 }
  0xf4   : > { %v1378_v33 = vcombine.low %v1328_v25, %v1342_v27  ;;  %v1379_v34 = vcombine.high %v1328_v25, %v1342_v27  ;;  %v1380_v35 = vcombine.low %v1335_v26, %v1349_v28  ;;  %v1381_v36 = vcombine.high %v1335_v26, %v1349_v28 }
  0xf5   : > { %v1736_v37 = vrot.slane %v1722_v29, %v8974_v14  ;;  %v1743_v38 = vrot.slane %v1723_v30, %v8974_v14  ;;  %v1750_v39 = vrot.slane %v1724_v31, %v8974_v14  ;;  %v1757_v40 = vrot.slane %v1725_v32, %v8974_v14 }
  0xf6   : > { %v674_v41 = vpop.f32.mrb[4].mxu0  ;;  %v725_v42 = vpop.f32.mrb[4].mxu1  ;;  %v9003_v2 = vrot.slane %v1378_v33, %v8974_v14  ;;  %v9006_v3 = vrot.slane %v1380_v35, %v8974_v14  ;;  %v9009_v4 = vrot.slane %v1379_v34, %v8974_v14  ;;  %v9012_v5 = vrot.slane %v1381_v36, %v8974_v14 }
  0xf7   : > { %v1786_v43 = vcombine.low %v1736_v37, %v1750_v39  ;;  %v1787_v44 = vcombine.high %v1736_v37, %v1750_v39  ;;  %v1788_v45 = vcombine.low %v1743_v38, %v1757_v40  ;;  %v1789_v46 = vcombine.high %v1743_v38, %v1757_v40  ;;  %v676_v47 = vpop.f32.mrb[5].mxu0  ;;  %v727_v48 = vpop.f32.mrb[5].mxu1 }
  0xf8   : > { %v2130_v49 = vcombine.low %v674_v41, %v676_v47  ;;  %v2131_v50 = vcombine.high %v674_v41, %v676_v47  ;;  %v2132_v51 = vcombine.low %v725_v42, %v727_v48  ;;  %v2133_v52 = vcombine.high %v725_v42, %v727_v48  ;;  %v678_v53 = vpop.f32.mrb[6].mxu0  ;;  %v729_v54 = vpop.f32.mrb[6].mxu1 }
  0xf9   : > { %v679_v55 = vpop.f32.mrb[7].mxu0  ;;  %v730_v56 = vpop.f32.mrb[7].mxu1  ;;  %v9015_v16 = vrot.slane %v1786_v43, %v8974_v14  ;;  %v9018_v17 = vrot.slane %v1788_v45, %v8974_v14  ;;  %v9021_v18 = vrot.slane %v1787_v44, %v8974_v14  ;;  %v9024_v19 = vrot.slane %v1789_v46, %v8974_v14 }
  0xfa   : > { %v8985_v57 = vrot.slane %v2130_v49, %v8974_v14  ;;  %v8988_v58 = vrot.slane %v2131_v50, %v8974_v14  ;;  %v8991_v59 = vrot.slane %v2132_v51, %v8974_v14  ;;  %v8994_v60 = vrot.slane %v2133_v52, %v8974_v14 }
  0xfc   : > { %v2194_v61 = vcombine.low %v8985_v57, %v8991_v59  ;;  %v2195_v62 = vcombine.high %v8985_v57, %v8991_v59  ;;  %v2196_v63 = vcombine.low %v8988_v58, %v8994_v60 }
  0xfe   : > { %v766_v0 = vpop.f32.mrb[8].mxu0  ;;  %v817_v1 = vpop.f32.mrb[8].mxu1 }
  0xff   : > { %v768_v7 = vpop.f32.mrb[9].mxu0  ;;  %v819_v8 = vpop.f32.mrb[9].mxu1 }
 0x100   : > { %v1318_v9 = vcombine.low %v766_v0, %v768_v7  ;;  %v1319_v10 = vcombine.high %v766_v0, %v768_v7  ;;  %v1320_v11 = vcombine.low %v817_v1, %v819_v8  ;;  %v1321_v12 = vcombine.high %v817_v1, %v819_v8  ;;  %v770_v13 = vpop.f32.mrb[10].mxu0  ;;  %v821_v15 = vpop.f32.mrb[10].mxu1 }
 0x101   : > { %v772_v20 = vpop.f32.mrb[11].mxu0  ;;  %v823_v21 = vpop.f32.mrb[11].mxu1 }
 0x102   : > { %v1356_v22 = vrot.slane %v1318_v9, %v8974_v14  ;;  %v1363_v23 = vrot.slane %v1319_v10, %v8974_v14  ;;  %v1370_v24 = vrot.slane %v1320_v11, %v8974_v14  ;;  %v1377_v25 = vrot.slane %v1321_v12, %v8974_v14 }
 0x103   : > { %v1726_v26 = vcombine.low %v770_v13, %v772_v20  ;;  %v1727_v27 = vcombine.high %v770_v13, %v772_v20  ;;  %v1728_v28 = vcombine.low %v821_v15, %v823_v21  ;;  %v1729_v29 = vcombine.high %v821_v15, %v823_v21 }
 0x104   : > { %v1382_v30 = vcombine.low %v1356_v22, %v1370_v24  ;;  %v1383_v31 = vcombine.high %v1356_v22, %v1370_v24  ;;  %v1384_v32 = vcombine.low %v1363_v23, %v1377_v25  ;;  %v1385_v33 = vcombine.high %v1363_v23, %v1377_v25 }
 0x105   : > { %v1764_v34 = vrot.slane %v1726_v26, %v8974_v14  ;;  %v1771_v35 = vrot.slane %v1727_v27, %v8974_v14  ;;  %v1778_v36 = vrot.slane %v1728_v28, %v8974_v14  ;;  %v1785_v37 = vrot.slane %v1729_v29, %v8974_v14 }
 0x106   : > { %v9035_v38 = vrot.slane %v1382_v30, %v8974_v14  ;;  %v9038_v39 = vrot.slane %v1384_v32, %v8974_v14  ;;  %v9041_v40 = vrot.slane %v1383_v31, %v8974_v14  ;;  %v9044_v41 = vrot.slane %v1385_v33, %v8974_v14  ;;  %v776_v42 = vpop.f32.mrb[12].mxu0  ;;  %v827_v43 = vpop.f32.mrb[12].mxu1 }
 0x107   : > { %v1790_v44 = vcombine.low %v1764_v34, %v1778_v36  ;;  %v1791_v45 = vcombine.high %v1764_v34, %v1778_v36  ;;  %v1792_v46 = vcombine.low %v1771_v35, %v1785_v37  ;;  %v1793_v47 = vcombine.high %v1771_v35, %v1785_v37  ;;  %v778_v48 = vpop.f32.mrb[13].mxu0  ;;  %v829_v49 = vpop.f32.mrb[13].mxu1 }
 0x108   : > { %v1444_v51 = vcombine.low %v9006_v3, %v9038_v39  ;;  %v1445_v52 = vcombine.high %v9006_v3, %v9038_v39  ;;  %v780_v54 = vpop.f32.mrb[14].mxu0  ;;  %v831_v55 = vpop.f32.mrb[14].mxu1  ;;  %v2134_v13 = vcombine.low %v776_v42, %v778_v48  ;;  %v2135_v21 = vcombine.high %v776_v42, %v778_v48 }
 0x109   : > { %v9061_v7 = vrot.slane %v1790_v44, %v8974_v14  ;;  %v781_v8 = vpop.f32.mrb[15].mxu0  ;;  %v832_v9 = vpop.f32.mrb[15].mxu1  ;;  %v9064_v10 = vrot.slane %v1792_v46, %v8974_v14  ;;  %v9067_v11 = vrot.slane %v1791_v45, %v8974_v14  ;;  %v9070_v12 = vrot.slane %v1793_v47, %v8974_v14 }
 0x10a   : > { %v2136_v22 = vcombine.low %v827_v43, %v829_v49  ;;  %v2172_v29 = vrot.slane %v2134_v13, %v8974_v14  ;;  %v2179_v30 = vrot.slane %v2135_v21, %v8974_v14  ;;  %v2137_v31 = vcombine.high %v827_v43, %v829_v49 }
 0x10b   : > { %v1850_v15 = vcombine.low %v9015_v16, %v9061_v7  ;;  %v9097_v36 = vrot.slane %v2194_v61, %v8974_v14  ;;  %v9103_v37 = vrot.slane %v2196_v63, %v8974_v14  ;;  %v9110_v61 = vrot.slane %v2195_v62, %v8974_v14 }
 0x10c   : > { %v2186_v32 = vrot.slane %v2136_v22, %v8974_v14  ;;  %v2193_v44 = vrot.slane %v2137_v31, %v8974_v14 }
 0x10e   : > { %v868_v33 = vpop.f32.mrb[16].mxu0  ;;  %v919_v34 = vpop.f32.mrb[16].mxu1  ;;  %v2197_v45 = vcombine.low %v2172_v29, %v2186_v32  ;;  %v2198_v46 = vcombine.high %v2172_v29, %v2186_v32  ;;  %v2199_v8 = vcombine.low %v2179_v30, %v2193_v44 }
 0x10f   : > { %v870_v42 = vpop.f32.mrb[17].mxu0  ;;  %v921_v43 = vpop.f32.mrb[17].mxu1 }
 0x110   : > { %v1450_v47 = vcombine.low %v868_v33, %v870_v42  ;;  %v872_v48 = vpop.f32.mrb[18].mxu0  ;;  %v923_v49 = vpop.f32.mrb[18].mxu1  ;;  %v1451_v54 = vcombine.high %v868_v33, %v870_v42  ;;  %v1452_v55 = vcombine.low %v919_v34, %v921_v43  ;;  %v1453_v58 = vcombine.high %v919_v34, %v921_v43 }
 0x111   : > { %v874_v60 = vpop.f32.mrb[19].mxu0  ;;  %v925_v63 = vpop.f32.mrb[19].mxu1  ;;  %v9113_v9 = vrot.slane %v2197_v45, %v8974_v14  ;;  %v9116_v13 = vrot.slane %v2198_v46, %v8974_v14  ;;  %v9123_v29 = vrot.slane %v2199_v8, %v8974_v14 }
 0x112   : > { %v1464_v21 = vrot.slane %v1450_v47, %v8974_v14  ;;  %v1471_v22 = vrot.slane %v1451_v54, %v8974_v14  ;;  %v1478_v57 = vrot.slane %v1452_v55, %v8974_v14  ;;  %v1485_v59 = vrot.slane %v1453_v58, %v8974_v14 }
 0x113   : > { %v1858_v62 = vcombine.low %v872_v48, %v874_v60  ;;  %10832 = vst [vmem:[#allocation2_spill] sm:$0xff] %v9123_v29  ;;  %v1859_v32 = vcombine.high %v872_v48, %v874_v60  ;;  %v1860_v46 = vcombine.low %v923_v49, %v925_v63  ;;  %v9136_v48 = vld [vmem:[%s10790_s3] sm:$0xff]   ;;  %v1861_v60 = vcombine.high %v923_v49, %v925_v63 }
 0x114   : > { %v1514_v33 = vcombine.low %v1464_v21, %v1478_v57  ;;  %v1515_v34 = vcombine.high %v1464_v21, %v1478_v57  ;;  %v1516_v42 = vcombine.low %v1471_v22, %v1485_v59  ;;  %v1517_v43 = vcombine.high %v1471_v22, %v1485_v59  ;;  %7522 = vmatprep.subr.bf16.mxu1 %v9136_v48 }
 0x115   : > { %v1872_v45 = vrot.slane %v1858_v62, %v8974_v14  ;;  %v1879_v55 = vrot.slane %v1859_v32, %v8974_v14  ;;  %v1886_v21 = vrot.slane %v1860_v46, %v8974_v14  ;;  %v1893_v49 = vrot.slane %v1861_v60, %v8974_v14 }
 0x116   : > { %v878_v47 = vpop.f32.mrb[20].mxu0  ;;  %v929_v54 = vpop.f32.mrb[20].mxu1 }
 0x117   : > { %v880_v58 = vpop.f32.mrb[21].mxu0  ;;  %v931_v8 = vpop.f32.mrb[21].mxu1  ;;  %v1922_v63 = vcombine.low %v1872_v45, %v1886_v21  ;;  %v1923_v46 = vcombine.high %v1872_v45, %v1886_v21  ;;  %v9158_v45 = vrot.slane %v1514_v33, %v8974_v14  ;;  %v9161_v21 = vrot.slane %v1516_v42, %v8974_v14 }
 0x118   : > { %v2247_v22 = vcombine.low %v878_v47, %v880_v58  ;;  %v2248_v57 = vcombine.high %v878_v47, %v880_v58  ;;  %v882_v59 = vpop.f32.mrb[22].mxu0  ;;  %v933_v44 = vpop.f32.mrb[22].mxu1  ;;  %v2249_v62 = vcombine.low %v929_v54, %v931_v8  ;;  %v2250_v31 = vcombine.high %v929_v54, %v931_v8 }
 0x119   : > { %v883_v53 = vpop.f32.mrb[23].mxu0  ;;  %v934_v28 = vpop.f32.mrb[23].mxu1  ;;  %v1924_v54 = vcombine.low %v1879_v55, %v1893_v49  ;;  %v1925_v58 = vcombine.high %v1879_v55, %v1893_v49  ;;  %v9170_v55 = vrot.slane %v1922_v63, %v8974_v14  ;;  %v9173_v49 = vrot.slane %v1923_v46, %v8974_v14 }
 0x11a   : > { %v9146_v47 = vrot.slane %v2247_v22, %v8974_v14  ;;  %v2268_v44 = vrot.slane %v2248_v57, %v8974_v14  ;;  %v9150_v53 = vrot.slane %v2249_v62, %v8974_v14  ;;  %v2282_v28 = vrot.slane %v2250_v31, %v8974_v14 }
 0x11b   : > { %v9164_v62 = vrot.slane %v1515_v34, %v8974_v14  ;;  %v9167_v31 = vrot.slane %v1517_v43, %v8974_v14  ;;  %v1943_v34 = vrot.slane %v1924_v54, %v8974_v14  ;;  %v9177_v0 = vrot.slane %v1925_v58, %v8974_v14 }
 0x11c   : > { %v2311_v8 = vcombine.low %v9146_v47, %v9150_v53  ;;  %v2313_v59 = vcombine.low %v2268_v44, %v2282_v28 }
 0x11e   : > { %v970_v22 = vpop.f32.mrb[24].mxu0  ;;  %v1021_v57 = vpop.f32.mrb[24].mxu1  ;;  %v9180_v43 = vrot.slane %v2311_v8, %v8974_v14  ;;  %v9183_v63 = vrot.slane %v2313_v59, %v8974_v14 }
 0x11f   : > { %v972_v44 = vpop.f32.mrb[25].mxu0  ;;  %v1023_v33 = vpop.f32.mrb[25].mxu1 }
 0x120   : > { %v1454_v28 = vcombine.low %v970_v22, %v972_v44  ;;  %v1455_v27 = vcombine.high %v970_v22, %v972_v44  ;;  %v1456_v42 = vcombine.low %v1021_v57, %v1023_v33  ;;  %v1457_v26 = vcombine.high %v1021_v57, %v1023_v33  ;;  %v974_v25 = vpop.f32.mrb[26].mxu0  ;;  %v1025_v1 = vpop.f32.mrb[26].mxu1  ;;  %10833 = vst [vmem:[#allocation3_spill] sm:$0xff] %v9183_v63 }
 0x121   : > { %v976_v46 = vpop.f32.mrb[27].mxu0  ;;  %v1027_v56 = vpop.f32.mrb[27].mxu1 }
 0x122   : > { %v1492_v30 = vrot.slane %v1454_v28, %v8974_v14  ;;  %v1499_v22 = vrot.slane %v1455_v27, %v8974_v14  ;;  %v1506_v57 = vrot.slane %v1456_v42, %v8974_v14  ;;  %v1513_v44 = vrot.slane %v1457_v26, %v8974_v14 }
 0x123   : > { %v1862_v54 = vcombine.low %v974_v25, %v976_v46  ;;  %v1863_v33 = vcombine.high %v974_v25, %v976_v46  ;;  %v1864_v58 = vcombine.low %v1025_v1, %v1027_v56  ;;  %v1865_v32 = vcombine.high %v1025_v1, %v1027_v56 }
 0x124   : > { %v1518_v35 = vcombine.low %v1492_v30, %v1506_v57  ;;  %v1519_v8 = vcombine.high %v1492_v30, %v1506_v57  ;;  %v1520_v50 = vcombine.low %v1499_v22, %v1513_v44  ;;  %v1521_v60 = vcombine.high %v1499_v22, %v1513_v44 }
 0x125   : > { %v1900_v59 = vrot.slane %v1862_v54, %v8974_v14  ;;  %v1907_v24 = vrot.slane %v1863_v33, %v8974_v14  ;;  %v1914_v28 = vrot.slane %v1864_v58, %v8974_v14  ;;  %v1921_v27 = vrot.slane %v1865_v32, %v8974_v14 }
 0x126   : > { %v1556_v42 = vrot.slane %v1518_v35, %v8974_v14  ;;  %v1563_v26 = vrot.slane %v1520_v50, %v8974_v14  ;;  %v9196_v25 = vrot.slane %v1519_v8, %v8974_v14  ;;  %v9199_v56 = vrot.slane %v1521_v60, %v8974_v14  ;;  %v980_v1 = vpop.f32.mrb[28].mxu0  ;;  %v1031_v30 = vpop.f32.mrb[28].mxu1 }
 0x127   : > { %v1926_v46 = vcombine.low %v1900_v59, %v1914_v28  ;;  %v1927_v22 = vcombine.high %v1900_v59, %v1914_v28  ;;  %v1928_v57 = vcombine.low %v1907_v24, %v1921_v27  ;;  %v1929_v44 = vcombine.high %v1907_v24, %v1921_v27  ;;  %v982_v54 = vpop.f32.mrb[29].mxu0  ;;  %v1033_v33 = vpop.f32.mrb[29].mxu1 }
 0x128   : > { %v1578_v32 = vcombine.low %v9158_v45, %v1556_v42  ;;  %v1580_v35 = vcombine.low %v9161_v21, %v1563_v26  ;;  %v1581_v50 = vcombine.high %v9161_v21, %v1563_v26  ;;  %v984_v8 = vpop.f32.mrb[30].mxu0  ;;  %v1035_v60 = vpop.f32.mrb[30].mxu1  ;;  %v2253_v39 = vcombine.low %v1031_v30, %v1033_v33 }
 0x129   : > { %v1964_v24 = vrot.slane %v1926_v46, %v8974_v14  ;;  %v1971_v28 = vrot.slane %v1928_v57, %v8974_v14  ;;  %v985_v27 = vpop.f32.mrb[31].mxu0  ;;  %v1036_v20 = vpop.f32.mrb[31].mxu1  ;;  %v9223_v8 = vrot.slane %v1927_v22, %v8974_v14  ;;  %v9226_v60 = vrot.slane %v1929_v44, %v8974_v14 }
 0x12a   : > { %v9215_v21 = vpack.c.bf16 %v1580_v35, %v1444_v51  ;;  %v9220_v26 = vpack.c.bf16 %v1581_v50, %v1445_v52  ;;  %v10837_v44 = vcombine.low %v9018_v17, %v9064_v10  ;;  %v10839_v50 = vcombine.high %v9018_v17, %v9064_v10 }
 0x12b   : > { %v1986_v46 = vcombine.low %v9170_v55, %v1964_v24  ;;  %v1987_v20 = vcombine.high %v9170_v55, %v1964_v24  ;;  %v1988_v57 = vcombine.low %v1943_v34, %v1971_v28  ;;  %v1989_v27 = vcombine.high %v1943_v34, %v1971_v28 }
 0x12c   : > { %v10835_v55 = vcombine.high %v9015_v16, %v9061_v7  ;;  %v2251_v28 = vcombine.low %v980_v1, %v982_v54  ;;  %v2252_v52 = vcombine.high %v980_v1, %v982_v54  ;;  %v10841_v16 = vcombine.high %v9146_v47, %v9150_v53 }
 0x12d   : > { %v9241_v22 = vpack.c.bf16 %v1986_v46, %v1850_v15  ;;  %v9251_v35 = vpack.c.bf16 %v1988_v57, %v10837_v44  ;;  %v9256_v24 = vpack.c.bf16 %v1989_v27, %v10839_v50  ;;  %v2254_v15 = vcombine.high %v1031_v30, %v1033_v33 }
 0x12e   : > { %v9246_v34 = vpack.c.bf16 %v1987_v20, %v10835_v55  ;;  %v1072_v46 = vpop.f32.mrb[32].mxu0  ;;  %v1123_v3 = vpop.f32.mrb[32].mxu1  ;;  %v9262_v7 = vrot.slane %v10841_v16, %v8974_v14  ;;  %v1579_v20 = vcombine.high %v9158_v45, %v1556_v42  ;;  %v10842_v10 = vcombine.low %v9003_v2, %v9035_v38 }
 0x12f   : > { %10834 = vst [vmem:[#allocation4_spill] sm:$0xff] %v9241_v22  ;;  %10838 = vst [vmem:[#allocation6_spill] sm:$0xff] %v9251_v35  ;;  %v1074_v57 = vpop.f32.mrb[33].mxu0  ;;  %v1125_v55 = vpop.f32.mrb[33].mxu1  ;;  %v2289_v30 = vrot.slane %v2251_v28, %v8974_v14  ;;  %v2296_v54 = vrot.slane %v2252_v52, %v8974_v14  ;;  %v2303_v47 = vrot.slane %v2253_v39, %v8974_v14 }
 0x130   : > { %10836 = vst [vmem:[#allocation5_spill] sm:$0xff] %v9246_v34  ;;  %10840 = vst [vmem:[#allocation7_spill] sm:$0xff] %v9256_v24  ;;  %v9270_v1 = vpack.c.bf16 %v1578_v32, %v10842_v10  ;;  %v2310_v53 = vrot.slane %v2254_v15, %v8974_v14  ;;  %v1076_v33 = vpop.f32.mrb[34].mxu0  ;;  %v1127_v45 = vpop.f32.mrb[34].mxu1  ;;  %v10843_v42 = vcombine.high %v9003_v2, %v9035_v38 }
 0x131   : > { %v1586_v44 = vcombine.low %v1072_v46, %v1074_v57  ;;  %v1587_v50 = vcombine.high %v1072_v46, %v1074_v57  ;;  %v1588_v16 = vcombine.low %v1123_v3, %v1125_v55  ;;  %v1078_v32 = vpop.f32.mrb[35].mxu0  ;;  %v1129_v10 = vpop.f32.mrb[35].mxu1  ;;  %v2314_v17 = vcombine.low %v2289_v30, %v2303_v47 }
 0x132   : > { %v9279_v27 = vpack.c.bf16 %v1579_v20, %v10843_v42  ;;  %v2315_v28 = vcombine.high %v2289_v30, %v2303_v47  ;;  %v2316_v51 = vcombine.low %v2296_v54, %v2310_v53  ;;  %v1589_v52 = vcombine.high %v1123_v3, %v1125_v55 }
 0x133   : > { %v1600_v39 = vrot.slane %v1586_v44, %v8974_v14  ;;  %v1607_v15 = vrot.slane %v1587_v50, %v8974_v14  ;;  %v1614_v59 = vrot.slane %v1588_v16, %v8974_v14  ;;  %v1994_v2 = vcombine.low %v1076_v33, %v1078_v32 }
 0x134   : > { %7666 = vmatprep.mubr.bf16.mxu0 %v9279_v27  ;;  %v2344_v38 = vrot.slane %v2314_v17, %v8974_v14  ;;  %v9287_v46 = vrot.slane %v2316_v51, %v8974_v14  ;;  %v9290_v20 = vrot.slane %v2315_v28, %v8974_v14  ;;  %v1621_v57 = vrot.slane %v1589_v52, %v8974_v14 }
 0x135   : > { %v1650_v3 = vcombine.low %v1600_v39, %v1614_v59  ;;  %v1651_v55 = vcombine.high %v1600_v39, %v1614_v59  ;;  %v1995_v30 = vcombine.high %v1076_v33, %v1078_v32  ;;  %v2008_v50 = vrot.slane %v1994_v2, %v8974_v14 }
 0x136   : > { %10844 = vst [vmem:[#allocation8_spill] sm:$0xff] %v9287_v46  ;;  %v2360_v54 = vcombine.high %v9180_v43, %v2344_v38  ;;  %v1652_v17 = vcombine.low %v1607_v15, %v1621_v57  ;;  %v1082_v42 = vpop.f32.mrb[36].mxu0  ;;  %v1133_v51 = vpop.f32.mrb[36].mxu1  ;;  %v1653_v44 = vcombine.high %v1607_v15, %v1621_v57  ;;  %v1996_v59 = vcombine.low %v1127_v45, %v1129_v10 }
 0x137   : > { %v1084_v16 = vpop.f32.mrb[37].mxu0  ;;  %v1135_v28 = vpop.f32.mrb[37].mxu1  ;;  %v2015_v52 = vrot.slane %v1995_v30, %v8974_v14  ;;  %v1997_v33 = vcombine.high %v1127_v45, %v1129_v10  ;;  %v2359_v10 = vcombine.low %v9180_v43, %v2344_v38  ;;  %v10845_v43 = vcombine.low %v9097_v36, %v9113_v9 }
 0x138   : > { %v2364_v32 = vcombine.low %v1082_v42, %v1084_v16  ;;  %v1086_v39 = vpop.f32.mrb[38].mxu0  ;;  %v1137_v23 = vpop.f32.mrb[38].mxu1  ;;  %v2365_v58 = vcombine.low %v1133_v51, %v1135_v28  ;;  %v2022_v53 = vrot.slane %v1996_v59, %v8974_v14  ;;  %v9317_v42 = vrot.slane %v1652_v17, %v8974_v14 }
 0x139   : > { %v1087_v47 = vpop.f32.mrb[39].mxu0  ;;  %v1138_v24 = vpop.f32.mrb[39].mxu1  ;;  %v2029_v35 = vrot.slane %v1997_v33, %v8974_v14  ;;  %v9331_v38 = vpack.c.bf16 %v2359_v10, %v10845_v43 }
 0x13a   : > { %v9303_v15 = vrot.slane %v2364_v32, %v8974_v14  ;;  %v9306_v2 = vrot.slane %v2365_v58, %v8974_v14  ;;  %v2058_v57 = vcombine.low %v2008_v50, %v2022_v53  ;;  %v2059_v30 = vcombine.high %v2008_v50, %v2022_v53 }
 0x13b   : > { %v2060_v34 = vcombine.low %v2015_v52, %v2029_v35  ;;  %v2061_v45 = vcombine.high %v2015_v52, %v2029_v35  ;;  %v9314_v47 = vrot.slane %v1650_v3, %v8974_v14  ;;  %v9320_v58 = vrot.slane %v1651_v55, %v8974_v14 }
 0x13c   : > { %v9323_v35 = vrot.slane %v1653_v44, %v8974_v14  ;;  %v9326_v50 = vrot.slane %v2058_v57, %v8974_v14  ;;  %v9339_v39 = vrot.slane %v2059_v30, %v8974_v14  ;;  %v10846_v3 = vcombine.high %v9097_v36, %v9113_v9 }
 0x13d   : > { %v9336_v32 = vrot.slane %v2060_v34, %v8974_v14  ;;  %v9342_v57 = vrot.slane %v2061_v45, %v8974_v14 }
 0x13e   : > { %v1174_v53 = vpop.f32.mrb[40].mxu0  ;;  %v1225_v51 = vpop.f32.mrb[40].mxu1  ;;  %v9347_v24 = vpack.c.bf16 %v2360_v54, %v10846_v3 }
 0x13f   : > { %v1176_v16 = vpop.f32.mrb[41].mxu0  ;;  %v1227_v28 = vpop.f32.mrb[41].mxu1 }
 0x140   : > { %v1590_v55 = vcombine.low %v1174_v53, %v1176_v16  ;;  %v1591_v17 = vcombine.high %v1174_v53, %v1176_v16  ;;  %v1592_v52 = vcombine.low %v1225_v51, %v1227_v28  ;;  %v1593_v59 = vcombine.high %v1225_v51, %v1227_v28  ;;  %v1178_v33 = vpop.f32.mrb[42].mxu0  ;;  %v1229_v44 = vpop.f32.mrb[42].mxu1 }
 0x141   : > { %v1180_v10 = vpop.f32.mrb[43].mxu0  ;;  %v1231_v43 = vpop.f32.mrb[43].mxu1 }
 0x142   : > { %v1628_v53 = vrot.slane %v1590_v55, %v8974_v14  ;;  %v1635_v51 = vrot.slane %v1591_v17, %v8974_v14  ;;  %v1642_v34 = vrot.slane %v1592_v52, %v8974_v14  ;;  %v1649_v16 = vrot.slane %v1593_v59, %v8974_v14 }
 0x143   : > { %v1998_v30 = vcombine.low %v1178_v33, %v1180_v10  ;;  %v1999_v28 = vcombine.high %v1178_v33, %v1180_v10  ;;  %v2000_v23 = vcombine.low %v1229_v44, %v1231_v43  ;;  %v2001_v45 = vcombine.high %v1229_v44, %v1231_v43 }
 0x144   : > { %v1654_v22 = vcombine.low %v1628_v53, %v1642_v34  ;;  %v1655_v46 = vcombine.high %v1628_v53, %v1642_v34  ;;  %v1656_v63 = vcombine.low %v1635_v51, %v1649_v16  ;;  %v1657_v29 = vcombine.high %v1635_v51, %v1649_v16 }
 0x145   : > { %v2036_v36 = vrot.slane %v1998_v30, %v8974_v14  ;;  %v2043_v9 = vrot.slane %v1999_v28, %v8974_v14  ;;  %v2050_v54 = vrot.slane %v2000_v23, %v8974_v14  ;;  %v2057_v3 = vrot.slane %v2001_v45, %v8974_v14 }
 0x146   : > { %v1692_v55 = vrot.slane %v1654_v22, %v8974_v14  ;;  %v1699_v17 = vrot.slane %v1656_v63, %v8974_v14  ;;  %v9360_v52 = vrot.slane %v1655_v46, %v8974_v14  ;;  %v1713_v59 = vrot.slane %v1657_v29, %v8974_v14  ;;  %v1184_v33 = vpop.f32.mrb[44].mxu0  ;;  %v1235_v44 = vpop.f32.mrb[44].mxu1 }
 0x147   : > { %v2062_v10 = vcombine.low %v2036_v36, %v2050_v54  ;;  %v2063_v43 = vcombine.high %v2036_v36, %v2050_v54  ;;  %v2064_v53 = vcombine.low %v2043_v9, %v2057_v3  ;;  %v2065_v51 = vcombine.high %v2043_v9, %v2057_v3  ;;  %v1186_v34 = vpop.f32.mrb[45].mxu0  ;;  %v1237_v16 = vpop.f32.mrb[45].mxu1 }
 0x148   : > { %v1714_v23 = vcombine.low %v9314_v47, %v1692_v55  ;;  %v1715_v30 = vcombine.high %v9314_v47, %v1692_v55  ;;  %v1716_v22 = vcombine.low %v9317_v42, %v1699_v17  ;;  %v1717_v63 = vcombine.high %v9317_v42, %v1699_v17  ;;  %v1188_v46 = vpop.f32.mrb[46].mxu0  ;;  %v1239_v28 = vpop.f32.mrb[46].mxu1 }
 0x149   : > { %v1718_v29 = vcombine.low %v9320_v58, %v9360_v52  ;;  %v1720_v45 = vcombine.low %v9323_v35, %v1713_v59  ;;  %v1721_v36 = vcombine.high %v9323_v35, %v1713_v59  ;;  %v2100_v9 = vrot.slane %v2062_v10, %v8974_v14  ;;  %v1189_v54 = vpop.f32.mrb[47].mxu0  ;;  %v1240_v3 = vpop.f32.mrb[47].mxu1  ;;  %v8568_v59 = vld [vmem:[%s10790_s3 + $0x108] sm:$0xff]  }
 0x14a   : > { %v10847_v47 = vcombine.high %v9009_v4, %v9041_v40  ;;  %v10848_v42 = vcombine.low %v9012_v5, %v9044_v41  ;;  %v10849_v46 = vcombine.high %v9012_v5, %v9044_v41  ;;  %v2107_v35 = vrot.slane %v2064_v53, %v8974_v14 }
 0x14b   : > { %v10850_v10 = vcombine.low %v9164_v62, %v9196_v25  ;;  %v10852_v5 = vcombine.high %v9167_v31, %v9199_v56  ;;  %v2114_v53 = vrot.slane %v2063_v43, %v8974_v14  ;;  %v2122_v3 = vcombine.low %v9326_v50, %v2100_v9 }
 0x14c   : > { %v9375_v55 = vpack.c.bf16 %v10847_v47, %v1715_v30  ;;  %v9380_v17 = vpack.c.bf16 %v10848_v42, %v1716_v22  ;;  %v9385_v28 = vpack.c.bf16 %v10849_v46, %v1717_v63  ;;  %v10851_v22 = vcombine.low %v9167_v31, %v9199_v56 }
 0x14d   : > { %v9394_v30 = vpack.c.bf16 %v1718_v29, %v10850_v10  ;;  %v9404_v41 = vpack.c.bf16 %v1721_v36, %v10852_v5  ;;  %v2121_v63 = vrot.slane %v2065_v51, %v8974_v14  ;;  %v2123_v47 = vcombine.high %v9326_v50, %v2100_v9 }
 0x14e   : > { %v9399_v54 = vpack.c.bf16 %v1720_v45, %v10851_v22  ;;  %v2124_v29 = vcombine.low %v9336_v32, %v2107_v35  ;;  %7667 = vmatmul.mubr.bf16.vlgmr.msra.gmra.mrb[48].mxu0 %v9375_v55  ;;  %v2125_v45 = vcombine.high %v9336_v32, %v2107_v35  ;;  %v2126_v42 = vcombine.low %v9339_v39, %v2114_v53 }
 0x14f   : > { %v2127_v31 = vcombine.high %v9339_v39, %v2114_v53  ;;  %v2366_v56 = vcombine.low %v1184_v33, %v1186_v34  ;;  %7715 = vmatpush3.bf16.msra.mxu0 %v8971_v6  ;;  %v2128_v43 = vcombine.low %v9342_v57, %v2121_v63  ;;  %v2129_v51 = vcombine.high %v9342_v57, %v2121_v63  ;;  %v8569_v39 = vld [vmem:[%s10790_s3 + $0x110] sm:$0xff]  }
 0x150   : > { %v10853_v50 = vcombine.low %v9021_v18, %v9067_v11  ;;  %v10854_v9 = vcombine.high %v9021_v18, %v9067_v11  ;;  %7716 = vmatprep.subr.bf16.mxu0 %v8568_v59  ;;  %v10855_v6 = vcombine.low %v9173_v49, %v9223_v8  ;;  %v10856_v57 = vcombine.high %v9173_v49, %v9223_v8 }
 0x151   : > { %v10857_v18 = vcombine.low %v9024_v19, %v9070_v12  ;;  %v10858_v46 = vcombine.high %v9024_v19, %v9070_v12  ;;  %v10859_v10 = vcombine.low %v9177_v0, %v9226_v60  ;;  %v10860_v49 = vcombine.high %v9177_v0, %v9226_v60 }
 0x152   : > { %v9421_v36 = vpack.c.bf16 %v10853_v50, %v2122_v3  ;;  %v9426_v32 = vpack.c.bf16 %v10854_v9, %v2123_v47  ;;  %v9434_v33 = vpack.c.bf16 %v2126_v42, %v10855_v6  ;;  %v9439_v34 = vpack.c.bf16 %v2127_v31, %v10856_v57 }
 0x153   : > { %v9444_v11 = vpack.c.bf16 %v10857_v18, %v2124_v29  ;;  %v9449_v35 = vpack.c.bf16 %v10858_v46, %v2125_v45  ;;  %v9454_v22 = vpack.c.bf16 %v2128_v43, %v10859_v10  ;;  %v9459_v8 = vpack.c.bf16 %v2129_v51, %v10860_v49  ;;  %7717 = vmatpush3.bf16.msra.mxu0 %v8568_v59  ;;  %v8571_v43 = vld [vmem:[%s10790_s3 + $0x120] sm:$0xff]  }
 0x154   : > { %v2388_v5 = vrot.slane %v2366_v56, %v8974_v14  ;;  %v2367_v53 = vcombine.low %v1235_v44, %v1237_v16  ;;  %v1719_v63 = vcombine.high %v9320_v58, %v9360_v52  ;;  %v10861_v19 = vcombine.low %v9009_v4, %v9041_v40  ;;  %7718 = vmatprep.subr.bf16.mxu0 %v8569_v39 }
 0x155   : > { %v2587_v3 = vrot.slane %v9394_v30, 1  ;;  %v10862_v0 = vcombine.high %v9164_v62, %v9196_v25  ;;  %v2584_v44 = vrot.slane %v9270_v1, 1  ;;  %v10863_v40 = vcombine.low %v9303_v15, %v9306_v2  ;;  %v8570_v25 = vld [vmem:[%s10790_s3 + $0x118] sm:$0xff]  }
 0x156   : > { %v9467_v12 = vpack.c.bf16 %v10861_v19, %v1714_v23  ;;  %v2395_v47 = vrot.slane %v2367_v53, %v8974_v14  ;;  %v2589_v62 = vrot.slane %v9279_v27, 1  ;;  %v10864_v29 = vcombine.high %v9303_v15, %v9306_v2  ;;  %v8574_v15 = vld [vmem:[%s10790_s3 + $0x8] sm:$0xff]  }
 0x157   : > { %v9474_v60 = vpack.c.bf16 %v1719_v63, %v10862_v0  ;;  %v2406_v16 = vrot.slane %v10863_v40, %v8974_v14  ;;  %7719 = vmatpush3.bf16.msra.mxu0 %v8569_v39  ;;  %v10865_v9 = vcombine.high %v9110_v61, %v9116_v13  ;;  %v10866_v6 = vcombine.high %v9262_v7, %v9290_v20  ;;  %v8572_v63 = vld [vmem:[%s10790_s3 + $0x128] sm:$0xff]  }
 0x158   : > { %v2585_v58 = vrot.slane %v9467_v12, 1  ;;  %v2398_v52 = vcombine.low %v2388_v5, %v2395_v47  ;;  %v2399_v4 = vcombine.high %v2388_v5, %v2395_v47  ;;  %v2413_v45 = vrot.slane %v10864_v29, %v8974_v14  ;;  %7720 = vmatprep.subr.bf16.mxu0 %v8570_v25  ;;  %v8575_v47 = vld [vmem:[%s10790_s3 + $0x130] sm:$0xff]  }
 0x159   : > { %7670 = vmatprep.mubr.bf16.mxu0 %v9474_v60  ;;  %v2590_v56 = vsel %vm2583_vm2, %v2587_v3, %v2589_v62  ;;  %v2591_v18 = vrot.slane %v9375_v55, 1  ;;  %v2593_v46 = vrot.slane %v9474_v60, 1  ;;  %v10867_v10 = vcombine.low %v9110_v61, %v9116_v13 }
 0x15a   : > { %v2586_v23 = vsel %vm2583_vm2, %v2584_v44, %v2585_v58  ;;  %v2588_v59 = vsel %vm2583_vm2, %v2585_v58, %v2587_v3  ;;  %v2420_v42 = vrot.slane %v2398_v52, %v8974_v14  ;;  %v2427_v31 = vrot.slane %v2399_v4, %v8974_v14  ;;  %7671 = vmatmul.mubr.bf16.gmra.mrb[52].mxu0 %v9215_v21  ;;  %v8578_v58 = vld [vmem:[%s10790_s3 + $0x20] sm:$0xff]   ;;  %v8579_v52 = vld [vmem:[%s10790_s3 + $0x138] sm:$0xff]  }
 0x15b   : > { %7474 = vmatprep.mubr.bf16.mxu1 %v2586_v23  ;;  %7674 = vmatprep.mubr.bf16.mxu0 %v9380_v17  ;;  %v10868_v5 = vcombine.low %v9262_v7, %v9290_v20  ;;  %v9534_v19 = vsel %vm2583_vm2, %v2589_v62, %v2591_v18  ;;  %v2631_v61 = vrot.slane %v9331_v38, 1  ;;  %v9541_v7 = vsel %vm2583_vm2, %v2591_v18, %v2593_v46  ;;  %v8577_v20 = vld [vmem:[%s10790_s3 + $0x18] sm:$0xff]   ;;  %v9582_v23 = vld [vmem:[%s10790_s3 + $0x140] sm:$0xff]   ;;  %v8581_v62 = vld [vmem:[%s10790_s3 + $0x30] sm:$0xff]  }
 0x15c   : > { %7475 = vmatmul.mubr.bf16.vlgmr.msra.gmra.mrb[48].mxu1 %v2588_v59  ;;  %v2428_v2 = vcombine.low %v2406_v16, %v2420_v42  ;;  %v2429_v51 = vcombine.high %v2406_v16, %v2420_v42  ;;  %v2430_v50 = vcombine.low %v2413_v45, %v2427_v31  ;;  %v2431_v14 = vcombine.high %v2413_v45, %v2427_v31  ;;  %v8580_v16 = vld [vmem:[%s10790_s3 + $0x28] sm:$0xff]   ;;  %v10870_v31 = vld [vmem:[#allocation2_spill] sm:$0xff] }
 0x15d   : > { %7478 = vmatprep.mubr.bf16.mxu1 %v2590_v56  ;;  %7721 = vmatpush3.bf16.msra.mxu0 %v8570_v25  ;;  %v2597_v0 = vrot.slane %v9380_v17, 1  ;;  %v2595_v44 = vrot.slane %v9215_v21, 1  ;;  %v2599_v59 = vrot.slane %v9399_v54, 1  ;;  %v10810_v25 = vrot.slane %v9347_v24, 2 }
 0x15e   : > { %v9507_v39 = vpack.c.bf16 %v10865_v9, %v2429_v51  ;;  %v9512_v57 = vpack.c.bf16 %v2431_v14, %v10866_v6  ;;  %7523 = vmatpush3.bf16.msra.mxu1 %v9136_v48  ;;  %7722 = vmatprep.subr.bf16.mxu0 %v8571_v43  ;;  %v9520_v49 = vpack.c.bf16 %v10867_v10, %v2428_v2  ;;  %v8576_v48 = vld [vmem:[%s10790_s3 + $0x10] sm:$0xff]   ;;  %v2601_v45 = vrot.slane %v9220_v26, 1 }
 0x15f   : > { %7524 = vmatprep.subr.bf16.mxu1 %v8574_v15  ;;  %v9525_v53 = vpack.c.bf16 %v2430_v50, %v10868_v5  ;;  %v9567_v4 = vsel %vm2583_vm2, %v2593_v46, %v2595_v44  ;;  %v9572_v40 = vsel %vm2583_vm2, %v2595_v44, %v2597_v0  ;;  %v10871_v56 = vcombine.low %v9103_v37, %v10870_v31  ;;  %v10875_v14 = vld [vmem:[#allocation4_spill] sm:$0xff]  ;;  %v8582_v46 = vld [vmem:[%s10790_s3 + $0x38] sm:$0xff]  }
 0x160   : > { %v3877_v13 = vrot.slane %v9520_v49, 1  ;;  %v10808_v29 = vrot.slane %v9507_v39, 2  ;;  %v10809_v42 = vrot.slane %v9512_v57, 2  ;;  %v9600_v50 = vsel %vm2583_vm2, %v2597_v0, %v2599_v59 }
 0x161   : > { %7723 = vmatpush3.bf16.msra.mxu0 %v8571_v43  ;;  %v10872_v43 = vld [vmem:[#allocation3_spill] sm:$0xff]  ;;  %v3881_v9 = vrot.slane %v9347_v24, 1  ;;  %v10806_v37 = vrot.slane %v9507_v39, 1  ;;  %v9614_v18 = vsel %vm2583_vm2, %v2599_v59, %v2601_v45  ;;  %v10807_v5 = vrot.slane %v9512_v57, 1  ;;  %v9653_v59 = vld [vmem:[%s10790_s3 + $0x80] sm:$0xff]  }
 0x162   : > { %7675 = vmatmul.mubr.bf16.gmra.mrb[56].mxu0 %v9399_v54  ;;  %7525 = vmatpush3.bf16.msra.mxu1 %v8574_v15  ;;  %v9553_v3 = vsel %vm2583_vm2, %v2631_v61, %v3877_v13  ;;  %v10873_v15 = vld [vmem:[#allocation8_spill] sm:$0xff]  ;;  %v9609_v6 = vsel %vm3188_vm3, %v10810_v25, %v10808_v29  ;;  %v2603_v0 = vrot.slane %v9385_v28, 1  ;;  %v2605_v44 = vrot.slane %v9404_v41, 1 }
 0x163   : > { %7678 = vmatprep.mubr.bf16.mxu0 %v9220_v26  ;;  %10869 = vst [vmem:[#allocation9_spill] sm:$0xff] %v9553_v3  ;;  %7724 = vmatprep.subr.bf16.mxu0 %v8572_v63  ;;  %v10874_v2 = vcombine.low %v10872_v43, %v10873_v15  ;;  %v2611_v43 = vrot.slane %v9434_v33, 1 }
 0x164   : > { %7479 = vmatmul.mubr.bf16.gmra.mrb[52].mxu1 %v9534_v19  ;;  %7526 = vmatprep.subr.bf16.mxu1 %v8576_v48 }
 0x165   : > { %7482 = vmatprep.mubr.bf16.mxu1 %v9541_v7  ;;  %7725 = vmatpush3.bf16.msra.mxu0 %v8572_v63  ;;  %v2524_v51 = vpack.c.bf16 %v10874_v2, %v10871_v56 }
 0x166   : > { %7527 = vmatpush3.bf16.msra.mxu1 %v8576_v48  ;;  %7726 = vmatprep.subr.bf16.mxu0 %v8575_v47  ;;  %v9627_v48 = vsel %vm2583_vm2, %v3881_v9, %v10806_v37 }
 0x167   : > { %7528 = vmatprep.subr.bf16.mxu1 %v8577_v20  ;;  %v5135_v10 = vrot.slane %v2524_v51, 2  ;;  %v4820_v63 = vrot.slane %v2524_v51, 1  ;;  %10876 = vst [vmem:[#allocation2_spill] sm:$0xff] %v9627_v48  ;;  %v10879_v51 = vld [vmem:[#allocation6_spill] sm:$0xff] }
 0x169   : > { %7727 = vmatpush3.bf16.msra.mxu0 %v8575_v47  ;;  %v9637_v47 = vsel %vm2583_vm2, %v10807_v5, %v4820_v63  ;;  %v2617_v63 = vrot.slane %v9439_v34, 1 }
 0x16a   : > { %7679 = vmatmul.mubr.bf16.gmra.mrb[60].mxu0 %v9385_v28  ;;  %7529 = vmatpush3.bf16.msra.mxu1 %v8577_v20  ;;  %v9632_v20 = vsel %vm3188_vm3, %v10809_v42, %v5135_v10  ;;  %10877 = vst [vmem:[#allocation3_spill] sm:$0xff] %v9637_v47  ;;  %v2615_v10 = vrot.slane %v9426_v32, 1  ;;  %v2629_v42 = vrot.slane %v9459_v8, 1 }
 0x16b   : > { %7682 = vmatprep.mubr.bf16.mxu0 %v9404_v41  ;;  %7530 = vmatprep.subr.bf16.mxu1 %v8578_v58 }
 0x16c   : > { %7483 = vmatmul.mubr.bf16.gmra.mrb[56].mxu1 %v9567_v4  ;;  %7728 = vmatprep.subr.bf16.mxu0 %v8579_v52 }
 0x16d   : > { %7486 = vmatprep.mubr.bf16.mxu1 %v9572_v40  ;;  %7729 = vmatpush3.bf16.msra.mxu0 %v8579_v52  ;;  %v9647_v52 = vsel %vm2583_vm2, %v2603_v0, %v2605_v44 }
 0x16e   : > { %7531 = vmatpush3.bf16.msra.mxu1 %v8578_v58  ;;  %7778 = vmatprep.subr.bf16.mxu0 %v9582_v23  ;;  %v9642_v58 = vsel %vm2583_vm2, %v2601_v45, %v2603_v0  ;;  %v2607_v45 = vrot.slane %v10875_v14, 1 }
 0x16f   : > { %7532 = vmatprep.subr.bf16.mxu1 %v8580_v16 }
 0x170   : > { %v9660_v31 = vsel %vm2583_vm2, %v2605_v44, %v2607_v45  ;;  %v9689_v44 = vsel %vm2583_vm2, %v2615_v10, %v2617_v63 }
 0x172   : > { %7683 = vmatmul.mubr.bf16.gmra.mrb[64].mxu0 %v10875_v14  ;;  %7533 = vmatpush3.bf16.msra.mxu1 %v8580_v16  ;;  %v10878_v16 = vld [vmem:[#allocation5_spill] sm:$0xff] }
 0x173   : > { %7686 = vmatprep.mubr.bf16.mxu0 %v9421_v36  ;;  %7534 = vmatprep.subr.bf16.mxu1 %v8581_v62  ;;  %v2613_v15 = vrot.slane %v10878_v16, 1  ;;  %10882 = vst [vmem:[#allocation5_spill] sm:$0xff] %v9689_v44 }
 0x174   : > { %7487 = vmatmul.mubr.bf16.gmra.mrb[60].mxu1 %v9600_v50 }
 0x175   : > { %7490 = vmatprep.mubr.bf16.mxu1 %v9614_v18  ;;  %v9684_v0 = vsel %vm2583_vm2, %v2613_v15, %v2615_v10  ;;  %v2623_v10 = vrot.slane %v9454_v22, 1 }
 0x176   : > { %7535 = vmatpush3.bf16.msra.mxu1 %v8581_v62  ;;  %v2609_v62 = vrot.slane %v9421_v36, 1  ;;  %10881 = vst [vmem:[#allocation4_spill] sm:$0xff] %v9684_v0 }
 0x177   : > { %7536 = vmatprep.subr.bf16.mxu1 %v8582_v46 }
 0x178   : > { %v9665_v56 = vsel %vm2583_vm2, %v2607_v45, %v2609_v62  ;;  %v9672_v2 = vsel %vm2583_vm2, %v2609_v62, %v2611_v43  ;;  %v10883_v62 = vld [vmem:[#allocation7_spill] sm:$0xff]  ;;  %v2621_v45 = vrot.slane %v9444_v11, 1 }
 0x179   : > { %v2625_v5 = vrot.slane %v10883_v62, 1 }
 0x17a   : > { %7687 = vmatmul.mubr.bf16.gmra.mrb[68].mxu0 %v9434_v33  ;;  %7537 = vmatpush3.bf16.msra.mxu1 %v8582_v46  ;;  %v9677_v46 = vsel %vm2583_vm2, %v2611_v43, %v2613_v15  ;;  %v2619_v43 = vrot.slane %v10879_v51, 1  ;;  %v9708_v29 = vsel %vm2583_vm2, %v2621_v45, %v2623_v10 }
 0x17b   : > { %7690 = vmatprep.mubr.bf16.mxu0 %v10878_v16  ;;  %7586 = vmatprep.subr.bf16.mxu1 %v9653_v59  ;;  %10880 = vst [vmem:[#allocation8_spill] sm:$0xff] %v9677_v46  ;;  %10886 = vst [vmem:[#allocation10_spill] sm:$0xff] %v9708_v29 }
 0x17c   : > { %7491 = vmatmul.mubr.bf16.gmra.mrb[64].mxu1 %v9642_v58  ;;  %v9696_v37 = vsel %vm2583_vm2, %v2617_v63, %v2619_v43  ;;  %v9701_v15 = vsel %vm2583_vm2, %v2619_v43, %v2621_v45  ;;  %v9713_v63 = vsel %vm2583_vm2, %v2623_v10, %v2625_v5  ;;  %v2627_v43 = vrot.slane %v9449_v35, 1  ;;  %v8584_v10 = vld [vmem:[%s10790_s3 + $0x148] sm:$0xff]  }
 0x17d   : > { %7494 = vmatprep.mubr.bf16.mxu1 %v9647_v52  ;;  %10884 = vst [vmem:[#allocation6_spill] sm:$0xff] %v9696_v37  ;;  %10885 = vst [vmem:[#allocation7_spill] sm:$0xff] %v9701_v15 }
 0x17e   : > { %10887 = vst [vmem:[#allocation11_spill] sm:$0xff] %v9713_v63  ;;  %v9720_v25 = vsel %vm2583_vm2, %v2625_v5, %v2627_v43  ;;  %v9725_v45 = vsel %vm2583_vm2, %v2627_v43, %v2629_v42  ;;  %v9735_v5 = vsel %vm2583_vm2, %v2629_v42, %v2631_v61  ;;  %v8586_v61 = vld [vmem:[%s10790_s3 + $0x158] sm:$0xff]   ;;  %v8588_v42 = vld [vmem:[%s10790_s3 + $0x168] sm:$0xff]  }
 0x17f   : > { %10888 = vst [vmem:[#allocation12_spill] sm:$0xff] %v9720_v25  ;;  %10889 = vst [vmem:[#allocation13_spill] sm:$0xff] %v9725_v45  ;;  %v8593_v43 = vld [vmem:[%s10790_s3 + $0x98] sm:$0xff]  }
 0x180   : > { %10890 = vst [vmem:[#allocation14_spill] sm:$0xff] %v9735_v5 }
 0x182   : > { %7691 = vmatmul.mubr.bf16.gmra.mrb[72].mxu0 %v9426_v32 }
 0x183   : > { %7694 = vmatprep.mubr.bf16.mxu0 %v9439_v34 }
 0x184   : > { %7495 = vmatmul.mubr.bf16.gmra.mrb[68].mxu1 %v9660_v31 }
 0x185   : > { %7498 = vmatprep.mubr.bf16.mxu1 %v9665_v56 }
 0x18a   : > { %7695 = vmatmul.mubr.bf16.gmra.mrb[76].mxu0 %v10879_v51 }
 0x18b   : > { %7698 = vmatprep.mubr.bf16.mxu0 %v9444_v11 }
 0x18c   : > { %7499 = vmatmul.mubr.bf16.gmra.mrb[72].mxu1 %v9672_v2 }
 0x18d   : > { %7502 = vmatprep.mubr.bf16.mxu1 %v9677_v46 }
 0x192   : > { %7699 = vmatmul.mubr.bf16.gmra.mrb[80].mxu0 %v9454_v22 }
 0x193   : > { %7702 = vmatprep.mubr.bf16.mxu0 %v10883_v62 }
 0x194   : > { %7503 = vmatmul.mubr.bf16.gmra.mrb[76].mxu1 %v9684_v0 }
 0x195   : > { %7506 = vmatprep.mubr.bf16.mxu1 %v9689_v44 }
 0x19a   : > { %7703 = vmatmul.mubr.bf16.gmra.mrb[84].mxu0 %v9449_v35 }
 0x19b   : > { %7706 = vmatprep.mubr.bf16.mxu0 %v9459_v8 }
 0x19c   : > { %7507 = vmatmul.mubr.bf16.gmra.mrb[80].mxu1 %v9696_v37 }
 0x19d   : > { %7510 = vmatprep.mubr.bf16.mxu1 %v9701_v15 }
 0x1a2   : > { %7707 = vmatmul.mubr.bf16.gmra.mrb[88].mxu0 %v9331_v38 }
 0x1a3   : > { %7710 = vmatprep.mubr.bf16.mxu0 %v9520_v49 }
 0x1a4   : > { %7511 = vmatmul.mubr.bf16.gmra.mrb[84].mxu1 %v9708_v29 }
 0x1a5   : > { %7514 = vmatprep.mubr.bf16.mxu1 %v9713_v63 }
 0x1aa   : > { %7711 = vmatmul.mubr.bf16.gmra.mrb[92].mxu0 %v9525_v53 }
 0x1ab   : > { %7730 = vmatprep.mubr.bf16.mxu0 %v9534_v19  ;;  %v8585_v19 = vld [vmem:[%s10790_s3 + $0x150] sm:$0xff]  }
 0x1ac   : > { %7515 = vmatmul.mubr.bf16.gmra.mrb[88].mxu1 %v9720_v25 }
 0x1ad   : > { %7518 = vmatprep.mubr.bf16.mxu1 %v9725_v45 }
 0x1b2   : > { %7731 = vmatmul.mubr.bf16.vlgmr.msra.gmra.mrb[48].mxu0 %v9541_v7  ;;  %v8590_v7 = vld [vmem:[%s10790_s3 + $0x88] sm:$0xff]  }
 0x1b3   : > { %7734 = vmatprep.mubr.bf16.mxu0 %v9567_v4  ;;  %7779 = vmatpush3.bf16.msra.mxu0 %v9582_v23  ;;  %v8587_v4 = vld [vmem:[%s10790_s3 + $0x160] sm:$0xff]   ;;  %v8592_v23 = vld [vmem:[%s10790_s3 + $0x90] sm:$0xff]  }
 0x1b4   : > { %7519 = vmatmul.mubr.bf16.gmra.mrb[92].mxu1 %v9735_v5  ;;  %7780 = vmatprep.subr.bf16.mxu0 %v8584_v10 }
 0x1b5   : > { %7538 = vmatprep.mubr.bf16.mxu1 %v9270_v1 }
 0x1b7   : > { %7781 = vmatpush3.bf16.msra.mxu0 %v8584_v10  ;;  %v8594_v10 = vld [vmem:[%s10790_s3 + $0xa0] sm:$0xff]  }
 0x1b8   : > { %7782 = vmatprep.subr.bf16.mxu0 %v8585_v19 }
 0x1ba   : > { %7735 = vmatmul.mubr.bf16.gmra.mrb[52].mxu0 %v9572_v40 }
 0x1bb   : > { %7738 = vmatprep.mubr.bf16.mxu0 %v9600_v50  ;;  %7783 = vmatpush3.bf16.msra.mxu0 %v8585_v19  ;;  %v8595_v19 = vld [vmem:[%s10790_s3 + $0x178] sm:$0xff]  }
 0x1bc   : > { %7539 = vmatmul.mubr.bf16.vlgmr.msra.gmra.mrb[48].mxu1 %v9467_v12  ;;  %7784 = vmatprep.subr.bf16.mxu0 %v8586_v61 }
 0x1bd   : > { %7542 = vmatprep.mubr.bf16.mxu1 %v9394_v30  ;;  %7587 = vmatpush3.bf16.msra.mxu1 %v9653_v59  ;;  %v8591_v59 = vld [vmem:[%s10790_s3 + $0x170] sm:$0xff]  }
 0x1be   : > { %7588 = vmatprep.subr.bf16.mxu1 %v8590_v7 }
 0x1bf   : > { %7785 = vmatpush3.bf16.msra.mxu0 %v8586_v61  ;;  %v8596_v61 = vld [vmem:[%s10790_s3 + $0xa8] sm:$0xff]  }
 0x1c0   : > { %7786 = vmatprep.subr.bf16.mxu0 %v8587_v4 }
 0x1c1   : > { %7589 = vmatpush3.bf16.msra.mxu1 %v8590_v7  ;;  %v8599_v7 = vld [vmem:[%s10790_s3 + $0x180] sm:$0xff]  }
 0x1c2   : > { %7739 = vmatmul.mubr.bf16.gmra.mrb[56].mxu0 %v9614_v18  ;;  %7590 = vmatprep.subr.bf16.mxu1 %v8592_v23 }
 0x1c3   : > { %7742 = vmatprep.mubr.bf16.mxu0 %v9642_v58  ;;  %7787 = vmatpush3.bf16.msra.mxu0 %v8587_v4  ;;  %v8597_v4 = vld [vmem:[%s10790_s3 + $0xb0] sm:$0xff]  }
 0x1c4   : > { %7543 = vmatmul.mubr.bf16.gmra.mrb[52].mxu1 %v9279_v27  ;;  %7788 = vmatprep.subr.bf16.mxu0 %v8588_v42 }
 0x1c5   : > { %7546 = vmatprep.mubr.bf16.mxu1 %v9375_v55  ;;  %7591 = vmatpush3.bf16.msra.mxu1 %v8592_v23  ;;  %v8598_v23 = vld [vmem:[%s10790_s3 + $0xb8] sm:$0xff]  }
 0x1c6   : > { %7592 = vmatprep.subr.bf16.mxu1 %v8593_v43 }
 0x1c7   : > { %7789 = vmatpush3.bf16.msra.mxu0 %v8588_v42  ;;  %v9807_v42 = vld [vmem:[%s10790_s3 + $0x200] sm:$0xff]  }
 0x1c8   : > { %7790 = vmatprep.subr.bf16.mxu0 %v8591_v59 }
 0x1c9   : > { %7593 = vmatpush3.bf16.msra.mxu1 %v8593_v43  ;;  %v3879_v43 = vrot.slane %v9525_v53, 1 }
 0x1ca   : > { %7743 = vmatmul.mubr.bf16.gmra.mrb[60].mxu0 %v9647_v52  ;;  %7594 = vmatprep.subr.bf16.mxu1 %v8594_v10 }
 0x1cb   : > { %7746 = vmatprep.mubr.bf16.mxu0 %v9660_v31  ;;  %7791 = vmatpush3.bf16.msra.mxu0 %v8591_v59  ;;  %v9832_v59 = vsel %vm2583_vm2, %v3877_v13, %v3879_v43 }
 0x1cc   : > { %7547 = vmatmul.mubr.bf16.gmra.mrb[56].mxu1 %v9474_v60  ;;  %7792 = vmatprep.subr.bf16.mxu0 %v8595_v19  ;;  %10891 = vst [vmem:[#allocation15_spill] sm:$0xff] %v9832_v59 }
 0x1cd   : > { %7550 = vmatprep.mubr.bf16.mxu1 %v9215_v21  ;;  %7595 = vmatpush3.bf16.msra.mxu1 %v8594_v10  ;;  %v3196_v10 = vrot.slane %v9375_v55, 2  ;;  %v3190_v55 = vrot.slane %v9467_v12, 2  ;;  %v3202_v12 = vrot.slane %v9380_v17, 2 }
 0x1ce   : > { %7596 = vmatprep.subr.bf16.mxu1 %v8596_v61 }
 0x1cf   : > { %7793 = vmatpush3.bf16.msra.mxu0 %v8595_v19  ;;  %v3194_v19 = vrot.slane %v9279_v27, 2  ;;  %v3200_v27 = vrot.slane %v9215_v21, 2 }
 0x1d0   : > { %7842 = vmatprep.subr.bf16.mxu0 %v8599_v7 }
 0x1d1   : > { %7597 = vmatpush3.bf16.msra.mxu1 %v8596_v61  ;;  %v9842_v61 = vsel %vm2583_vm2, %v3879_v43, %v3881_v9  ;;  %v3197_v13 = vsel %vm3188_vm3, %v3194_v19, %v3196_v10  ;;  %v8600_v43 = vld [vmem:[%s10790_s3 + $0x188] sm:$0xff]  }
 0x1d2   : > { %7747 = vmatmul.mubr.bf16.gmra.mrb[64].mxu0 %v9665_v56  ;;  %7598 = vmatprep.subr.bf16.mxu1 %v8597_v4  ;;  %10892 = vst [vmem:[#allocation16_spill] sm:$0xff] %v9842_v61 }
 0x1d3   : > { %7750 = vmatprep.mubr.bf16.mxu0 %v9672_v2 }
 0x1d4   : > { %7551 = vmatmul.mubr.bf16.gmra.mrb[60].mxu1 %v9380_v17 }
 0x1d5   : > { %7554 = vmatprep.mubr.bf16.mxu1 %v9399_v54  ;;  %7599 = vmatpush3.bf16.msra.mxu1 %v8597_v4  ;;  %v3198_v4 = vrot.slane %v9474_v60, 2  ;;  %v3192_v60 = vrot.slane %v9394_v30, 2  ;;  %v9879_v30 = vld [vmem:[%s10790_s3 + $0x208] sm:$0xff]  }
 0x1d6   : > { %7600 = vmatprep.subr.bf16.mxu1 %v8598_v23 }
 0x1d7   : > { %v3199_v9 = vsel %vm3188_vm3, %v3196_v10, %v3198_v4  ;;  %v3201_v47 = vsel %vm3188_vm3, %v3198_v4, %v3200_v27  ;;  %v3204_v10 = vrot.slane %v9399_v54, 2  ;;  %v9866_v4 = vsel %vm3188_vm3, %v3200_v27, %v3202_v12 }
 0x1d8   : > { %10893 = vst [vmem:[#allocation17_spill] sm:$0xff] %v9866_v4  ;;  %v3195_v27 = vsel %vm3188_vm3, %v3192_v60, %v3194_v19  ;;  %v3206_v19 = vrot.slane %v9220_v26, 2 }
 0x1d9   : > { %7601 = vmatpush3.bf16.msra.mxu1 %v8598_v23  ;;  %v3189_v23 = vrot.slane %v9270_v1, 2  ;;  %v8601_v1 = vld [vmem:[%s10790_s3 + $0x190] sm:$0xff]  }
 0x1da   : > { %7751 = vmatmul.mubr.bf16.gmra.mrb[68].mxu0 %v9677_v46  ;;  %8130 = vmatprep.subr.bf16.mxu1 %v9807_v42 }
 0x1db   : > { %7754 = vmatprep.mubr.bf16.mxu0 %v9684_v0  ;;  %v3191_v48 = vsel %vm3188_vm3, %v3189_v23, %v3190_v55  ;;  %v9874_v23 = vsel %vm3188_vm3, %v3202_v12, %v3204_v10  ;;  %v9892_v12 = vld [vmem:[%s10790_s3 + $0x210] sm:$0xff]   ;;  %v4194_v0 = vrot.slane %v9525_v53, 2 }
 0x1dc   : > { %7555 = vmatmul.mubr.bf16.gmra.mrb[64].mxu1 %v9220_v26  ;;  %10894 = vst [vmem:[#allocation18_spill] sm:$0xff] %v9874_v23 }
 0x1dd   : > { %7558 = vmatprep.mubr.bf16.mxu1 %v9385_v28 }
 0x1e2   : > { %7755 = vmatmul.mubr.bf16.gmra.mrb[72].mxu0 %v9689_v44 }
 0x1e3   : > { %7758 = vmatprep.mubr.bf16.mxu0 %v9696_v37  ;;  %v3236_v37 = vrot.slane %v9331_v38, 2 }
 0x1e4   : > { %7559 = vmatmul.mubr.bf16.gmra.mrb[68].mxu1 %v9404_v41 }
 0x1e5   : > { %7562 = vmatprep.mubr.bf16.mxu1 %v10875_v14 }
 0x1ea   : > { %7759 = vmatmul.mubr.bf16.gmra.mrb[76].mxu0 %v9701_v15 }
 0x1eb   : > { %7762 = vmatprep.mubr.bf16.mxu0 %v9708_v29  ;;  %v3230_v29 = vrot.slane %v10883_v62, 2 }
 0x1ec   : > { %7563 = vmatmul.mubr.bf16.gmra.mrb[72].mxu1 %v9421_v36 }
 0x1ed   : > { %7566 = vmatprep.mubr.bf16.mxu1 %v9434_v33 }
 0x1f2   : > { %7763 = vmatmul.mubr.bf16.gmra.mrb[80].mxu0 %v9713_v63 }
 0x1f3   : > { %7766 = vmatprep.mubr.bf16.mxu0 %v9720_v25  ;;  %v3228_v25 = vrot.slane %v9454_v22, 2 }
 0x1f4   : > { %7567 = vmatmul.mubr.bf16.gmra.mrb[76].mxu1 %v10878_v16 }
 0x1f5   : > { %7570 = vmatprep.mubr.bf16.mxu1 %v9426_v32  ;;  %v10024_v15 = vsel %vm3188_vm3, %v3228_v25, %v3230_v29 }
 0x1fa   : > { %7767 = vmatmul.mubr.bf16.gmra.mrb[84].mxu0 %v9725_v45  ;;  %v3226_v45 = vrot.slane %v9444_v11, 2 }
 0x1fb   : > { %7770 = vmatprep.mubr.bf16.mxu0 %v9735_v5  ;;  %v3224_v5 = vrot.slane %v10879_v51, 2 }
 0x1fc   : > { %7571 = vmatmul.mubr.bf16.gmra.mrb[80].mxu1 %v9439_v34 }
 0x1fd   : > { %7574 = vmatprep.mubr.bf16.mxu1 %v10879_v51  ;;  %v10012_v63 = vsel %vm3188_vm3, %v3224_v5, %v3226_v45 }
 0x202   : > { %7771 = vmatmul.mubr.bf16.gmra.mrb[88].mxu0 %v9553_v3  ;;  %v9971_v3 = vld [vmem:[%s10790_s3 + $0x238] sm:$0xff]  }
 0x203   : > { %7774 = vmatprep.mubr.bf16.mxu0 %v9832_v59  ;;  %v3216_v59 = vrot.slane %v9434_v33, 2  ;;  %10897 = vst [vmem:[#allocation21_spill] sm:$0xff] %v9971_v3 }
 0x204   : > { %7575 = vmatmul.mubr.bf16.gmra.mrb[84].mxu1 %v9444_v11 }
 0x205   : > { %7578 = vmatprep.mubr.bf16.mxu1 %v9454_v22 }
 0x20a   : > { %7775 = vmatmul.mubr.bf16.gmra.mrb[92].mxu0 %v9842_v61 }
 0x20b   : > { %7794 = vmatprep.mubr.bf16.mxu0 %v3197_v13 }
 0x20c   : > { %7579 = vmatmul.mubr.bf16.gmra.mrb[88].mxu1 %v10883_v62 }
 0x20d   : > { %7582 = vmatprep.mubr.bf16.mxu1 %v9449_v35 }
 0x212   : > { %7795 = vmatmul.mubr.bf16.vlgmr.msra.gmra.mrb[48].mxu0 %v3199_v9 }
 0x213   : > { %7798 = vmatprep.mubr.bf16.mxu0 %v3201_v47  ;;  %7843 = vmatpush3.bf16.msra.mxu0 %v8599_v7  ;;  %v3193_v7 = vsel %vm3188_vm3, %v3190_v55, %v3192_v60  ;;  %v8603_v55 = vld [vmem:[%s10790_s3 + $0x1a0] sm:$0xff]   ;;  %v8604_v60 = vld [vmem:[%s10790_s3 + $0x1a8] sm:$0xff]  }
 0x214   : > { %7583 = vmatmul.mubr.bf16.gmra.mrb[92].mxu1 %v9459_v8  ;;  %7844 = vmatprep.subr.bf16.mxu0 %v8600_v43 }
 0x215   : > { %7602 = vmatprep.mubr.bf16.mxu1 %v3191_v48  ;;  %v8602_v48 = vld [vmem:[%s10790_s3 + $0x198] sm:$0xff]  }
 0x217   : > { %7845 = vmatpush3.bf16.msra.mxu0 %v8600_v43  ;;  %v3208_v43 = vrot.slane %v9385_v28, 2 }
 0x218   : > { %7846 = vmatprep.subr.bf16.mxu0 %v8601_v1 }
 0x21a   : > { %7799 = vmatmul.mubr.bf16.gmra.mrb[52].mxu0 %v9866_v4 }
 0x21b   : > { %7802 = vmatprep.mubr.bf16.mxu0 %v9874_v23  ;;  %7847 = vmatpush3.bf16.msra.mxu0 %v8601_v1  ;;  %v9896_v1 = vsel %vm3188_vm3, %v3204_v10, %v3206_v19  ;;  %v3210_v10 = vrot.slane %v9404_v41, 2 }
 0x21c   : > { %7603 = vmatmul.mubr.bf16.vlgmr.msra.gmra.mrb[48].mxu1 %v3193_v7  ;;  %7848 = vmatprep.subr.bf16.mxu0 %v8602_v48  ;;  %10895 = vst [vmem:[#allocation19_spill] sm:$0xff] %v9896_v1  ;;  %v9904_v7 = vsel %vm3188_vm3, %v3206_v19, %v3208_v43  ;;  %v9922_v19 = vld [vmem:[%s10790_s3 + $0x220] sm:$0xff]  }
 0x21d   : > { %7606 = vmatprep.mubr.bf16.mxu1 %v3195_v27  ;;  %8138 = vmatpush3.bf16.msra.mxu1 %v9807_v42  ;;  %10896 = vst [vmem:[#allocation20_spill] sm:$0xff] %v9904_v7  ;;  %v8606_v27 = vld [vmem:[%s10790_s3 + $0x1b0] sm:$0xff]  }
 0x21e   : > { %8131 = vmatprep.subr.bf16.mxu1 %v9879_v30 }
 0x21f   : > { %7849 = vmatpush3.bf16.msra.mxu0 %v8602_v48  ;;  %v9910_v48 = vld [vmem:[%s10790_s3 + $0x218] sm:$0xff]  }
 0x220   : > { %7850 = vmatprep.subr.bf16.mxu0 %v8603_v55 }
 0x221   : > { %8139 = vmatpush3.bf16.msra.mxu1 %v9879_v30 }
 0x222   : > { %7803 = vmatmul.mubr.bf16.gmra.mrb[56].mxu0 %v9896_v1  ;;  %8132 = vmatprep.subr.bf16.mxu1 %v9892_v12 }
 0x223   : > { %7806 = vmatprep.mubr.bf16.mxu0 %v9904_v7  ;;  %7851 = vmatpush3.bf16.msra.mxu0 %v8603_v55  ;;  %v8610_v55 = vld [vmem:[%s10790_s3 + $0x1b8] sm:$0xff]  }
 0x224   : > { %7607 = vmatmul.mubr.bf16.gmra.mrb[52].mxu1 %v3197_v13  ;;  %7852 = vmatprep.subr.bf16.mxu0 %v8604_v60  ;;  %v3212_v13 = vrot.slane %v10875_v14, 2 }
 0x225   : > { %7610 = vmatprep.mubr.bf16.mxu1 %v3199_v9  ;;  %8140 = vmatpush3.bf16.msra.mxu1 %v9892_v12  ;;  %v9926_v9 = vsel %vm3188_vm3, %v3208_v43, %v3210_v10  ;;  %v3214_v43 = vrot.slane %v9421_v36, 2 }
 0x226   : > { %8133 = vmatprep.subr.bf16.mxu1 %v9910_v48  ;;  %v9934_v61 = vsel %vm3188_vm3, %v3210_v10, %v3212_v13  ;;  %v9949_v10 = vld [vmem:[%s10790_s3 + $0x1c0] sm:$0xff]  }
 0x227   : > { %7853 = vmatpush3.bf16.msra.mxu0 %v8604_v60  ;;  %v9940_v60 = vld [vmem:[%s10790_s3 + $0x228] sm:$0xff]  }
 0x228   : > { %7854 = vmatprep.subr.bf16.mxu0 %v8606_v27 }
 0x229   : > { %8141 = vmatpush3.bf16.msra.mxu1 %v9910_v48 }
 0x22a   : > { %7807 = vmatmul.mubr.bf16.gmra.mrb[60].mxu0 %v9926_v9  ;;  %8134 = vmatprep.subr.bf16.mxu1 %v9922_v19 }
 0x22b   : > { %7810 = vmatprep.mubr.bf16.mxu0 %v9934_v61  ;;  %7855 = vmatpush3.bf16.msra.mxu0 %v8606_v27  ;;  %v9959_v27 = vsel %vm3188_vm3, %v3212_v13, %v3214_v43  ;;  %v3220_v13 = vrot.slane %v9426_v32, 2 }
 0x22c   : > { %7611 = vmatmul.mubr.bf16.gmra.mrb[56].mxu1 %v3201_v47  ;;  %7856 = vmatprep.subr.bf16.mxu0 %v8610_v55  ;;  %v9956_v47 = vld [vmem:[%s10790_s3 + $0x230] sm:$0xff]  }
 0x22d   : > { %7614 = vmatprep.mubr.bf16.mxu1 %v9866_v4  ;;  %8142 = vmatpush3.bf16.msra.mxu1 %v9922_v19  ;;  %v9965_v4 = vsel %vm3188_vm3, %v3214_v43, %v3216_v59 }
 0x22e   : > { %8135 = vmatprep.subr.bf16.mxu1 %v9940_v60 }
 0x22f   : > { %7857 = vmatpush3.bf16.msra.mxu0 %v8610_v55  ;;  %v3218_v55 = vrot.slane %v10878_v16, 2 }
 0x230   : > { %7906 = vmatprep.subr.bf16.mxu0 %v9949_v10 }
 0x231   : > { %8143 = vmatpush3.bf16.msra.mxu1 %v9940_v60  ;;  %v9981_v43 = vsel %vm3188_vm3, %v3216_v59, %v3218_v55  ;;  %v3222_v59 = vrot.slane %v9439_v34, 2 }
 0x232   : > { %7811 = vmatmul.mubr.bf16.gmra.mrb[64].mxu0 %v9959_v27  ;;  %8136 = vmatprep.subr.bf16.mxu1 %v9956_v47 }
 0x233   : > { %7814 = vmatprep.mubr.bf16.mxu0 %v9965_v4 }
 0x234   : > { %7615 = vmatmul.mubr.bf16.gmra.mrb[60].mxu1 %v9874_v23  ;;  %v9986_v23 = vsel %vm3188_vm3, %v3218_v55, %v3220_v13  ;;  %v10000_v55 = vsel %vm3188_vm3, %v3220_v13, %v3222_v59  ;;  %v10016_v13 = vsel %vm3188_vm3, %v3226_v45, %v3228_v25  ;;  %v3234_v45 = vrot.slane %v9459_v8, 2 }
 0x235   : > { %7618 = vmatprep.mubr.bf16.mxu1 %v9896_v1  ;;  %8144 = vmatpush3.bf16.msra.mxu1 %v9956_v47  ;;  %v9994_v1 = vld [vmem:[%s10793_s6] sm:$0xff]  }
 0x236   : > { %8137 = vmatprep.subr.bf16.mxu1 %v9971_v3  ;;  %v10040_v25 = vsel %vm3188_vm3, %v3234_v45, %v3236_v37 }
 0x239   : > { %8145 = vmatpush3.bf16.msra.mxu1 %v9971_v3 }
 0x23a   : > { %7815 = vmatmul.mubr.bf16.gmra.mrb[68].mxu0 %v9981_v43  ;;  %8034 = vmatprep.subr.bf16.mxu1 %v9994_v1 }
 0x23b   : > { %7818 = vmatprep.mubr.bf16.mxu0 %v9986_v23 }
 0x23c   : > { %7619 = vmatmul.mubr.bf16.gmra.mrb[64].mxu1 %v9904_v7  ;;  %v10004_v7 = vsel %vm3188_vm3, %v3222_v59, %v3224_v5  ;;  %v3232_v59 = vrot.slane %v9449_v35, 2 }
 0x23d   : > { %7622 = vmatprep.mubr.bf16.mxu1 %v9926_v9 }
 0x23e   : > { %v10028_v5 = vsel %vm3188_vm3, %v3230_v29, %v3232_v59  ;;  %v10036_v44 = vsel %vm3188_vm3, %v3232_v59, %v3234_v45  ;;  %v4192_v29 = vrot.slane %v9520_v49, 2  ;;  %v10898_v45 = vrot.slane %v9347_v24, 2 }
 0x240   : > { %v10048_v3 = vsel %vm3188_vm3, %v3236_v37, %v4192_v29  ;;  %v10052_v59 = vsel %vm3188_vm3, %v4192_v29, %v4194_v0  ;;  %v10060_v46 = vsel %vm3188_vm3, %v4194_v0, %v10898_v45  ;;  %v8616_v37 = vld [vmem:[%s10790_s3 + $0x1c8] sm:$0xff]   ;;  %v8618_v0 = vld [vmem:[%s10790_s3 + $0x1d8] sm:$0xff]  }
 0x242   : > { %7819 = vmatmul.mubr.bf16.gmra.mrb[72].mxu0 %v10000_v55 }
 0x243   : > { %7822 = vmatprep.mubr.bf16.mxu0 %v10004_v7 }
 0x244   : > { %7623 = vmatmul.mubr.bf16.gmra.mrb[68].mxu1 %v9934_v61 }
 0x245   : > { %7626 = vmatprep.mubr.bf16.mxu1 %v9959_v27 }
 0x24a   : > { %7823 = vmatmul.mubr.bf16.gmra.mrb[76].mxu0 %v10012_v63 }
 0x24b   : > { %7826 = vmatprep.mubr.bf16.mxu0 %v10016_v13 }
 0x24c   : > { %7627 = vmatmul.mubr.bf16.gmra.mrb[72].mxu1 %v9965_v4 }
 0x24d   : > { %7630 = vmatprep.mubr.bf16.mxu1 %v9981_v43 }
 0x252   : > { %7827 = vmatmul.mubr.bf16.gmra.mrb[80].mxu0 %v10024_v15 }
 0x253   : > { %7830 = vmatprep.mubr.bf16.mxu0 %v10028_v5 }
 0x254   : > { %7631 = vmatmul.mubr.bf16.gmra.mrb[76].mxu1 %v9986_v23 }
 0x255   : > { %7634 = vmatprep.mubr.bf16.mxu1 %v10000_v55 }
 0x25a   : > { %7831 = vmatmul.mubr.bf16.gmra.mrb[84].mxu0 %v10036_v44 }
 0x25b   : > { %7834 = vmatprep.mubr.bf16.mxu0 %v10040_v25 }
 0x25c   : > { %7635 = vmatmul.mubr.bf16.gmra.mrb[80].mxu1 %v10004_v7 }
 0x25d   : > { %7638 = vmatprep.mubr.bf16.mxu1 %v10012_v63 }
 0x262   : > { %7835 = vmatmul.mubr.bf16.gmra.mrb[88].mxu0 %v10048_v3 }
 0x263   : > { %7838 = vmatprep.mubr.bf16.mxu0 %v10052_v59 }
 0x264   : > { %7639 = vmatmul.mubr.bf16.gmra.mrb[84].mxu1 %v10016_v13 }
 0x265   : > { %7642 = vmatprep.mubr.bf16.mxu1 %v10024_v15 }
 0x26a   : > { %7839 = vmatmul.mubr.bf16.gmra.mrb[92].mxu0 %v10060_v46 }
 0x26b   : > { %7858 = vmatprep.mubr.bf16.mxu0 %v9215_v21  ;;  %v8617_v21 = vld [vmem:[%s10790_s3 + $0x1d0] sm:$0xff]  }
 0x26c   : > { %7643 = vmatmul.mubr.bf16.gmra.mrb[88].mxu1 %v10028_v5 }
 0x26d   : > { %7646 = vmatprep.mubr.bf16.mxu1 %v10036_v44 }
 0x272   : > { %7859 = vmatmul.mubr.bf16.vlgmr.msra.gmra.mrb[48].mxu0 %v9380_v17  ;;  %v8623_v17 = vld [vmem:[%s10793_s6 + $0x8] sm:$0xff]  }
 0x273   : > { %7862 = vmatprep.mubr.bf16.mxu0 %v9399_v54  ;;  %7907 = vmatpush3.bf16.msra.mxu0 %v9949_v10  ;;  %v8619_v54 = vld [vmem:[%s10790_s3 + $0x1e0] sm:$0xff]  }
 0x274   : > { %7647 = vmatmul.mubr.bf16.gmra.mrb[92].mxu1 %v10040_v25  ;;  %7908 = vmatprep.subr.bf16.mxu0 %v8616_v37  ;;  %v10913_v10 = vld [vmem:[#allocation10_spill] sm:$0xff] }
 0x275   : > { %7994 = vmatprep.mubr.bf16.mxu1 %v9926_v9  ;;  %v8629_v9 = vld [vmem:[%s10793_s6 + $0x30] sm:$0xff]  }
 0x277   : > { %7909 = vmatpush3.bf16.msra.mxu0 %v8616_v37 }
 0x278   : > { %7910 = vmatprep.subr.bf16.mxu0 %v8617_v21 }
 0x27a   : > { %7863 = vmatmul.mubr.bf16.gmra.mrb[52].mxu0 %v9220_v26  ;;  %v8624_v26 = vld [vmem:[%s10793_s6 + $0x10] sm:$0xff]  }
 0x27b   : > { %7866 = vmatprep.mubr.bf16.mxu0 %v9385_v28  ;;  %7911 = vmatpush3.bf16.msra.mxu0 %v8617_v21  ;;  %v8620_v28 = vld [vmem:[%s10790_s3 + $0x1e8] sm:$0xff]   ;;  %v10917_v21 = vld [vmem:[#allocation14_spill] sm:$0xff] }
 0x27c   : > { %7995 = vmatmul.mubr.bf16.vlgmr.msra.gmra.mrb[96].mxu1 %v9934_v61  ;;  %7912 = vmatprep.subr.bf16.mxu0 %v8618_v0  ;;  %v8626_v61 = vld [vmem:[%s10793_s6 + $0x18] sm:$0xff]  }
 0x27d   : > { %7998 = vmatprep.mubr.bf16.mxu1 %v9959_v27  ;;  %8035 = vmatpush3.bf16.msra.mxu1 %v9994_v1  ;;  %v8621_v1 = vld [vmem:[%s10790_s3 + $0x1f0] sm:$0xff]  }
 0x27e   : > { %8036 = vmatprep.subr.bf16.mxu1 %v8623_v17 }
 0x27f   : > { %7913 = vmatpush3.bf16.msra.mxu0 %v8618_v0  ;;  %v10918_v0 = vld [vmem:[#allocation9_spill] sm:$0xff] }
 0x280   : > { %7914 = vmatprep.subr.bf16.mxu0 %v8619_v54 }
 0x281   : > { %8037 = vmatpush3.bf16.msra.mxu1 %v8623_v17 }
 0x282   : > { %7867 = vmatmul.mubr.bf16.gmra.mrb[56].mxu0 %v9404_v41  ;;  %8038 = vmatprep.subr.bf16.mxu1 %v8624_v26  ;;  %v8627_v41 = vld [vmem:[%s10793_s6 + $0x20] sm:$0xff]  }
 0x283   : > { %7870 = vmatprep.mubr.bf16.mxu0 %v10875_v14  ;;  %7915 = vmatpush3.bf16.msra.mxu0 %v8619_v54  ;;  %v8625_v14 = vld [vmem:[%s10790_s3 + $0x1f8] sm:$0xff]  }
 0x284   : > { %7999 = vmatmul.mubr.bf16.gmra.mrb[100].mxu1 %v9965_v4  ;;  %7916 = vmatprep.subr.bf16.mxu0 %v8620_v28  ;;  %v8628_v4 = vld [vmem:[%s10793_s6 + $0x28] sm:$0xff]  }
 0x285   : > { %8002 = vmatprep.mubr.bf16.mxu1 %v9981_v43  ;;  %8039 = vmatpush3.bf16.msra.mxu1 %v8624_v26 }
 0x286   : > { %8040 = vmatprep.subr.bf16.mxu1 %v8626_v61 }
 0x287   : > { %7917 = vmatpush3.bf16.msra.mxu0 %v8620_v28 }
 0x288   : > { %7918 = vmatprep.subr.bf16.mxu0 %v8621_v1 }
 0x289   : > { %8041 = vmatpush3.bf16.msra.mxu1 %v8626_v61  ;;  %v10919_v61 = vld [vmem:[#allocation15_spill] sm:$0xff] }
 0x28a   : > { %7871 = vmatmul.mubr.bf16.gmra.mrb[60].mxu0 %v9421_v36  ;;  %8042 = vmatprep.subr.bf16.mxu1 %v8627_v41  ;;  %v8630_v36 = vld [vmem:[%s10793_s6 + $0x38] sm:$0xff]  }
 0x28b   : > { %7874 = vmatprep.mubr.bf16.mxu0 %v9434_v33  ;;  %7919 = vmatpush3.bf16.msra.mxu0 %v8621_v1  ;;  %v10900_v33 = vrot.slane %v9507_v39, 2  ;;  %v10920_v1 = vld [vmem:[#allocation16_spill] sm:$0xff] }
 0x28c   : > { %8003 = vmatmul.mubr.bf16.gmra.mrb[104].mxu1 %v9986_v23  ;;  %7920 = vmatprep.subr.bf16.mxu0 %v8625_v14  ;;  %v10911_v23 = vld [vmem:[#allocation6_spill] sm:$0xff] }
 0x28d   : > { %8006 = vmatprep.mubr.bf16.mxu1 %v10000_v55  ;;  %8043 = vmatpush3.bf16.msra.mxu1 %v8627_v41 }
 0x28e   : > { %8044 = vmatprep.subr.bf16.mxu1 %v8628_v4 }
 0x28f   : > { %7921 = vmatpush3.bf16.msra.mxu0 %v8625_v14 }
 0x290   : > { %7970 = vmatprep.subr.bf16.mxu0 %v9807_v42 }
 0x291   : > { %8045 = vmatpush3.bf16.msra.mxu1 %v8628_v4 }
 0x292   : > { %7875 = vmatmul.mubr.bf16.gmra.mrb[64].mxu0 %v10878_v16  ;;  %8046 = vmatprep.subr.bf16.mxu1 %v8629_v9  ;;  %v8642_v16 = vld [vmem:[%s8878_s15 + $0x58] sm:$0xff]  }
 0x293   : > { %7878 = vmatprep.mubr.bf16.mxu0 %v9426_v32  ;;  %v10899_v32 = vrot.slane %v9512_v57, 2 }
 0x294   : > { %8007 = vmatmul.mubr.bf16.gmra.mrb[108].mxu1 %v10004_v7 }
 0x295   : > { %8010 = vmatprep.mubr.bf16.mxu1 %v10012_v63  ;;  %8047 = vmatpush3.bf16.msra.mxu1 %v8629_v9 }
 0x296   : > { %8048 = vmatprep.subr.bf16.mxu1 %v8630_v36 }
 0x299   : > { %8049 = vmatpush3.bf16.msra.mxu1 %v8630_v36  ;;  %v10921_v36 = vld [vmem:[#allocation2_spill] sm:$0xff] }
 0x29a   : > { %7879 = vmatmul.mubr.bf16.gmra.mrb[68].mxu0 %v9439_v34  ;;  %v5134_v34 = vsel %vm3188_vm3, %v10900_v33, %v10899_v32  ;;  %v10922_v32 = vrot.slane %v9512_v57, 1  ;;  %v10923_v33 = vrot.slane %v9507_v39, 1 }
 0x29b   : > { %7882 = vmatprep.mubr.bf16.mxu0 %v10879_v51  ;;  %v10907_v51 = vld [vmem:[#allocation5_spill] sm:$0xff] }
 0x29c   : > { %8011 = vmatmul.mubr.bf16.gmra.mrb[112].mxu1 %v10016_v13 }
 0x29d   : > { %8014 = vmatprep.mubr.bf16.mxu1 %v10024_v15  ;;  %v8644_v15 = vld [vmem:[%s8878_s15 + $0x68] sm:$0xff]  }
 0x2a2   : > { %7883 = vmatmul.mubr.bf16.gmra.mrb[72].mxu0 %v9444_v11  ;;  %v8631_v11 = vld [vmem:[%s8878_s15] sm:$0xff]  }
 0x2a3   : > { %7886 = vmatprep.mubr.bf16.mxu0 %v9454_v22  ;;  %v8634_v22 = vld [vmem:[%s8878_s15 + $0x18] sm:$0xff]  }
 0x2a4   : > { %8015 = vmatmul.mubr.bf16.gmra.mrb[116].mxu1 %v10028_v5  ;;  %v10915_v5 = vld [vmem:[#allocation12_spill] sm:$0xff] }
 0x2a5   : > { %8018 = vmatprep.mubr.bf16.mxu1 %v10036_v44 }
 0x2aa   : > { %7887 = vmatmul.mubr.bf16.gmra.mrb[76].mxu0 %v10883_v62 }
 0x2ab   : > { %7890 = vmatprep.mubr.bf16.mxu0 %v9449_v35  ;;  %v8633_v35 = vld [vmem:[%s8878_s15 + $0x10] sm:$0xff]  }
 0x2ac   : > { %8019 = vmatmul.mubr.bf16.gmra.mrb[120].mxu1 %v10040_v25  ;;  %v10916_v25 = vld [vmem:[#allocation13_spill] sm:$0xff] }
 0x2ad   : > { %8022 = vmatprep.mubr.bf16.mxu1 %v10048_v3  ;;  %v8639_v3 = vld [vmem:[%s8878_s15 + $0x40] sm:$0xff]  }
 0x2b2   : > { %7891 = vmatmul.mubr.bf16.gmra.mrb[80].mxu0 %v9459_v8  ;;  %v8635_v8 = vld [vmem:[%s8878_s15 + $0x20] sm:$0xff]  }
 0x2b3   : > { %7894 = vmatprep.mubr.bf16.mxu0 %v9331_v38  ;;  %v8632_v38 = vld [vmem:[%s8878_s15 + $0x8] sm:$0xff]  }
 0x2b4   : > { %8023 = vmatmul.mubr.bf16.gmra.mrb[124].mxu1 %v10052_v59 }
 0x2b5   : > { %8026 = vmatprep.mubr.bf16.mxu1 %v10060_v46 }
 0x2ba   : > { %7895 = vmatmul.mubr.bf16.gmra.mrb[84].mxu0 %v9520_v49  ;;  %v8637_v49 = vld [vmem:[%s8878_s15 + $0x30] sm:$0xff]  }
 0x2bb   : > { %7898 = vmatprep.mubr.bf16.mxu0 %v9525_v53  ;;  %v8638_v53 = vld [vmem:[%s8878_s15 + $0x38] sm:$0xff]  }
 0x2bc   : > { %8027 = vmatmul.mubr.bf16.gmra.mrb[128].mxu1 %v9609_v6  ;;  %v10901_v6 = vld [vmem:[#allocation8_spill] sm:$0xff] }
 0x2bd   : > { %8030 = vmatprep.mubr.bf16.mxu1 %v5134_v34  ;;  %v4819_v34 = vsel %vm2583_vm2, %v10923_v33, %v10922_v32  ;;  %v8648_v32 = vld [vmem:[%s10796_s9 + $0x8] sm:$0xff]  }
 0x2c2   : > { %7899 = vmatmul.mubr.bf16.gmra.mrb[88].mxu0 %v9347_v24  ;;  %v8636_v24 = vld [vmem:[%s8878_s15 + $0x28] sm:$0xff]  }
 0x2c3   : > { %7902 = vmatprep.mubr.bf16.mxu0 %v9507_v39  ;;  %v10926_v39 = vld [vmem:[#allocation18_spill] sm:$0xff] }
 0x2c4   : > { %8031 = vmatmul.mubr.bf16.gmra.mrb[132].mxu1 %v9632_v20 }
 0x2c5   : > { %8050 = vmatprep.mubr.bf16.mxu1 %v8631_v11 }
 0x2ca   : > { %7903 = vmatmul.mubr.bf16.gmra.mrb[92].mxu0 %v9512_v57 }
 0x2cb   : > { %7922 = vmatprep.mubr.bf16.mxu0 %v9572_v40  ;;  %v8640_v40 = vld [vmem:[%s8878_s15 + $0x48] sm:$0xff]  }
 0x2cc   : > { %8051 = vmatmul.mubr.bf16.vlgmr.msra.gmra.mrb[136].mxu1 %v8632_v38 }
 0x2cd   : > { %8054 = vmatprep.mubr.bf16.mxu1 %v8633_v35 }
 0x2d2   : > { %7923 = vmatmul.mubr.bf16.vlgmr.msra.gmra.mrb[48].mxu0 %v9600_v50  ;;  %v8641_v50 = vld [vmem:[%s8878_s15 + $0x50] sm:$0xff]  }
 0x2d3   : > { %7926 = vmatprep.mubr.bf16.mxu0 %v9614_v18  ;;  %7971 = vmatpush3.bf16.msra.mxu0 %v9807_v42  ;;  %v10902_v18 = vld [vmem:[#allocation21_spill] sm:$0xff]  ;;  %v8645_v42 = vld [vmem:[%s8878_s15 + $0x70] sm:$0xff]  }
 0x2d4   : > { %7972 = vmatprep.subr.bf16.mxu0 %v9879_v30  ;;  %8055 = vmatmul.mubr.bf16.gmra.mrb[140].mxu1 %v8634_v22 }
 0x2d5   : > { %8058 = vmatprep.mubr.bf16.mxu1 %v8635_v8  ;;  %v10924_v8 = vld [vmem:[#allocation3_spill] sm:$0xff] }
 0x2d7   : > { %7973 = vmatpush3.bf16.msra.mxu0 %v9879_v30  ;;  %v10912_v30 = vld [vmem:[#allocation7_spill] sm:$0xff] }
 0x2d8   : > { %7974 = vmatprep.subr.bf16.mxu0 %v9892_v12 }
 0x2da   : > { %7927 = vmatmul.mubr.bf16.gmra.mrb[52].mxu0 %v9642_v58 }
 0x2db   : > { %7930 = vmatprep.mubr.bf16.mxu0 %v9647_v52  ;;  %7975 = vmatpush3.bf16.msra.mxu0 %v9892_v12 }
 0x2dc   : > { %8059 = vmatmul.mubr.bf16.gmra.mrb[144].mxu1 %v8636_v24  ;;  %7976 = vmatprep.subr.bf16.mxu0 %v9910_v48  ;;  %v10925_v24 = vld [vmem:[#allocation17_spill] sm:$0xff] }
 0x2dd   : > { %8062 = vmatprep.mubr.bf16.mxu1 %v8637_v49 }
 0x2df   : > { %7977 = vmatpush3.bf16.msra.mxu0 %v9910_v48 }
 0x2e0   : > { %7978 = vmatprep.subr.bf16.mxu0 %v9922_v19 }
 0x2e2   : > { %7931 = vmatmul.mubr.bf16.gmra.mrb[56].mxu0 %v9660_v31 }
 0x2e3   : > { %7934 = vmatprep.mubr.bf16.mxu0 %v9665_v56  ;;  %7979 = vmatpush3.bf16.msra.mxu0 %v9922_v19  ;;  %v8643_v56 = vld [vmem:[%s8878_s15 + $0x60] sm:$0xff]   ;;  %v8646_v19 = vld [vmem:[%s8878_s15 + $0x78] sm:$0xff]  }
 0x2e4   : > { %8063 = vmatmul.mubr.bf16.gmra.mrb[148].mxu1 %v8638_v53  ;;  %7980 = vmatprep.subr.bf16.mxu0 %v9940_v60 }
 0x2e5   : > { %8066 = vmatprep.mubr.bf16.mxu1 %v8639_v3 }
 0x2e7   : > { %7981 = vmatpush3.bf16.msra.mxu0 %v9940_v60 }
 0x2e8   : > { %7982 = vmatprep.subr.bf16.mxu0 %v9956_v47 }
 0x2ea   : > { %7935 = vmatmul.mubr.bf16.gmra.mrb[60].mxu0 %v9672_v2  ;;  %v10906_v2 = vld [vmem:[#allocation4_spill] sm:$0xff] }
 0x2eb   : > { %7938 = vmatprep.mubr.bf16.mxu0 %v10901_v6  ;;  %7983 = vmatpush3.bf16.msra.mxu0 %v9956_v47  ;;  %v10914_v47 = vld [vmem:[#allocation11_spill] sm:$0xff] }
 0x2ec   : > { %8067 = vmatmul.mubr.bf16.gmra.mrb[152].mxu1 %v8640_v40  ;;  %7984 = vmatprep.subr.bf16.mxu0 %v10902_v18  ;;  %v10927_v40 = vld [vmem:[#allocation19_spill] sm:$0xff] }
 0x2ed   : > { %8070 = vmatprep.mubr.bf16.mxu1 %v8641_v50 }
 0x2ef   : > { %v7604_v20 = vpop.f32.mrb[48].mxu1  ;;  %7985 = vmatpush3.bf16.msra.mxu0 %v10902_v18 }
 0x2f0   : > { %v10193_v58 = vpop.f32.mrb[49].mxu1 }
 0x2f1   : > { %10903 = vst [vmem:[#allocation8_spill] sm:$0xff] %v10193_v58  ;;  %v10196_v52 = vpop.f32.mrb[50].mxu1 }
 0x2f2   : > { %10904 = vst [vmem:[#allocation21_spill] sm:$0xff] %v10196_v52  ;;  %v10199_v31 = vpop.f32.mrb[51].mxu1  ;;  %7939 = vmatmul.mubr.bf16.gmra.mrb[64].mxu0 %v10906_v2 }
 0x2f3   : > { %10905 = vst [vmem:[#allocation22_spill] sm:$0xff] %v10199_v31  ;;  %7942 = vmatprep.mubr.bf16.mxu0 %v10907_v51 }
 0x2f4   : > { %8071 = vmatmul.mubr.bf16.gmra.mrb[156].mxu1 %v8642_v16  ;;  %v10929_v16 = vld [vmem:[#allocation20_spill] sm:$0xff] }
 0x2f5   : > { %8074 = vmatprep.mubr.bf16.mxu1 %v8643_v56 }
 0x2f7   : > { %v10204_v46 = vpop.f32.mrb[52].mxu1 }
 0x2f8   : > { %10908 = vst [vmem:[#allocation4_spill] sm:$0xff] %v10204_v46  ;;  %v10206_v44 = vpop.f32.mrb[53].mxu1 }
 0x2f9   : > { %10909 = vst [vmem:[#allocation5_spill] sm:$0xff] %v10206_v44  ;;  %v10208_v62 = vpop.f32.mrb[54].mxu1 }
 0x2fa   : > { %10910 = vst [vmem:[#allocation23_spill] sm:$0xff] %v10208_v62  ;;  %v3362_v63 = vpop.f32.mrb[55].mxu1  ;;  %7943 = vmatmul.mubr.bf16.gmra.mrb[68].mxu0 %v10911_v23 }
 0x2fb   : > { %7946 = vmatprep.mubr.bf16.mxu0 %v10912_v30 }
 0x2fc   : > { %8075 = vmatmul.mubr.bf16.gmra.mrb[160].mxu1 %v8644_v15 }
 0x2fd   : > { %8078 = vmatprep.mubr.bf16.mxu1 %v8645_v42 }
 0x2ff   : > { %v10214_v12 = vpop.f32.mrb[56].mxu1 }
 0x300   : > { %v3374_v7 = vpop.f32.mrb[57].mxu1 }
 0x301   : > { %v7613_v48 = vpop.f32.mrb[58].mxu1 }
 0x302   : > { %v10217_v60 = vpop.f32.mrb[59].mxu1  ;;  %7947 = vmatmul.mubr.bf16.gmra.mrb[72].mxu0 %v10913_v10 }
 0x303   : > { %7950 = vmatprep.mubr.bf16.mxu0 %v10914_v47 }
 0x304   : > { %8079 = vmatmul.mubr.bf16.gmra.mrb[164].mxu1 %v8646_v19 }
 0x307   : > { %v7616_v27 = vpop.f32.mrb[60].mxu1 }
 0x308   : > { %v10221_v43 = vpop.f32.mrb[61].mxu1 }
 0x309   : > { %v10223_v55 = vpop.f32.mrb[62].mxu1 }
 0x30a   : > { %v10225_v13 = vpop.f32.mrb[63].mxu1  ;;  %7951 = vmatmul.mubr.bf16.gmra.mrb[76].mxu0 %v10915_v5 }
 0x30b   : > { %7954 = vmatprep.mubr.bf16.mxu0 %v10916_v25 }
 0x30f   : > { %v10229_v29 = vpop.f32.mrb[64].mxu1 }
 0x310   : > { %v10231_v59 = vpop.f32.mrb[65].mxu1 }
 0x311   : > { %v10233_v45 = vpop.f32.mrb[66].mxu1 }
 0x312   : > { %v3406_v37 = vpop.f32.mrb[67].mxu1  ;;  %7955 = vmatmul.mubr.bf16.gmra.mrb[80].mxu0 %v10917_v21 }
 0x313   : > { %7958 = vmatprep.mubr.bf16.mxu0 %v10918_v0 }
 0x317   : > { %v10237_v17 = vpop.f32.mrb[68].mxu1 }
 0x318   : > { %v3418_v54 = vpop.f32.mrb[69].mxu1 }
 0x319   : > { %v7625_v26 = vpop.f32.mrb[70].mxu1 }
 0x31a   : > { %v10239_v28 = vpop.f32.mrb[71].mxu1  ;;  %7959 = vmatmul.mubr.bf16.gmra.mrb[84].mxu0 %v10919_v61  ;;  %v8647_v61 = vld [vmem:[%s10796_s9] sm:$0xff]  }
 0x31b   : > { %7962 = vmatprep.mubr.bf16.mxu0 %v10920_v1  ;;  %8082 = vmatprep.subr.bf16.mxu1 %v8647_v61 }
 0x31c   : > { %8083 = vmatpush3.bf16.msra.mxu1 %v8647_v61 }
 0x31d   : > { %8084 = vmatprep.subr.bf16.mxu1 %v8648_v32 }
 0x31f   : > { %v7628_v41 = vpop.f32.mrb[72].mxu1 }
 0x320   : > { %v10243_v14 = vpop.f32.mrb[73].mxu1  ;;  %8085 = vmatpush3.bf16.msra.mxu1 %v8648_v32 }
 0x321   : > { %v10245_v4 = vpop.f32.mrb[74].mxu1 }
 0x322   : > { %v10247_v9 = vpop.f32.mrb[75].mxu1  ;;  %7963 = vmatmul.mubr.bf16.gmra.mrb[88].mxu0 %v10921_v36 }
 0x323   : > { %7966 = vmatprep.mubr.bf16.mxu0 %v4819_v34  ;;  %v8649_v34 = vld [vmem:[%s10796_s9 + $0x10] sm:$0xff]  }
 0x324   : > { %8086 = vmatprep.subr.bf16.mxu1 %v8649_v34 }
 0x325   : > { %8087 = vmatpush3.bf16.msra.mxu1 %v8649_v34 }
 0x327   : > { %v10255_v11 = vpop.f32.mrb[76].mxu1 }
 0x328   : > { %v10257_v38 = vpop.f32.mrb[77].mxu1 }
 0x329   : > { %v10259_v35 = vpop.f32.mrb[78].mxu1 }
 0x32a   : > { %v3450_v22 = vpop.f32.mrb[79].mxu1  ;;  %7967 = vmatmul.mubr.bf16.gmra.mrb[92].mxu0 %v10924_v8 }
 0x32b   : > { %7986 = vmatprep.mubr.bf16.mxu0 %v10925_v24 }
 0x32f   : > { %v10263_v49 = vpop.f32.mrb[80].mxu1 }
 0x330   : > { %v3462_v53 = vpop.f32.mrb[81].mxu1 }
 0x331   : > { %v7637_v57 = vpop.f32.mrb[82].mxu1 }
 0x332   : > { %v10265_v3 = vpop.f32.mrb[83].mxu1  ;;  %7987 = vmatmul.mubr.bf16.vlgmr.msra.gmra.mrb[48].mxu0 %v10926_v39 }
 0x333   : > { %7990 = vmatprep.mubr.bf16.mxu0 %v10927_v40 }
 0x337   : > { %v7640_v50 = vpop.f32.mrb[84].mxu1 }
 0x338   : > { %v10269_v6 = vpop.f32.mrb[85].mxu1 }
 0x339   : > { %v10271_v18 = vpop.f32.mrb[86].mxu1 }
 0x33a   : > { %v10273_v20 = vpop.f32.mrb[87].mxu1  ;;  %7991 = vmatmul.mubr.bf16.gmra.mrb[52].mxu0 %v10929_v16  ;;  %v8650_v16 = vld [vmem:[%s10796_s9 + $0x18] sm:$0xff]  }
 0x33b   : > { %10928 = vst [vmem:[#allocation6_spill] sm:$0xff] %v10273_v20  ;;  %8088 = vmatprep.subr.bf16.mxu1 %v8650_v16 }
 0x33c   : > { %8089 = vmatpush3.bf16.msra.mxu1 %v8650_v16 }
 0x33f   : > { %v10276_v56 = vpop.f32.mrb[88].mxu1 }
 0x340   : > { %10930 = vst [vmem:[#allocation7_spill] sm:$0xff] %v10276_v56  ;;  %v10278_v2 = vpop.f32.mrb[89].mxu1 }
 0x341   : > { %10931 = vst [vmem:[#allocation10_spill] sm:$0xff] %v10278_v2  ;;  %v10280_v51 = vpop.f32.mrb[90].mxu1 }
 0x342   : > { %10932 = vst [vmem:[#allocation11_spill] sm:$0xff] %v10280_v51  ;;  %v3494_v15 = vpop.f32.mrb[91].mxu1 }
 0x347   : > { %v10282_v63 = vpop.f32.mrb[92].mxu1 }
 0x348   : > { %10933 = vst [vmem:[#allocation12_spill] sm:$0xff] %v10282_v63  ;;  %v3506_v42 = vpop.f32.mrb[93].mxu1 }
 0x349   : > { %v7649_v23 = vpop.f32.mrb[94].mxu1 }
 0x34a   : > { %v10284_v30 = vpop.f32.mrb[95].mxu1 }
 0x34b   : > { %10934 = vst [vmem:[#allocation13_spill] sm:$0xff] %v10284_v30 }
 0x34f   : > { %v10286_v7 = vpop.f32.mrb[96].mxu1 }
 0x350   : > { %v5252_v48 = vpop.f32.mrb[97].mxu1 }
 0x351   : > { %v7997_v19 = vpop.f32.mrb[98].mxu1  ;;  %v8651_v48 = vld [vmem:[%s10796_s9 + $0x20] sm:$0xff]  }
 0x352   : > { %v10288_v10 = vpop.f32.mrb[99].mxu1  ;;  %8090 = vmatprep.subr.bf16.mxu1 %v8651_v48 }
 0x353   : > { %8091 = vmatpush3.bf16.msra.mxu1 %v8651_v48 }
 0x357   : > { %v8000_v47 = vpop.f32.mrb[100].mxu1 }
 0x358   : > { %v10290_v27 = vpop.f32.mrb[101].mxu1  ;;  %v8652_v47 = vld [vmem:[%s10796_s9 + $0x28] sm:$0xff]  }
 0x359   : > { %v10292_v5 = vpop.f32.mrb[102].mxu1  ;;  %8092 = vmatprep.subr.bf16.mxu1 %v8652_v47 }
 0x35a   : > { %v10294_v25 = vpop.f32.mrb[103].mxu1  ;;  %8093 = vmatpush3.bf16.msra.mxu1 %v8652_v47 }
 0x35f   : > { %v10296_v37 = vpop.f32.mrb[104].mxu1 }
 0x360   : > { %v10298_v21 = vpop.f32.mrb[105].mxu1 }
 0x361   : > { %v10300_v0 = vpop.f32.mrb[106].mxu1 }
 0x362   : > { %v5284_v54 = vpop.f32.mrb[107].mxu1 }
 0x367   : > { %v10302_v26 = vpop.f32.mrb[108].mxu1 }
 0x368   : > { %v5296_v1 = vpop.f32.mrb[109].mxu1 }
 0x369   : > { %v8009_v41 = vpop.f32.mrb[110].mxu1 }
 0x36a   : > { %v10307_v36 = vpop.f32.mrb[111].mxu1 }
 0x36f   : > { %v8012_v33 = vpop.f32.mrb[112].mxu1 }
 0x370   : > { %v10315_v22 = vpop.f32.mrb[113].mxu1 }
 0x371   : > { %v10317_v8 = vpop.f32.mrb[114].mxu1 }
 0x372   : > { %v10319_v24 = vpop.f32.mrb[115].mxu1 }
 0x377   : > { %v10321_v53 = vpop.f32.mrb[116].mxu1 }
 0x378   : > { %v10323_v57 = vpop.f32.mrb[117].mxu1 }
 0x379   : > { %v10325_v39 = vpop.f32.mrb[118].mxu1 }
 0x37a   : > { %v5328_v40 = vpop.f32.mrb[119].mxu1 }
 0x37b   : > { %v8653_v40 = vld [vmem:[%s10796_s9 + $0x30] sm:$0xff]  }
 0x37c   : > { %8094 = vmatprep.subr.bf16.mxu1 %v8653_v40 }
 0x37d   : > { %8095 = vmatpush3.bf16.msra.mxu1 %v8653_v40  ;;  %v10371_v40 = vld [vmem:[%s10795_s8] ss:$0 sm:$0xff] }
 0x37f   : > { %v10327_v50 = vpop.f32.mrb[120].mxu1 }
 0x380   : > { %v5340_v15 = vpop.f32.mrb[121].mxu1 }
 0x381   : > { %v8021_v42 = vpop.f32.mrb[122].mxu1 }
 0x382   : > { %v10332_v23 = vpop.f32.mrb[123].mxu1 }
 0x387   : > { %v8024_v19 = vpop.f32.mrb[124].mxu1 }
 0x388   : > { %v10340_v54 = vpop.f32.mrb[125].mxu1  ;;  %v8654_v19 = vld [vmem:[%s10796_s9 + $0x38] sm:$0xff]  }
 0x389   : > { %10935 = vst [vmem:[#allocation14_spill] sm:$0xff] %v10340_v54  ;;  %v10342_v61 = vpop.f32.mrb[126].mxu1  ;;  %8096 = vmatprep.subr.bf16.mxu1 %v8654_v19 }
 0x38a   : > { %10936 = vst [vmem:[#allocation9_spill] sm:$0xff] %v10342_v61  ;;  %v10344_v1 = vpop.f32.mrb[127].mxu1  ;;  %8097 = vmatpush3.bf16.msra.mxu1 %v8654_v19 }
 0x38b   : > { %10937 = vst [vmem:[#allocation15_spill] sm:$0xff] %v10344_v1 }
 0x38f   : > { %v10346_v41 = vpop.f32.mrb[128].mxu1 }
 0x390   : > { %10938 = vst [vmem:[#allocation16_spill] sm:$0xff] %v10346_v41  ;;  %v10348_v32 = vpop.f32.mrb[129].mxu1 }
 0x391   : > { %10939 = vst [vmem:[#allocation2_spill] sm:$0xff] %v10348_v32  ;;  %v10350_v33 = vpop.f32.mrb[130].mxu1 }
 0x392   : > { %10940 = vst [vmem:[#allocation3_spill] sm:$0xff] %v10350_v33  ;;  %v5372_v34 = vpop.f32.mrb[131].mxu1 }
 0x393   : > { %v10365_v34 = vld [vmem:[%s10794_s7] ss:$0 sm:$0xff] }
 0x397   : > { %v10355_v16 = vpop.f32.mrb[132].mxu1 }
 0x398   : > { %10941 = vst [vmem:[#allocation17_spill] sm:$0xff] %v10355_v16  ;;  %v5384_v15 = vpop.f32.mrb[133].mxu1 }
 0x399   : > { %v8033_v42 = vpop.f32.mrb[134].mxu1 }
 0x39a   : > { %v10357_v48 = vpop.f32.mrb[135].mxu1 }
 0x39b   : > { %10942 = vst [vmem:[#allocation18_spill] sm:$0xff] %v10357_v48 }
 0x39f   : > { %v8052_v47 = vpop.f32.mrb[136].mxu1 }
 0x3a0   : > { %v5901_v62 = vmul.f32 %v8052_v47, %v10365_v34  ;;  %v5765_v44 = vpop.f32.mrb[137].mxu1 }
 0x3a1   : > { %v5899_v15 = vmul.f32 %v10365_v34, %v5765_v44  ;;  %v8053_v42 = vpop.f32.mrb[138].mxu1 }
 0x3a2   : > { %v10375_v46 = vadd.f32 %v10371_v40, %v5901_v62  ;;  %v5902_v31 = vmul.f32 %v8053_v42, %v10365_v34  ;;  %v5768_v52 = vpop.f32.mrb[139].mxu1 }
 0x3a3   : > { %v10379_v58 = vadd.f32 %v10371_v40, %v5899_v15  ;;  %v5900_v47 = vmul.f32 %v10365_v34, %v5768_v52 }
 0x3a4   : > { %10943 = vst [vmem:[#allocation19_spill] sm:$0xff] %v10375_v46  ;;  %v10383_v19 = vadd.f32 %v10371_v40, %v5902_v31 }
 0x3a5   : > { %10944 = vst [vmem:[#allocation20_spill] sm:$0xff] %v10379_v58  ;;  %v10386_v48 = vadd.f32 %v10371_v40, %v5900_v47 }
 0x3a6   : > { %10945 = vst [vmem:[#allocation24_spill] sm:$0xff] %v10383_v19 }
 0x3a7   : > { %10946 = vst [vmem:[#allocation25_spill] sm:$0xff] %v10386_v48  ;;  %v8056_v30 = vpop.f32.mrb[140].mxu1 }
 0x3a8   : > { %v5781_v44 = vpop.f32.mrb[141].mxu1 }
 0x3a9   : > { %v5903_v16 = vmul.f32 %v10365_v34, %v5781_v44  ;;  %v8057_v62 = vpop.f32.mrb[142].mxu1 }
 0x3aa   : > { %v5784_v46 = vpop.f32.mrb[143].mxu1  ;;  %v5906_v47 = vmul.f32 %v8057_v62, %v10365_v34 }
 0x3ab   : > { %v10390_v42 = vadd.f32 %v10371_v40, %v5903_v16  ;;  %v5904_v15 = vmul.f32 %v10365_v34, %v5784_v46  ;;  %v10401_v16 = vld [vmem:[%s10791_s4] ss:$0 sm:$0xff] }
 0x3ac   : > { %v5945_v62 = vadd.f32 %v10371_v40, %v5906_v47 }
 0x3ad   : > { %10947 = vst [vmem:[#allocation26_spill] sm:$0xff] %v10390_v42  ;;  %v10394_v58 = vadd.f32 %v10371_v40, %v5904_v15 }
 0x3ae   : > { %v5977_v47 = vmax.f32 %v5945_v62, 0.0 }
 0x3af   : > { %10948 = vst [vmem:[#allocation27_spill] sm:$0xff] %v10394_v58  ;;  %v8060_v52 = vpop.f32.mrb[144].mxu1  ;;  %v5905_v58 = vmul.f32 %v8056_v30, %v10365_v34 }
 0x3b0   : > { %v5797_v31 = vpop.f32.mrb[145].mxu1  ;;  %v5909_v2 = vmul.f32 %v8060_v52, %v10365_v34 }
 0x3b1   : > { %v8061_v19 = vpop.f32.mrb[146].mxu1 }
 0x3b2   : > { %v5800_v63 = vpop.f32.mrb[147].mxu1 }
 0x3b3   : > { %v5908_v61 = vmul.f32 %v10365_v34, %v5800_v63 }
 0x3b5   : > { %v7932_v48 = vpop.f32.mrb[56].mxu0 }
 0x3b6   : > { %v8152_v33 = vadd.f32 %v7932_v48, %v10214_v12  ;;  %v4937_v44 = vpop.f32.mrb[57].mxu0  ;;  %v10411_v12 = vld [vmem:[%s10792_s5] ss:$0 sm:$0xff] }
 0x3b7   : > { %v7933_v42 = vpop.f32.mrb[58].mxu0  ;;  %v10403_v46 = vpop.f32.mrb[148].mxu1 }
 0x3b8   : > { %v8153_v15 = vadd.f32 %v8152_v33, %v10286_v7  ;;  %v4939_v32 = vpop.f32.mrb[59].mxu0  ;;  %v5813_v51 = vpop.f32.mrb[149].mxu1  ;;  %v5944_v33 = vadd.f32 %v10371_v40, %v5905_v58 }
 0x3b9   : > { %v8154_v48 = vadd.f32 %v4939_v32, %v10217_v60  ;;  %v10414_v44 = vpop.f32.mrb[150].mxu1  ;;  %v5907_v60 = vmul.f32 %v10365_v34, %v5797_v31 }
 0x3ba   : > { %v5443_v42 = vmul.f32 %v8153_v15, %v10401_v16  ;;  %v5816_v41 = vpop.f32.mrb[151].mxu1  ;;  %v5976_v52 = vmax.f32 %v5944_v33, 0.0 }
 0x3bb   : > { %v8155_v7 = vadd.f32 %v8154_v48, %v10288_v10  ;;  %v5946_v63 = vadd.f32 %v10371_v40, %v5907_v60 }
 0x3bc   : > { %v10419_v30 = vadd.f32 %v10411_v12, %v5443_v42 }
 0x3bd   : > { %v5442_v56 = vmul.f32 %v8155_v7, %v10401_v16  ;;  %v7936_v1 = vpop.f32.mrb[60].mxu0  ;;  %v5948_v7 = vadd.f32 %v10371_v40, %v5909_v2 }
 0x3be   : > { %v10830_v32 = vmax.f32 %v10419_v30, 0.0  ;;  %v4951_v15 = vpop.f32.mrb[61].mxu0 }
 0x3bf   : > { %v8156_v10 = vadd.f32 %v4951_v15, %v10221_v43  ;;  %v7937_v48 = vpop.f32.mrb[62].mxu0  ;;  %v10429_v42 = vpop.f32.mrb[152].mxu1  ;;  %v10432_v58 = vadd.f32 %v10411_v12, %v5442_v56  ;;  %v5947_v15 = vadd.f32 %v10371_v40, %v5908_v61  ;;  %v5980_v60 = vmax.f32 %v5948_v7, 0.0 }
 0x3c0   : > { %v6009_v1 = vadd.f32 %v5977_v47, %v10830_v32  ;;  %v8158_v31 = vadd.f32 %v7937_v48, %v10223_v55  ;;  %v4954_v62 = vpop.f32.mrb[63].mxu0  ;;  %v10438_v20 = vpop.f32.mrb[153].mxu1 }
 0x3c1   : > { %v8157_v43 = vadd.f32 %v8156_v10, %v10290_v27  ;;  %v8160_v56 = vadd.f32 %v4954_v62, %v10225_v13  ;;  %v10448_v33 = vpop.f32.mrb[154].mxu1  ;;  %v10831_v55 = vmax.f32 %v10432_v58, 0.0  ;;  %v5911_v27 = vmul.f32 %v10365_v34, %v5813_v51 }
 0x3c2   : > { %v6041_v47 = vmax.f32 %v6009_v1, 0.0  ;;  %v8159_v2 = vadd.f32 %v8158_v31, %v10292_v5  ;;  %v10453_v48 = vpop.f32.mrb[155].mxu1  ;;  %v5910_v10 = vmul.f32 %v8061_v19, %v10365_v34  ;;  %v5978_v31 = vmax.f32 %v5946_v63, 0.0 }
 0x3c3   : > { %v5444_v32 = vmul.f32 %v8157_v43, %v10401_v16  ;;  %v8161_v54 = vadd.f32 %v8160_v56, %v10294_v25  ;;  %v6008_v1 = vadd.f32 %v5976_v52, %v10831_v55  ;;  %v5912_v43 = vmul.f32 %v10365_v34, %v5816_v41 }
 0x3c4   : > { %6073 = vst [vmem:[%s10443_s23 + $0x38] sm:$0xff] %v6041_v47  ;;  %v5446_v13 = vmul.f32 %v8159_v2, %v10401_v16  ;;  %v5979_v51 = vmax.f32 %v5947_v15, 0.0 }
 0x3c5   : > { %v5483_v5 = vadd.f32 %v10411_v12, %v5444_v32  ;;  %v5445_v61 = vmul.f32 %v8161_v54, %v10401_v16  ;;  %v7940_v62 = vpop.f32.mrb[64].mxu0  ;;  %v6040_v19 = vmax.f32 %v6008_v1, 0.0  ;;  %v5950_v54 = vadd.f32 %v10371_v40, %v5911_v27 }
 0x3c6   : > { %v10467_v25 = vadd.f32 %v10411_v12, %v5446_v13  ;;  %v8162_v7 = vadd.f32 %v7940_v62, %v10229_v29  ;;  %v4966_v56 = vpop.f32.mrb[65].mxu0  ;;  %v5913_v29 = vmul.f32 %v10403_v46, %v10365_v34  ;;  %v5951_v27 = vadd.f32 %v10371_v40, %v5912_v43 }
 0x3c7   : > { %v5484_v47 = vadd.f32 %v10411_v12, %v5445_v61  ;;  %v5515_v52 = vmax.f32 %v5483_v5, 0.0  ;;  %v8164_v32 = vadd.f32 %v4966_v56, %v10231_v59  ;;  %v7941_v2 = vpop.f32.mrb[66].mxu0  ;;  %v10473_v63 = vpop.f32.mrb[156].mxu1  ;;  %6072 = vst [vmem:[%s10443_s23 + $0x30] sm:$0xff] %v6040_v19  ;;  %v5982_v56 = vmax.f32 %v5950_v54, 0.0 }
 0x3c8   : > { %v5517_v41 = vmax.f32 %v10467_v25, 0.0  ;;  %v8163_v13 = vadd.f32 %v8162_v7, %v10296_v37  ;;  %v8166_v15 = vadd.f32 %v7941_v2, %v10233_v45  ;;  %v4969_v55 = vpop.f32.mrb[67].mxu0  ;;  %v5845_v1 = vpop.f32.mrb[157].mxu1  ;;  %v10488_v45 = vadd.f32 %v10371_v40, %v5910_v10 }
 0x3c9   : > { %v6010_v5 = vadd.f32 %v5978_v31, %v5515_v52  ;;  %v5516_v61 = vmax.f32 %v5484_v47, 0.0  ;;  %v8165_v59 = vadd.f32 %v8164_v32, %v10298_v21  ;;  %v10483_v62 = vpop.f32.mrb[158].mxu1  ;;  %v5914_v43 = vmul.f32 %v10414_v44, %v10365_v34 }
 0x3ca   : > { %v6012_v37 = vadd.f32 %v5980_v60, %v5517_v41  ;;  %v5448_v55 = vmul.f32 %v8163_v13, %v10401_v16  ;;  %v8167_v46 = vadd.f32 %v8166_v15, %v10300_v0  ;;  %v10492_v31 = vpop.f32.mrb[159].mxu1  ;;  %v10501_v0 = vadd.f32 %v10371_v40, %v5913_v29 }
 0x3cb   : > { %v6042_v7 = vmax.f32 %v6010_v5, 0.0  ;;  %v6011_v21 = vadd.f32 %v5979_v51, %v5516_v61  ;;  %v5447_v60 = vmul.f32 %v8165_v59, %v10401_v16  ;;  %v5983_v2 = vmax.f32 %v5951_v27, 0.0 }
 0x3cc   : > { %v6044_v19 = vmax.f32 %v6012_v37, 0.0  ;;  %v5487_v47 = vadd.f32 %v10411_v12, %v5448_v55  ;;  %v5449_v10 = vmul.f32 %v8167_v46, %v10401_v16  ;;  %v5917_v51 = vmul.f32 %v10429_v42, %v10365_v34 }
 0x3cd   : > { %6074 = vst [vmem:[%s10443_s23 + $0x40] sm:$0xff] %v6042_v7  ;;  %v6043_v32 = vmax.f32 %v6011_v21, 0.0  ;;  %v7944_v13 = vpop.f32.mrb[68].mxu0  ;;  %v10949_v59 = vmax.f32 %v10432_v58, 0.0  ;;  %v10950_v37 = vmax.f32 %v10419_v30, 0.0  ;;  %v5981_v29 = vmax.f32 %v10488_v45, 0.0 }
 0x3ce   : > { %6076 = vst [vmem:[%s10443_s23 + $0x50] sm:$0xff] %v6044_v19  ;;  %v5488_v44 = vadd.f32 %v10411_v12, %v5449_v10  ;;  %v5519_v54 = vmax.f32 %v5487_v47, 0.0  ;;  %v8168_v15 = vadd.f32 %v7944_v13, %v10237_v17  ;;  %v4981_v5 = vpop.f32.mrb[69].mxu0  ;;  %v10517_v27 = vadd.f32 %v10371_v40, %v5914_v43 }
 0x3cf   : > { %v10512_v55 = vpack.c.bf16 %v10950_v37, %v10949_v59  ;;  %6075 = vst [vmem:[%s10443_s23 + $0x48] sm:$0xff] %v6043_v32  ;;  %v7945_v42 = vpop.f32.mrb[70].mxu0  ;;  %v10519_v46 = vpop.f32.mrb[160].mxu1  ;;  %v10521_v7 = vpack.c.bf16 %v5516_v61, %v5515_v52  ;;  %v5486_v30 = vadd.f32 %v10411_v12, %v5447_v60  ;;  %v5984_v45 = vmax.f32 %v10501_v0, 0.0 }
 0x3d0   : > { %v6014_v21 = vadd.f32 %v5982_v56, %v5519_v54  ;;  %v5520_v17 = vmax.f32 %v5488_v44, 0.0  ;;  %v8169_v19 = vadd.f32 %v8168_v15, %v10302_v26  ;;  %v4983_v58 = vpop.f32.mrb[71].mxu0  ;;  %v10524_v47 = vpop.f32.mrb[161].mxu1  ;;  %v10530_v10 = vadd.f32 %v10371_v40, %v5917_v51 }
 0x3d1   : > { %v8170_v43 = vadd.f32 %v4983_v58, %v10239_v28  ;;  %v5915_v52 = vmul.f32 %v10365_v34, %v10438_v20  ;;  %v8077_v61 = vpop.f32.mrb[162].mxu1  ;;  %v5918_v13 = vmul.f32 %v10448_v33, %v10365_v34  ;;  %v5916_v28 = vmul.f32 %v10365_v34, %v10453_v48 }
 0x3d2   : > { %v6046_v56 = vmax.f32 %v6014_v21, 0.0  ;;  %v6015_v32 = vadd.f32 %v5983_v2, %v5520_v17  ;;  %v5451_v26 = vmul.f32 %v8169_v19, %v10401_v16  ;;  %v10537_v60 = vpop.f32.mrb[163].mxu1  ;;  %v5919_v51 = vmul.f32 %v10365_v34, %v5845_v1 }
 0x3d3   : > { %v8171_v0 = vadd.f32 %v8170_v43, %v10307_v36  ;;  %v5926_v20 = vmul.f32 %v8077_v61, %v10365_v34  ;;  %v5985_v2 = vmax.f32 %v10517_v27, 0.0  ;;  %v5518_v15 = vmax.f32 %v5486_v30, 0.0 }
 0x3d4   : > { %6078 = vst [vmem:[%s10443_s23 + $0x60] sm:$0xff] %v6046_v56  ;;  %v6047_v44 = vmax.f32 %v6015_v32, 0.0  ;;  %v10546_v5 = vpack.c.bf16 %v5520_v17, %v5519_v54  ;;  %v5988_v37 = vmax.f32 %v10530_v10, 0.0  ;;  %v5954_v36 = vadd.f32 %v10371_v40, %v5915_v52 }
 0x3d5   : > { %v5450_v33 = vmul.f32 %v8171_v0, %v10401_v16  ;;  %v7948_v59 = vpop.f32.mrb[72].mxu0  ;;  %v10552_v48 = vadd.f32 %v10371_v40, %v5926_v20  ;;  %v10556_v42 = vadd.f32 %v10371_v40, %v5918_v13  ;;  %v6013_v27 = vadd.f32 %v5981_v29, %v5518_v15 }
 0x3d6   : > { %6079 = vst [vmem:[%s10443_s23 + $0x68] sm:$0xff] %v6047_v44  ;;  %v4995_v1 = vpop.f32.mrb[73].mxu0  ;;  %v10560_v54 = vpack.c.bf16 %v5518_v15, %v5517_v41  ;;  %v5490_v21 = vadd.f32 %v10411_v12, %v5451_v26  ;;  %v5955_v58 = vadd.f32 %v10371_v40, %v5916_v28  ;;  %v10566_v30 = vadd.f32 %v10371_v40, %v5919_v51 }
 0x3d7   : > { %v8172_v17 = vadd.f32 %v4995_v1, %v10243_v14  ;;  %v7949_v19 = vpop.f32.mrb[74].mxu0  ;;  %v8080_v43 = vpop.f32.mrb[164].mxu1  ;;  %v5489_v52 = vadd.f32 %v10411_v12, %v5450_v33  ;;  %v6045_v56 = vmax.f32 %v6013_v27, 0.0 }
 0x3d8   : > { %v8174_v29 = vadd.f32 %v7949_v19, %v10245_v4  ;;  %v4998_v61 = vpop.f32.mrb[75].mxu0  ;;  %v5929_v25 = vmul.f32 %v8080_v43, %v10365_v34  ;;  %v5877_v41 = vpop.f32.mrb[165].mxu1  ;;  %v5522_v32 = vmax.f32 %v5490_v21, 0.0  ;;  %v5987_v19 = vmax.f32 %v5955_v58, 0.0 }
 0x3d9   : > { %v8173_v14 = vadd.f32 %v8172_v17, %v10315_v22  ;;  %v8176_v26 = vadd.f32 %v4998_v61, %v10247_v9  ;;  %v5927_v13 = vmul.f32 %v10365_v34, %v5877_v41  ;;  %v8081_v0 = vpop.f32.mrb[166].mxu1  ;;  %v5521_v28 = vmax.f32 %v5489_v52, 0.0  ;;  %6077 = vst [vmem:[%s10443_s23 + $0x58] sm:$0xff] %v6045_v56 }
 0x3da   : > { %v8175_v51 = vadd.f32 %v8174_v29, %v10317_v8  ;;  %v10576_v20 = vadd.f32 %v10371_v40, %v5929_v25  ;;  %v5930_v4 = vmul.f32 %v8081_v0, %v10365_v34  ;;  %v5880_v44 = vpop.f32.mrb[167].mxu1  ;;  %v6017_v15 = vadd.f32 %v5985_v2, %v5522_v32 }
 0x3db   : > { %v5452_v33 = vmul.f32 %v8173_v14, %v10401_v16  ;;  %v8177_v22 = vadd.f32 %v8176_v26, %v10319_v24  ;;  %v10583_v9 = vadd.f32 %v10371_v40, %v5927_v13  ;;  %v5928_v59 = vmul.f32 %v10365_v34, %v5880_v44 }
 0x3dc   : > { %v5454_v1 = vmul.f32 %v8175_v51, %v10401_v16  ;;  %v5986_v8 = vmax.f32 %v5954_v36, 0.0  ;;  %v10588_v27 = vadd.f32 %v10371_v40, %v5930_v4  ;;  %v6016_v21 = vadd.f32 %v5984_v45, %v5521_v28 }
 0x3dd   : > { %v5491_v17 = vadd.f32 %v10411_v12, %v5452_v33  ;;  %v5453_v2 = vmul.f32 %v8177_v22, %v10401_v16  ;;  %v7952_v43 = vpop.f32.mrb[76].mxu0  ;;  %v10593_v24 = vadd.f32 %v10371_v40, %v5928_v59  ;;  %v5920_v36 = vmul.f32 %v10365_v34, %v10492_v31 }
 0x3de   : > { %v5493_v52 = vadd.f32 %v10411_v12, %v5454_v1  ;;  %v8178_v29 = vadd.f32 %v7952_v43, %v10255_v11  ;;  %v5010_v61 = vpop.f32.mrb[77].mxu0  ;;  %v6048_v25 = vmax.f32 %v6016_v21, 0.0  ;;  %v5990_v14 = vmax.f32 %v10566_v30, 0.0 }
 0x3df   : > { %v5492_v45 = vadd.f32 %v10411_v12, %v5453_v2  ;;  %v5523_v41 = vmax.f32 %v5491_v17, 0.0  ;;  %v8180_v56 = vadd.f32 %v5010_v61, %v10257_v38  ;;  %v7953_v58 = vpop.f32.mrb[78].mxu0  ;;  %v6049_v51 = vmax.f32 %v6017_v15, 0.0 }
 0x3e0   : > { %v5525_v26 = vmax.f32 %v5493_v52, 0.0  ;;  %v8179_v13 = vadd.f32 %v8178_v29, %v10321_v53  ;;  %v8182_v0 = vadd.f32 %v7953_v58, %v10259_v35  ;;  %v5013_v11 = vpop.f32.mrb[79].mxu0  ;;  %6080 = vst [vmem:[%s10443_s23 + $0x70] sm:$0xff] %v6048_v25  ;;  %v10606_v33 = vpack.c.bf16 %v5522_v32, %v5521_v28 }
 0x3e1   : > { %v6018_v4 = vadd.f32 %v5986_v8, %v5523_v41  ;;  %v5524_v31 = vmax.f32 %v5492_v45, 0.0  ;;  %v8181_v44 = vadd.f32 %v8180_v56, %v10323_v57  ;;  %v5959_v35 = vadd.f32 %v10371_v40, %v5920_v36  ;;  %6081 = vst [vmem:[%s10443_s23 + $0x78] sm:$0xff] %v6049_v51 }
 0x3e2   : > { %v6020_v38 = vadd.f32 %v5988_v37, %v5525_v26  ;;  %v5456_v30 = vmul.f32 %v8179_v13, %v10401_v16  ;;  %v8183_v22 = vadd.f32 %v8182_v0, %v10325_v39  ;;  %v5922_v37 = vmul.f32 %v10483_v62, %v10365_v34 }
 0x3e3   : > { %v6050_v53 = vmax.f32 %v6018_v4, 0.0  ;;  %v6019_v15 = vadd.f32 %v5987_v19, %v5524_v31  ;;  %v5455_v59 = vmul.f32 %v8181_v44, %v10401_v16  ;;  %v10615_v1 = vpack.c.bf16 %v5524_v31, %v5523_v41 }
 0x3e4   : > { %v6052_v57 = vmax.f32 %v6020_v38, 0.0  ;;  %v5495_v32 = vadd.f32 %v10411_v12, %v5456_v30  ;;  %v5457_v10 = vmul.f32 %v8183_v22, %v10401_v16  ;;  %v5989_v39 = vmax.f32 %v10556_v42, 0.0 }
 0x3e5   : > { %6082 = vst [vmem:[%s10443_s23 + $0x80] sm:$0xff] %v6050_v53  ;;  %v6051_v28 = vmax.f32 %v6019_v15, 0.0  ;;  %v7956_v8 = vpop.f32.mrb[80].mxu0  ;;  %v5494_v21 = vadd.f32 %v10411_v12, %v5455_v59  ;;  %v5991_v19 = vmax.f32 %v5959_v35, 0.0  ;;  %v5921_v29 = vmul.f32 %v10473_v63, %v10365_v34 }
 0x3e6   : > { %6084 = vst [vmem:[%s10443_s23 + $0x90] sm:$0xff] %v6052_v57  ;;  %v5496_v17 = vadd.f32 %v10411_v12, %v5457_v10  ;;  %v5527_v2 = vmax.f32 %v5495_v32, 0.0  ;;  %v8184_v43 = vadd.f32 %v7956_v8, %v10263_v49  ;;  %v5025_v52 = vpop.f32.mrb[81].mxu0  ;;  %v5961_v36 = vadd.f32 %v10371_v40, %v5922_v37  ;;  %v10951_v37 = vld [vmem:[#allocation14_spill] sm:$0xff] }
 0x3e7   : > { %6083 = vst [vmem:[%s10443_s23 + $0x88] sm:$0xff] %v6051_v28  ;;  %v7957_v62 = vpop.f32.mrb[82].mxu0  ;;  %v5526_v61 = vmax.f32 %v5494_v21, 0.0  ;;  %v5923_v38 = vmul.f32 %v10365_v34, %v10524_v47  ;;  %v5925_v22 = vmul.f32 %v10519_v46, %v10365_v34  ;;  %v10952_v28 = vld [vmem:[#allocation6_spill] sm:$0xff] }
 0x3e8   : > { %v6022_v42 = vadd.f32 %v5990_v14, %v5527_v2  ;;  %v5528_v25 = vmax.f32 %v5496_v17, 0.0  ;;  %v8185_v45 = vadd.f32 %v8184_v43, %v10327_v50  ;;  %v5027_v41 = vpop.f32.mrb[83].mxu0  ;;  %v5960_v14 = vadd.f32 %v10371_v40, %v5921_v29 }
 0x3e9   : > { %v8186_v56 = vadd.f32 %v5027_v41, %v10265_v3  ;;  %v6021_v58 = vadd.f32 %v5989_v39, %v5526_v61  ;;  %v10633_v49 = vpack.c.bf16 %v5526_v61, %v5525_v26  ;;  %v5993_v50 = vmax.f32 %v5961_v36, 0.0 }
 0x3ea   : > { %v6054_v13 = vmax.f32 %v6022_v42, 0.0  ;;  %v6023_v0 = vadd.f32 %v5991_v19, %v5528_v25  ;;  %v5459_v63 = vmul.f32 %v8185_v45, %v10401_v16  ;;  %v10636_v11 = vpack.c.bf16 %v5528_v25, %v5527_v2 }
 0x3eb   : > { %v8187_v51 = vadd.f32 %v8186_v56, %v10332_v23  ;;  %v6053_v4 = vmax.f32 %v6021_v58, 0.0  ;;  %v5924_v23 = vmul.f32 %v10365_v34, %v10537_v60  ;;  %v5992_v53 = vmax.f32 %v5960_v14, 0.0  ;;  %v10953_v34 = vld [vmem:[#allocation9_spill] sm:$0xff]  ;;  %v10955_v56 = vld [vmem:[#allocation7_spill] sm:$0xff] }
 0x3ec   : > { %6086 = vst [vmem:[%s10443_s23 + $0xa0] sm:$0xff] %v6054_v13  ;;  %v6055_v31 = vmax.f32 %v6023_v0, 0.0  ;;  %v5498_v3 = vadd.f32 %v10411_v12, %v5459_v63  ;;  %v5962_v46 = vadd.f32 %v10371_v40, %v5923_v38  ;;  %v5964_v17 = vadd.f32 %v10371_v40, %v5925_v22 }
 0x3ed   : > { %v5458_v26 = vmul.f32 %v8187_v51, %v10401_v16  ;;  %v7960_v44 = vpop.f32.mrb[84].mxu0  ;;  %6085 = vst [vmem:[%s10443_s23 + $0x98] sm:$0xff] %v6053_v4  ;;  %v10956_v51 = vld [vmem:[#allocation10_spill] sm:$0xff] }
 0x3ee   : > { %6087 = vst [vmem:[%s10443_s23 + $0xa8] sm:$0xff] %v6055_v31  ;;  %v5039_v30 = vpop.f32.mrb[85].mxu0  ;;  %v5530_v35 = vmax.f32 %v5498_v3, 0.0  ;;  %v5994_v36 = vmax.f32 %v5962_v46, 0.0  ;;  %v5996_v41 = vmax.f32 %v5964_v17, 0.0  ;;  %v10957_v3 = vld [vmem:[#allocation16_spill] sm:$0xff] }
 0x3ef   : > { %v8188_v15 = vadd.f32 %v5039_v30, %v10269_v6  ;;  %v7961_v59 = vpop.f32.mrb[86].mxu0  ;;  %v5497_v57 = vadd.f32 %v10411_v12, %v5458_v26  ;;  %v5963_v6 = vadd.f32 %v10371_v40, %v5924_v23  ;;  %v10958_v44 = vld [vmem:[#allocation11_spill] sm:$0xff] }
 0x3f0   : > { %v8190_v32 = vadd.f32 %v7961_v59, %v10271_v18  ;;  %v5042_v47 = vpop.f32.mrb[87].mxu0  ;;  %v6025_v10 = vadd.f32 %v5993_v50, %v5530_v35  ;;  %v10954_v18 = vld [vmem:[#allocation15_spill] sm:$0xff] }
 0x3f1   : > { %v8189_v39 = vadd.f32 %v8188_v15, %v10951_v37  ;;  %v8192_v8 = vadd.f32 %v5042_v47, %v10952_v28  ;;  %v5529_v21 = vmax.f32 %v5497_v57, 0.0  ;;  %v5995_v14 = vmax.f32 %v5963_v6, 0.0  ;;  %v10960_v57 = vld [vmem:[#allocation3_spill] sm:$0xff] }
 0x3f2   : > { %v8191_v60 = vadd.f32 %v8190_v32, %v10953_v34  ;;  %v6057_v2 = vmax.f32 %v6025_v10, 0.0  ;;  %v5997_v34 = vmax.f32 %v10552_v48, 0.0  ;;  %v10962_v48 = vld [vmem:[#allocation17_spill] sm:$0xff] }
 0x3f3   : > { %v5460_v19 = vmul.f32 %v8189_v39, %v10401_v16  ;;  %v8193_v43 = vadd.f32 %v8192_v8, %v10954_v18  ;;  %v6024_v52 = vadd.f32 %v5992_v53, %v5529_v21  ;;  %v10662_v29 = vpack.c.bf16 %v5530_v35, %v5529_v21  ;;  %v10959_v35 = vld [vmem:[#allocation2_spill] sm:$0xff] }
 0x3f4   : > { %v5462_v62 = vmul.f32 %v8191_v60, %v10401_v16  ;;  %6089 = vst [vmem:[%s10443_s23 + $0xb8] sm:$0xff] %v6057_v2  ;;  %v5998_v21 = vmax.f32 %v10583_v9, 0.0  ;;  %v5999_v18 = vmax.f32 %v10593_v24, 0.0 }
 0x3f5   : > { %v5499_v61 = vadd.f32 %v10411_v12, %v5460_v19  ;;  %v5461_v42 = vmul.f32 %v8193_v43, %v10401_v16  ;;  %v7964_v25 = vpop.f32.mrb[88].mxu0  ;;  %v6056_v45 = vmax.f32 %v6024_v52, 0.0  ;;  %v10961_v43 = vld [vmem:[#allocation12_spill] sm:$0xff] }
 0x3f6   : > { %v5501_v40 = vadd.f32 %v10411_v12, %v5462_v62  ;;  %v8194_v58 = vadd.f32 %v7964_v25, %v10955_v56  ;;  %v5054_v13 = vpop.f32.mrb[89].mxu0 }
 0x3f7   : > { %v5500_v0 = vadd.f32 %v10411_v12, %v5461_v42  ;;  %v5531_v63 = vmax.f32 %v5499_v61, 0.0  ;;  %v8196_v4 = vadd.f32 %v5054_v13, %v10956_v51  ;;  %v7965_v50 = vpop.f32.mrb[90].mxu0  ;;  %6088 = vst [vmem:[%s10443_s23 + $0xb0] sm:$0xff] %v6056_v45 }
 0x3f8   : > { %v5533_v31 = vmax.f32 %v5501_v40, 0.0  ;;  %v8195_v26 = vadd.f32 %v8194_v58, %v10957_v3  ;;  %v8198_v38 = vadd.f32 %v7965_v50, %v10958_v44  ;;  %v5057_v30 = vpop.f32.mrb[91].mxu0  ;;  %v10963_v40 = vld [vmem:[#allocation13_spill] sm:$0xff]  ;;  %v6001_v50 = vmax.f32 %v10588_v27, 0.0 }
 0x3f9   : > { %v6026_v22 = vadd.f32 %v5994_v36, %v5531_v63  ;;  %v5532_v23 = vmax.f32 %v5500_v0, 0.0  ;;  %v8197_v53 = vadd.f32 %v8196_v4, %v10959_v35 }
 0x3fa   : > { %v6028_v15 = vadd.f32 %v5996_v41, %v5533_v31  ;;  %v5464_v59 = vmul.f32 %v8195_v26, %v10401_v16  ;;  %v8199_v32 = vadd.f32 %v8198_v38, %v10960_v57 }
 0x3fb   : > { %v6058_v47 = vmax.f32 %v6026_v22, 0.0  ;;  %v6027_v10 = vadd.f32 %v5995_v14, %v5532_v23  ;;  %v5463_v37 = vmul.f32 %v8197_v53, %v10401_v16  ;;  %v10679_v39 = vpack.c.bf16 %v5532_v23, %v5531_v63  ;;  %v10964_v14 = vld [vmem:[#allocation18_spill] sm:$0xff]  ;;  %v10965_v23 = vld [vmem:[#allocation8_spill] sm:$0xff] }
 0x3fc   : > { %v6060_v28 = vmax.f32 %v6028_v15, 0.0  ;;  %v5503_v8 = vadd.f32 %v10411_v12, %v5464_v59  ;;  %v5465_v46 = vmul.f32 %v8199_v32, %v10401_v16  ;;  %v6000_v22 = vmax.f32 %v10576_v20, 0.0  ;;  %v10966_v59 = vld [vmem:[#allocation21_spill] sm:$0xff] }
 0x3fd   : > { %6090 = vst [vmem:[%s10443_s23 + $0xc0] sm:$0xff] %v6058_v47  ;;  %v6059_v60 = vmax.f32 %v6027_v10, 0.0  ;;  %v7968_v17 = vpop.f32.mrb[92].mxu0  ;;  %v5502_v6 = vadd.f32 %v10411_v12, %v5463_v37  ;;  %v10967_v10 = vld [vmem:[#allocation22_spill] sm:$0xff] }
 0x3fe   : > { %6092 = vst [vmem:[%s10443_s23 + $0xd0] sm:$0xff] %v6060_v28  ;;  %v5504_v2 = vadd.f32 %v10411_v12, %v5465_v46  ;;  %v5535_v19 = vmax.f32 %v5503_v8, 0.0  ;;  %v8200_v52 = vadd.f32 %v7968_v17, %v10961_v43  ;;  %v5069_v62 = vpop.f32.mrb[93].mxu0  ;;  %v10968_v8 = vld [vmem:[#allocation20_spill] sm:$0xff]  ;;  %v10970_v43 = vld [vmem:[#allocation25_spill] sm:$0xff] }
 0x3ff   : > { %6091 = vst [vmem:[%s10443_s23 + $0xc8] sm:$0xff] %v6059_v60  ;;  %v7969_v61 = vpop.f32.mrb[94].mxu0  ;;  %v5534_v9 = vmax.f32 %v5502_v6, 0.0  ;;  %v5970_v46 = vmax.f32 %v10968_v8, 0.0 }
 0x400   : > { %v6030_v42 = vadd.f32 %v5998_v21, %v5535_v19  ;;  %v5536_v36 = vmax.f32 %v5504_v2, 0.0  ;;  %v8201_v25 = vadd.f32 %v8200_v52, %v10962_v48  ;;  %v5071_v45 = vpop.f32.mrb[95].mxu0  ;;  %v10969_v2 = vld [vmem:[#allocation19_spill] sm:$0xff]  ;;  %v5971_v52 = vmax.f32 %v10970_v43, 0.0  ;;  %v10971_v48 = vld [vmem:[#allocation4_spill] sm:$0xff] }
 0x401   : > { %v8202_v41 = vadd.f32 %v5071_v45, %v10963_v40  ;;  %v6029_v56 = vadd.f32 %v5997_v34, %v5534_v9  ;;  %v10694_v58 = vpack.c.bf16 %v5534_v9, %v5533_v31 }
 0x402   : > { %v6062_v24 = vmax.f32 %v6030_v42, 0.0  ;;  %v6031_v13 = vadd.f32 %v5999_v18, %v5536_v36  ;;  %v5467_v0 = vmul.f32 %v8201_v25, %v10401_v16  ;;  %v10697_v63 = vpack.c.bf16 %v5536_v36, %v5535_v19 }
 0x403   : > { %v8203_v51 = vadd.f32 %v8202_v41, %v10964_v14  ;;  %v6061_v4 = vmax.f32 %v6029_v56, 0.0  ;;  %v5972_v19 = vmax.f32 %v10969_v2, 0.0  ;;  %v10972_v56 = vld [vmem:[#allocation5_spill] sm:$0xff] }
 0x404   : > { %6094 = vst [vmem:[%s10443_s23 + $0xe0] sm:$0xff] %v6062_v24  ;;  %v6063_v3 = vmax.f32 %v6031_v13, 0.0  ;;  %v5506_v26 = vadd.f32 %v10411_v12, %v5467_v0 }
 0x405   : > { %v5466_v44 = vmul.f32 %v8203_v51, %v10401_v16  ;;  %v7988_v38 = vpop.f32.mrb[48].mxu0  ;;  %6093 = vst [vmem:[%s10443_s23 + $0xd8] sm:$0xff] %v6061_v4  ;;  %v10973_v51 = vld [vmem:[#allocation23_spill] sm:$0xff] }
 0x406   : > { %6095 = vst [vmem:[%s10443_s23 + $0xe8] sm:$0xff] %v6063_v3  ;;  %v5222_v31 = vpop.f32.mrb[49].mxu0  ;;  %v5538_v30 = vmax.f32 %v5506_v26, 0.0 }
 0x407   : > { %v8146_v35 = vadd.f32 %v5222_v31, %v10965_v23  ;;  %v7989_v53 = vpop.f32.mrb[50].mxu0  ;;  %v5505_v15 = vadd.f32 %v10411_v12, %v5466_v44  ;;  %v10974_v31 = vld [vmem:[#allocation26_spill] sm:$0xff] }
 0x408   : > { %v8147_v27 = vadd.f32 %v7989_v53, %v10966_v59  ;;  %v5225_v57 = vpop.f32.mrb[51].mxu0  ;;  %v6033_v32 = vadd.f32 %v6001_v50, %v5538_v30  ;;  %v10975_v53 = vld [vmem:[#allocation24_spill] sm:$0xff] }
 0x409   : > { %v5436_v47 = vmul.f32 %v8146_v35, %v10401_v16  ;;  %v8148_v37 = vadd.f32 %v5225_v57, %v10967_v10  ;;  %v5537_v28 = vmax.f32 %v5505_v15, 0.0  ;;  %v5973_v15 = vmax.f32 %v10975_v53, 0.0  ;;  %v10976_v57 = vld [vmem:[#allocation27_spill] sm:$0xff] }
 0x40a   : > { %v5438_v21 = vmul.f32 %v8147_v27, %v10401_v16  ;;  %v6065_v20 = vmax.f32 %v6033_v32, 0.0  ;;  %v5975_v32 = vmax.f32 %v10976_v57, 0.0 }
 0x40b   : > { %v5475_v34 = vadd.f32 %v10411_v12, %v5436_v47  ;;  %v5437_v60 = vmul.f32 %v8148_v37, %v10401_v16  ;;  %v6032_v17 = vadd.f32 %v6000_v22, %v5537_v28  ;;  %v10716_v6 = vpack.c.bf16 %v5538_v30, %v5537_v28 }
 0x40c   : > { %v5477_v18 = vadd.f32 %v10411_v12, %v5438_v21  ;;  %6097 = vst [vmem:[%s10443_s23 + $0xf8] sm:$0xff] %v6065_v20  ;;  %v5974_v30 = vmax.f32 %v10974_v31, 0.0 }
 0x40d   : > { %v5507_v62 = vmax.f32 %v5475_v34, 0.0  ;;  %v5476_v61 = vadd.f32 %v10411_v12, %v5437_v60  ;;  %v7992_v9 = vpop.f32.mrb[52].mxu0  ;;  %v6064_v42 = vmax.f32 %v6032_v17, 0.0 }
 0x40e   : > { %v5509_v36 = vmax.f32 %v5477_v18, 0.0  ;;  %v8149_v25 = vadd.f32 %v7992_v9, %v10971_v48  ;;  %v5237_v45 = vpop.f32.mrb[53].mxu0 }
 0x40f   : > { %v6002_v40 = vadd.f32 %v5970_v46, %v5507_v62  ;;  %v5508_v41 = vmax.f32 %v5476_v61, 0.0  ;;  %v8150_v24 = vadd.f32 %v5237_v45, %v10972_v56  ;;  %v7993_v13 = vpop.f32.mrb[54].mxu0  ;;  %6096 = vst [vmem:[%s10443_s23 + $0xf0] sm:$0xff] %v6064_v42 }
 0x410   : > { %v6004_v0 = vadd.f32 %v5972_v19, %v5509_v36  ;;  %v5440_v14 = vmul.f32 %v8149_v25, %v10401_v16  ;;  %v8151_v4 = vadd.f32 %v7993_v13, %v10973_v51  ;;  %v5240_v50 = vpop.f32.mrb[55].mxu0 }
 0x411   : > { %v6034_v3 = vmax.f32 %v6002_v40, 0.0  ;;  %v6003_v26 = vadd.f32 %v5971_v52, %v5508_v41  ;;  %v5439_v44 = vmul.f32 %v8150_v24, %v10401_v16  ;;  %v6098_v38 = vpack.c.bf16 %v5508_v41, %v5507_v62 }
 0x412   : > { %v6036_v22 = vmax.f32 %v6004_v0, 0.0  ;;  %v5479_v23 = vadd.f32 %v10411_v12, %v5440_v14  ;;  %v5441_v35 = vmul.f32 %v8151_v4, %v10401_v16 }
 0x413   : > { %6066 = vst [vmem:[%s10443_s23] sm:$0xff] %v6034_v3  ;;  %v6035_v59 = vmax.f32 %v6003_v26, 0.0  ;;  %v5478_v27 = vadd.f32 %v10411_v12, %v5439_v44  ;;  %8098 = vmatprep.mubr.bf16.mxu1 %v6098_v38 }
 0x414   : > { %6068 = vst [vmem:[%s10443_s23 + $0x10] sm:$0xff] %v6036_v22  ;;  %v5511_v47 = vmax.f32 %v5479_v23, 0.0  ;;  %v5480_v10 = vadd.f32 %v10411_v12, %v5441_v35 }
 0x415   : > { %6067 = vst [vmem:[%s10443_s23 + $0x8] sm:$0xff] %v6035_v59  ;;  %v5510_v37 = vmax.f32 %v5478_v27, 0.0 }
 0x416   : > { %v6006_v28 = vadd.f32 %v5974_v30, %v5511_v47  ;;  %v5512_v16 = vmax.f32 %v5480_v10, 0.0 }
 0x417   : > { %v6005_v8 = vadd.f32 %v5973_v15, %v5510_v37  ;;  %v6099_v46 = vpack.c.bf16 %v5510_v37, %v5509_v36 }
 0x418   : > { %v6038_v21 = vmax.f32 %v6006_v28, 0.0  ;;  %v6007_v20 = vadd.f32 %v5975_v32, %v5512_v16  ;;  %v6100_v34 = vpack.c.bf16 %v5512_v16, %v5511_v47 }
 0x419   : > { %v6037_v60 = vmax.f32 %v6005_v8, 0.0  ;;  %8099 = vmatmul.mubr.bf16.vlgmr.msra.gmra.mrb[168].mxu1 %v6099_v46 }
 0x41a   : > { %6070 = vst [vmem:[%s10443_s23 + $0x20] sm:$0xff] %v6038_v21  ;;  %v6039_v17 = vmax.f32 %v6007_v20, 0.0  ;;  %8102 = vmatprep.mubr.bf16.mxu1 %v6100_v34 }
 0x41b   : > { %6069 = vst [vmem:[%s10443_s23 + $0x18] sm:$0xff] %v6037_v60 }
 0x41c   : > { %6071 = vst [vmem:[%s10443_s23 + $0x28] sm:$0xff] %v6039_v17 }
 0x421   : > { %8103 = vmatmul.mubr.bf16.gmra.mrb[172].mxu1 %v10512_v55 }
 0x422   : > { %8106 = vmatprep.mubr.bf16.mxu1 %v10521_v7 }
 0x429   : > { %8107 = vmatmul.mubr.bf16.gmra.mrb[176].mxu1 %v10560_v54 }
 0x42a   : > { %8110 = vmatprep.mubr.bf16.mxu1 %v10546_v5 }
 0x431   : > { %8111 = vmatmul.mubr.bf16.gmra.mrb[180].mxu1 %v10606_v33 }
 0x432   : > { %8114 = vmatprep.mubr.bf16.mxu1 %v10615_v1 }
 0x439   : > { %8115 = vmatmul.mubr.bf16.gmra.mrb[184].mxu1 %v10633_v49 }
 0x43a   : > { %8118 = vmatprep.mubr.bf16.mxu1 %v10636_v11 }
 0x441   : > { %8119 = vmatmul.mubr.bf16.gmra.mrb[188].mxu1 %v10662_v29 }
 0x442   : > { %8122 = vmatprep.mubr.bf16.mxu1 %v10679_v39 }
 0x449   : > { %8123 = vmatmul.mubr.bf16.gmra.mrb[192].mxu1 %v10694_v58 }
 0x44a   : > { %8126 = vmatprep.mubr.bf16.mxu1 %v10697_v63 }
 0x451   : > { %8127 = vmatmul.mubr.bf16.gmra.mrb[196].mxu1 %v10716_v6 }
 0x4ec   : > { %v8100_v12 = vpop.f32.mrb[168].mxu1 }
 0x4ed   : > { %v6212_v55 = vpop.f32.mrb[169].mxu1 }
 0x4ee   : > { %v8101_v7 = vpop.f32.mrb[170].mxu1 }
 0x4ef   : > { %v7035_v5 = vpack.c.bf16 %v8101_v7, %v8100_v12  ;;  %v6215_v54 = vpop.f32.mrb[171].mxu1 }
 0x4f0   : > { %v7030_v33 = vpack.c.bf16 %v6215_v54, %v6212_v55 }
 0x4f1   : > { %7107 = vst [vmem:[%s10760_s25 + $0x8] sm:$0xff] %v7035_v5  }
 0x4f2   : > { %7031 = vst [vmem:[%s10760_s25] sm:$0xff] %v7030_v33  }
 0x4f4   : > { %v8104_v1 = vpop.f32.mrb[172].mxu1 }
 0x4f5   : > { %v6228_v49 = vpop.f32.mrb[173].mxu1 }
 0x4f6   : > { %v8105_v11 = vpop.f32.mrb[174].mxu1 }
 0x4f7   : > { %v7045_v29 = vpack.c.bf16 %v8105_v11, %v8104_v1  ;;  %v6231_v39 = vpop.f32.mrb[175].mxu1 }
 0x4f8   : > { %v7040_v58 = vpack.c.bf16 %v6231_v39, %v6228_v49 }
 0x4f9   : > { %7109 = vst [vmem:[%s10760_s25 + $0x18] sm:$0xff] %v7045_v29  }
 0x4fa   : > { %7108 = vst [vmem:[%s10760_s25 + $0x10] sm:$0xff] %v7040_v58  }
 0x4fc   : > { %v8108_v63 = vpop.f32.mrb[176].mxu1 }
 0x4fd   : > { %v6244_v6 = vpop.f32.mrb[177].mxu1 }
 0x4fe   : > { %v8109_v2 = vpop.f32.mrb[178].mxu1 }
 0x4ff   : > { %v7055_v19 = vpack.c.bf16 %v8109_v2, %v8108_v63  ;;  %v6247_v18 = vpop.f32.mrb[179].mxu1 }
 0x500   : > { %v7050_v43 = vpack.c.bf16 %v6247_v18, %v6244_v6 }
 0x501   : > { %7111 = vst [vmem:[%s10760_s25 + $0x28] sm:$0xff] %v7055_v19  }
 0x502   : > { %7110 = vst [vmem:[%s10760_s25 + $0x20] sm:$0xff] %v7050_v43  }
 0x504   : > { %v8112_v52 = vpop.f32.mrb[180].mxu1 }
 0x505   : > { %v6260_v62 = vpop.f32.mrb[181].mxu1 }
 0x506   : > { %v8113_v61 = vpop.f32.mrb[182].mxu1 }
 0x507   : > { %v7065_v9 = vpack.c.bf16 %v8113_v61, %v8112_v52  ;;  %v6263_v42 = vpop.f32.mrb[183].mxu1 }
 0x508   : > { %v7060_v36 = vpack.c.bf16 %v6263_v42, %v6260_v62 }
 0x509   : > { %7113 = vst [vmem:[%s10760_s25 + $0x38] sm:$0xff] %v7065_v9  }
 0x50a   : > { %7112 = vst [vmem:[%s10760_s25 + $0x30] sm:$0xff] %v7060_v36  }
 0x50c   : > { %v8116_v48 = vpop.f32.mrb[184].mxu1 }
 0x50d   : > { %v6276_v25 = vpop.f32.mrb[185].mxu1 }
 0x50e   : > { %v8117_v45 = vpop.f32.mrb[186].mxu1 }
 0x50f   : > { %v7075_v40 = vpack.c.bf16 %v8117_v45, %v8116_v48  ;;  %v6279_v41 = vpop.f32.mrb[187].mxu1 }
 0x510   : > { %v7070_v56 = vpack.c.bf16 %v6279_v41, %v6276_v25 }
 0x511   : > { %7115 = vst [vmem:[%s10760_s25 + $0x48] sm:$0xff] %v7075_v40  }
 0x512   : > { %7114 = vst [vmem:[%s10760_s25 + $0x40] sm:$0xff] %v7070_v56  }
 0x514   : > { %v8120_v24 = vpop.f32.mrb[188].mxu1 }
 0x515   : > { %v6292_v13 = vpop.f32.mrb[189].mxu1 }
 0x516   : > { %v8121_v0 = vpop.f32.mrb[190].mxu1 }
 0x517   : > { %v7085_v14 = vpack.c.bf16 %v8121_v0, %v8120_v24  ;;  %v6295_v51 = vpop.f32.mrb[191].mxu1 }
 0x518   : > { %v7080_v4 = vpack.c.bf16 %v6295_v51, %v6292_v13 }
 0x519   : > { %7117 = vst [vmem:[%s10760_s25 + $0x58] sm:$0xff] %v7085_v14  }
 0x51a   : > { %7116 = vst [vmem:[%s10760_s25 + $0x50] sm:$0xff] %v7080_v4  }
 0x51c   : > { %v8124_v50 = vpop.f32.mrb[192].mxu1 }
 0x51d   : > { %v6308_v3 = vpop.f32.mrb[193].mxu1 }
 0x51e   : > { %v8125_v26 = vpop.f32.mrb[194].mxu1 }
 0x51f   : > { %v7095_v44 = vpack.c.bf16 %v8125_v26, %v8124_v50  ;;  %v6311_v38 = vpop.f32.mrb[195].mxu1 }
 0x520   : > { %v7090_v31 = vpack.c.bf16 %v6311_v38, %v6308_v3 }
 0x521   : > { %7119 = vst [vmem:[%s10760_s25 + $0x68] sm:$0xff] %v7095_v44  }
 0x522   : > { %7118 = vst [vmem:[%s10760_s25 + $0x60] sm:$0xff] %v7090_v31  }
 0x524   : > { %v8128_v30 = vpop.f32.mrb[196].mxu1 }
 0x525   : > { %v6324_v22 = vpop.f32.mrb[197].mxu1 }
 0x526   : > { %v8129_v23 = vpop.f32.mrb[198].mxu1 }
 0x527   : > { %v7105_v35 = vpack.c.bf16 %v8129_v23, %v8128_v30  ;;  %v6327_v53 = vpop.f32.mrb[199].mxu1 }
 0x528   : > { %v7100_v15 = vpack.c.bf16 %v6327_v53, %v6324_v22 }
 0x529   : > { %7121 = vst [vmem:[%s10760_s25 + $0x78] sm:$0xff] %v7105_v35  }
 0x52a   : > { %7120 = vst [vmem:[%s10760_s25 + $0x70] sm:$0xff] %v7100_v15  }
 0x52b PF: > { %s22_s19 = sadd.s32 1, %s8677_s19   ;;  %s10977_s17 = smov %s8673_s18 }
 0x52c   : > { %p19_p5 = scmp.ge.s32.totalorder %s22_s19, 4   ;;  %s10978_s18 = smov %s10980_s20 }
 0x52e   :  { %21 = sbr.rel (!%p19_p5) target bundleno = 2 (0x2), region = 114 }

</bundles_post_ra>
